<compile_context>
chip_gen: v5e
topology: v5e:2x2
jax: 0.10.0
libtpu: 0.0.40
codegen_flags: <defaults>
</compile_context>

<pallas_src>
import jax
import jax.numpy as jnp
from jax.experimental import pallas as pl
from jax.experimental.pallas import tpu as pltpu

# ------------------------- small ViT configuration -------------------------
BATCH = 2
IN_CH = 3
IMG = 16
PATCH = 8
NUM_PATCHES = (IMG // PATCH) * (IMG // PATCH)      # 4
SEQ = NUM_PATCHES + 1                              # +1 class token -> 5
TOKENS = BATCH * SEQ                               # 10
HIDDEN = 32
HEADS = 4
HEAD_DIM = HIDDEN // HEADS                         # 8
MLP_DIM = 64
NUM_LAYERS = 2
NUM_CLASSES = 100
HEAD_PAD = 128                                     # lane-dense padded head width
LN_EPS = 1e-6                                      # torchvision ViT uses eps=1e-6
ATTN_SCALE = 1.0 / (HEAD_DIM ** 0.5)
MASK_NEG = -1e30                                   # cross-batch attention mask bias


# --------------------------- in-kernel helpers ------------------------------
def _layernorm(x, g, b):
    mean = jnp.mean(x, axis=-1, keepdims=True)
    var = jnp.mean(jnp.square(x - mean), axis=-1, keepdims=True)  # biased, like PyTorch
    return (x - mean) * jax.lax.rsqrt(var + LN_EPS) * g + b


def _erf(x):
    # Abramowitz & Stegun 7.1.26 rational approximation, |abs err| < 1.5e-7 (~f32 ulp).
    # TODO(synk): switch to jax.lax.erf once its Pallas/Mosaic lowering is guaranteed.
    p = 0.3275911
    a1, a2, a3, a4, a5 = (0.254829592, -0.284496736, 1.421413741,
                          -1.453152027, 1.061405429)
    ax = jnp.abs(x)
    t = 1.0 / (1.0 + p * ax)
    poly = ((((a5 * t + a4) * t + a3) * t + a2) * t + a1) * t
    y = 1.0 - poly * jnp.exp(-ax * ax)
    return jnp.where(x >= 0.0, y, -y)


def _gelu_exact(x):
    # nn.GELU() default (exact erf-GELU)
    return 0.5 * x * (1.0 + _erf(x * 0.7071067811865476))


# ------------------------------ fused kernel --------------------------------
def _vit_fused_kernel(
    patches_ref, mask_ref, conv_w_ref, conv_b_ref, cls_ref, pos_ref,
    ln1_g_ref, ln1_b_ref, qkv_w_ref, qkv_b_ref, out_w_ref, out_b_ref,
    ln2_g_ref, ln2_b_ref, mlp_w1_ref, mlp_b1_ref, mlp_w2_ref, mlp_b2_ref,
    lnf_g_ref, lnf_b_ref, head_w_ref, head_b_ref,
    logits_ref,
):
    f32 = jnp.float32

    # ---- patch embedding: Conv2d(stride=kernel=P) as a single matmul ----
    tok = jnp.dot(patches_ref[...], conv_w_ref[...],
                  preferred_element_type=f32) + conv_b_ref[...]            # (B*N, D)

    # ---- assemble [class token | patch tokens] + positional embedding ----
    # Register-resident residual stream h: (B*S, D) = (10, 32) = 2 vregs.
    cls_row = cls_ref[...] + pos_ref[0:1, :]                               # (1, D)
    pieces = []
    for b in range(BATCH):                                                 # static unroll
        pieces.append(cls_row)
        pieces.append(tok[b * NUM_PATCHES:(b + 1) * NUM_PATCHES, :]
                      + pos_ref[1:SEQ, :])
    h = jnp.concatenate(pieces, axis=0)                                    # (B*S, D)

    mask = mask_ref[...]                                                   # (B*S, B*S)

    # ---- encoder layers (statically unrolled; all weights already in VMEM) ----
    for l in range(NUM_LAYERS):
        # pre-LN multi-head self-attention; each head runs over both batch
        # images at once with a block-diagonal mask (no cross-batch attention).
        y = _layernorm(h, ln1_g_ref[l], ln1_b_ref[l])                      # (B*S, D)
        qkv = (jnp.dot(y, qkv_w_ref[l], preferred_element_type=f32)
               + qkv_b_ref[l])                                             # (B*S, 3D)
        # Slice Q/K/V as 32-lane chunks once per layer (ATTN_SCALE is already
        # folded into the Q weights/bias).
        q_all = qkv[:, 0:HIDDEN]
        k_all = qkv[:, HIDDEN:2 * HIDDEN]
        v_all = qkv[:, 2 * HIDDEN:3 * HIDDEN]

        head_outs = []
        for hd in range(HEADS):                                            # 4 bodies
            c0 = hd * HEAD_DIM
            q = q_all[:, c0:c0 + HEAD_DIM]                                 # (B*S, Dh)
            k = k_all[:, c0:c0 + HEAD_DIM]
            v = v_all[:, c0:c0 + HEAD_DIM]
            s = jax.lax.dot_general(
                q, k, (((1,), (1,)), ((), ())),
                preferred_element_type=f32) + mask                         # (B*S, B*S)
            s = s - jnp.max(s, axis=-1, keepdims=True)
            p = jnp.exp(s)
            p = p / jnp.sum(p, axis=-1, keepdims=True)                     # exact softmax
            head_outs.append(jnp.dot(p, v, preferred_element_type=f32))    # (B*S, Dh)

        # Heads are already in lane order: one concat + ONE out-proj matmul.
        o = jnp.concatenate(head_outs, axis=-1)                            # (B*S, D)
        attn = (jnp.dot(o, out_w_ref[l], preferred_element_type=f32)
                + out_b_ref[l])
        h = h + attn                                                       # residual

        # pre-LN MLP with exact-erf GELU, residual fused.
        y = _layernorm(h, ln2_g_ref[l], ln2_b_ref[l])
        m = jnp.dot(y, mlp_w1_ref[l], preferred_element_type=f32) + mlp_b1_ref[l]
        m = _gelu_exact(m)
        m = jnp.dot(m, mlp_w2_ref[l], preferred_element_type=f32) + mlp_b2_ref[l]
        h = h + m

    # ---- final LN + head on the class-token rows only ----
    cls_rows = jnp.concatenate([h[b * SEQ:b * SEQ + 1, :] for b in range(BATCH)],
                               axis=0)                                     # (B, D)
    y = _layernorm(cls_rows, lnf_g_ref[...], lnf_b_ref[...])
    logits_ref[...] = (jnp.dot(y, head_w_ref[...], preferred_element_type=f32)
                       + head_b_ref[...])                                  # (B, 128)


# ------------------------------- model glue ---------------------------------
def patchify(x, p):
    # NCHW image -> (B, num_patches, C*P*P), matching Conv2d(stride=kernel=P)
    # followed by torchvision's reshape/permute (row-major patches, (C,P,P) flatten).
    B, C, H, W = x.shape
    nh, nw = H // p, W // p
    x = x.reshape(B, C, nh, p, nw, p)
    x = x.transpose(0, 2, 4, 1, 3, 5)
    return x.reshape(B, nh * nw, C * p * p)


def prepare_params(params):
    """One-time repack into the fused kernel's layout: stack per-layer weights,
    transpose nn.Linear weights to (in, out), 2-D biases, lane-pad the head,
    fold the attention scale into Q, and build the block-diagonal attn mask."""
    L = NUM_LAYERS

    def stack(name, transpose=False):
        ws = [lyr[name] for lyr in params["layers"]]
        if transpose:
            ws = [w.T for w in ws]
        return jnp.stack(ws, axis=0)

    head_w = jnp.pad(params["head_w"].T, ((0, 0), (0, HEAD_PAD - NUM_CLASSES)))
    head_b = jnp.pad(params["head_b"], (0, HEAD_PAD - NUM_CLASSES)).reshape(1, HEAD_PAD)

    # Fold ATTN_SCALE into the Q columns (first HIDDEN outputs) of the packed QKV.
    qkv_w = stack("in_proj_w", transpose=True)                            # (L, D, 3D)
    qkv_w = qkv_w.at[:, :, :HIDDEN].multiply(ATTN_SCALE)
    qkv_b = stack("in_proj_b").reshape(L, 1, 3 * HIDDEN)
    qkv_b = qkv_b.at[:, :, :HIDDEN].multiply(ATTN_SCALE)

    # Block-diagonal additive mask: 0 within an image's rows/cols, -1e30 across images.
    batch_of_row = jnp.arange(TOKENS) // SEQ
    same = batch_of_row[:, None] == batch_of_row[None, :]
    attn_mask = jnp.where(same, 0.0, MASK_NEG).astype(jnp.float32)        # (B*S, B*S)

    return dict(
        conv_w=params["conv_w"].reshape(HIDDEN, -1).T,                # (C*P*P, D)
        conv_b=params["conv_b"].reshape(1, HIDDEN),
        cls=params["class_token"].reshape(1, HIDDEN),
        pos=params["pos_embedding"].reshape(SEQ, HIDDEN),
        ln1_g=stack("ln1_g").reshape(L, 1, HIDDEN),
        ln1_b=stack("ln1_b").reshape(L, 1, HIDDEN),
        qkv_w=qkv_w,                                                  # (L, D, 3D), Q pre-scaled
        qkv_b=qkv_b,                                                  # (L, 1, 3D), Q pre-scaled
        out_w=stack("out_proj_w", transpose=True),                    # (L, D, D)
        out_b=stack("out_proj_b").reshape(L, 1, HIDDEN),
        ln2_g=stack("ln2_g").reshape(L, 1, HIDDEN),
        ln2_b=stack("ln2_b").reshape(L, 1, HIDDEN),
        mlp_w1=stack("mlp_w1", transpose=True),                       # (L, D, MLP)
        mlp_b1=stack("mlp_b1").reshape(L, 1, MLP_DIM),
        mlp_w2=stack("mlp_w2", transpose=True),                       # (L, MLP, D)
        mlp_b2=stack("mlp_b2").reshape(L, 1, HIDDEN),
        lnf_g=params["ln_g"].reshape(1, HIDDEN),
        lnf_b=params["ln_b"].reshape(1, HIDDEN),
        head_w=head_w,                                                # (D, 128)
        head_b=head_b,                                                # (1, 128)
        attn_mask=attn_mask,                                          # (B*S, B*S)
    )


def vit_forward(pp, x):
    B = x.shape[0]
    assert B == BATCH
    patches = patchify(x, PATCH).reshape(B * NUM_PATCHES, IN_CH * PATCH * PATCH)

    logits_padded = pl.pallas_call(
        _vit_fused_kernel,
        out_shape=jax.ShapeDtypeStruct((B, HEAD_PAD), jnp.float32),
    )(
        patches, pp["attn_mask"],
        pp["conv_w"], pp["conv_b"], pp["cls"], pp["pos"],
        pp["ln1_g"], pp["ln1_b"], pp["qkv_w"], pp["qkv_b"],
        pp["out_w"], pp["out_b"], pp["ln2_g"], pp["ln2_b"],
        pp["mlp_w1"], pp["mlp_b1"], pp["mlp_w2"], pp["mlp_b2"],
        pp["lnf_g"], pp["lnf_b"], pp["head_w"], pp["head_b"],
    )
    return logits_padded[:, :NUM_CLASSES]


# --------------------------- deterministic params ---------------------------
def init_params(key):
    keys = iter(jax.random.split(key, 8 + 8 * NUM_LAYERS))

    def nrm(shape, std=0.02):
        return (std * jax.random.normal(next(keys), shape)).astype(jnp.float32)

    params = {
        "conv_w": nrm((HIDDEN, IN_CH, PATCH, PATCH)),
        "conv_b": nrm((HIDDEN,)),
        "class_token": nrm((1, 1, HIDDEN)),
        "pos_embedding": nrm((1, SEQ, HIDDEN)),
        "ln_g": jnp.ones((HIDDEN,), jnp.float32),
        "ln_b": jnp.zeros((HIDDEN,), jnp.float32),
        "head_w": nrm((NUM_CLASSES, HIDDEN)),    # new nn.Linear head (num_classes=100)
        "head_b": jnp.zeros((NUM_CLASSES,), jnp.float32),
        "layers": [],
    }
    for _ in range(NUM_LAYERS):
        params["layers"].append({
            "ln1_g": jnp.ones((HIDDEN,), jnp.float32),
            "ln1_b": jnp.zeros((HIDDEN,), jnp.float32),
            "in_proj_w": nrm((3 * HIDDEN, HIDDEN)),     # packed [q; k; v] like nn.MultiheadAttention
            "in_proj_b": nrm((3 * HIDDEN,)),
            "out_proj_w": nrm((HIDDEN, HIDDEN)),
            "out_proj_b": jnp.zeros((HIDDEN,), jnp.float32),
            "ln2_g": jnp.ones((HIDDEN,), jnp.float32),
            "ln2_b": jnp.zeros((HIDDEN,), jnp.float32),
            "mlp_w1": nrm((MLP_DIM, HIDDEN)),
            "mlp_b1": nrm((MLP_DIM,)),
            "mlp_w2": nrm((HIDDEN, MLP_DIM)),
            "mlp_b2": jnp.zeros((HIDDEN,), jnp.float32),
        })
    return params


if __name__ == "__main__":
    root = jax.random.PRNGKey(0)
    pkey, xkey = jax.random.split(root)
    params = init_params(pkey)
    pp = prepare_params(params)            # one-time repack into kernel layout
    x = jax.random.normal(xkey, (BATCH, IN_CH, IMG, IMG), dtype=jnp.float32)

    logits = jax.jit(vit_forward)(pp, x)
    logits = jax.block_until_ready(logits)

    assert logits.shape == (BATCH, NUM_CLASSES)
    assert bool(jnp.all(jnp.isfinite(logits)))
    print("KERNEL_OK")
</pallas_src>

<mosaic_0001>
module attributes {stable_mosaic.version = 11 : i64} {
  func.func @_vit_fused_kernel(%arg0: memref<8x192xf32, #tpu.memory_space<vmem>>, %arg1: memref<10x10xf32, #tpu.memory_space<vmem>>, %arg2: memref<192x32xf32, #tpu.memory_space<vmem>>, %arg3: memref<1x32xf32, #tpu.memory_space<vmem>>, %arg4: memref<1x32xf32, #tpu.memory_space<vmem>>, %arg5: memref<5x32xf32, #tpu.memory_space<vmem>>, %arg6: memref<2x1x32xf32, #tpu.memory_space<vmem>>, %arg7: memref<2x1x32xf32, #tpu.memory_space<vmem>>, %arg8: memref<2x32x96xf32, #tpu.memory_space<vmem>>, %arg9: memref<2x1x96xf32, #tpu.memory_space<vmem>>, %arg10: memref<2x32x32xf32, #tpu.memory_space<vmem>>, %arg11: memref<2x1x32xf32, #tpu.memory_space<vmem>>, %arg12: memref<2x1x32xf32, #tpu.memory_space<vmem>>, %arg13: memref<2x1x32xf32, #tpu.memory_space<vmem>>, %arg14: memref<2x32x64xf32, #tpu.memory_space<vmem>>, %arg15: memref<2x1x64xf32, #tpu.memory_space<vmem>>, %arg16: memref<2x64x32xf32, #tpu.memory_space<vmem>>, %arg17: memref<2x1x32xf32, #tpu.memory_space<vmem>>, %arg18: memref<1x32xf32, #tpu.memory_space<vmem>>, %arg19: memref<1x32xf32, #tpu.memory_space<vmem>>, %arg20: memref<32x128xf32, #tpu.memory_space<vmem>>, %arg21: memref<1x128xf32, #tpu.memory_space<vmem>>, %arg22: memref<2x128xf32, #tpu.memory_space<vmem>>) attributes {dimension_semantics = [], scalar_prefetch = 0 : i64, scratch_operands = 0 : i64, tpu.core_type = #tpu.core_type<tc>} {
    %c0 = arith.constant 0 : index
    %c0_0 = arith.constant 0 : index
    %0 = vector.load %arg0[%c0, %c0_0] : memref<8x192xf32, #tpu.memory_space<vmem>>, vector<8x192xf32>
    %c0_1 = arith.constant 0 : index
    %c0_2 = arith.constant 0 : index
    %1 = vector.load %arg2[%c0_1, %c0_2] : memref<192x32xf32, #tpu.memory_space<vmem>>, vector<192x32xf32>
    %cst = arith.constant dense<0.000000e+00> : vector<8x32xf32>
    %2 = tpu.matmul %0, %1, %cst {dimension_numbers = #tpu.dot_dimension_numbers<[1], [0], [0], [1], [0, 0, 1, 1], [], []>} : vector<8x192xf32>, vector<192x32xf32>, vector<8x32xf32> -> vector<8x32xf32>
    %c0_3 = arith.constant 0 : index
    %c0_4 = arith.constant 0 : index
    %3 = vector.load %arg3[%c0_3, %c0_4] : memref<1x32xf32, #tpu.memory_space<vmem>>, vector<1x32xf32>
    %4 = vector.broadcast %3 : vector<1x32xf32> to vector<8x32xf32>
    %5 = arith.addf %2, %4 : vector<8x32xf32>
    %c0_5 = arith.constant 0 : index
    %c0_6 = arith.constant 0 : index
    %6 = vector.load %arg4[%c0_5, %c0_6] : memref<1x32xf32, #tpu.memory_space<vmem>>, vector<1x32xf32>
    %c0_7 = arith.constant 0 : index
    %c0_8 = arith.constant 0 : index
    %7 = vector.load %arg5[%c0_7, %c0_8] : memref<5x32xf32, #tpu.memory_space<vmem>>, vector<1x32xf32>
    %8 = arith.addf %6, %7 : vector<1x32xf32>
    %9 = vector.extract_strided_slice %5 {offsets = [0, 0], sizes = [4, 32], strides = [1, 1]} : vector<8x32xf32> to vector<4x32xf32>
    %c1 = arith.constant 1 : index
    %c0_9 = arith.constant 0 : index
    %10 = vector.load %arg5[%c1, %c0_9] : memref<5x32xf32, #tpu.memory_space<vmem>>, vector<4x32xf32>
    %11 = arith.addf %9, %10 : vector<4x32xf32>
    %12 = vector.extract_strided_slice %5 {offsets = [4, 0], sizes = [4, 32], strides = [1, 1]} : vector<8x32xf32> to vector<4x32xf32>
    %c1_10 = arith.constant 1 : index
    %c0_11 = arith.constant 0 : index
    %13 = vector.load %arg5[%c1_10, %c0_11] : memref<5x32xf32, #tpu.memory_space<vmem>>, vector<4x32xf32>
    %14 = arith.addf %12, %13 : vector<4x32xf32>
    %15 = tpu.concatenate %8, %11, %8, %14 in 0 : vector<1x32xf32>, vector<4x32xf32>, vector<1x32xf32>, vector<4x32xf32> -> vector<10x32xf32>
    %c0_12 = arith.constant 0 : index
    %c0_13 = arith.constant 0 : index
    %16 = vector.load %arg1[%c0_12, %c0_13] : memref<10x10xf32, #tpu.memory_space<vmem>>, vector<10x10xf32>
    %c0_14 = arith.constant 0 : index
    %c0_15 = arith.constant 0 : index
    %c0_16 = arith.constant 0 : index
    %17 = vector.load %arg6[%c0_14, %c0_15, %c0_16] : memref<2x1x32xf32, #tpu.memory_space<vmem>>, vector<1x1x32xf32>
    %18 = vector.shape_cast %17 : vector<1x1x32xf32> to vector<1x32xf32>
    %c0_17 = arith.constant 0 : index
    %c0_18 = arith.constant 0 : index
    %c0_19 = arith.constant 0 : index
    %19 = vector.load %arg7[%c0_17, %c0_18, %c0_19] : memref<2x1x32xf32, #tpu.memory_space<vmem>>, vector<1x1x32xf32>
    %20 = vector.shape_cast %19 : vector<1x1x32xf32> to vector<1x32xf32>
    %cst_20 = arith.constant dense<0.000000e+00> : vector<10xf32>
    %21 = vector.multi_reduction <add>, %15, %cst_20 [1] : vector<10x32xf32> to vector<10xf32>
    %22 = vector.shape_cast %21 : vector<10xf32> to vector<10x1xf32>
    %cst_21 = arith.constant 3.200000e+01 : f32
    %23 = vector.broadcast %cst_21 : f32 to vector<10x1xf32>
    %24 = arith.divf %22, %23 : vector<10x1xf32>
    %25 = vector.broadcast %24 : vector<10x1xf32> to vector<10x32xf32>
    %26 = arith.subf %15, %25 : vector<10x32xf32>
    %27 = arith.mulf %26, %26 : vector<10x32xf32>
    %cst_22 = arith.constant dense<0.000000e+00> : vector<10xf32>
    %28 = vector.multi_reduction <add>, %27, %cst_22 [1] : vector<10x32xf32> to vector<10xf32>
    %29 = vector.shape_cast %28 : vector<10xf32> to vector<10x1xf32>
    %cst_23 = arith.constant 3.200000e+01 : f32
    %30 = vector.broadcast %cst_23 : f32 to vector<10x1xf32>
    %31 = arith.divf %29, %30 : vector<10x1xf32>
    %32 = vector.broadcast %24 : vector<10x1xf32> to vector<10x32xf32>
    %33 = arith.subf %15, %32 : vector<10x32xf32>
    %cst_24 = arith.constant 9.99999997E-7 : f32
    %34 = vector.broadcast %cst_24 : f32 to vector<10x1xf32>
    %35 = arith.addf %31, %34 : vector<10x1xf32>
    %36 = math.rsqrt %35 : vector<10x1xf32>
    %37 = vector.broadcast %36 : vector<10x1xf32> to vector<10x32xf32>
    %38 = arith.mulf %33, %37 : vector<10x32xf32>
    %39 = vector.broadcast %18 : vector<1x32xf32> to vector<10x32xf32>
    %40 = arith.mulf %38, %39 : vector<10x32xf32>
    %41 = vector.broadcast %20 : vector<1x32xf32> to vector<10x32xf32>
    %42 = arith.addf %40, %41 : vector<10x32xf32>
    %c0_25 = arith.constant 0 : index
    %c0_26 = arith.constant 0 : index
    %c0_27 = arith.constant 0 : index
    %43 = vector.load %arg8[%c0_25, %c0_26, %c0_27] : memref<2x32x96xf32, #tpu.memory_space<vmem>>, vector<1x32x96xf32>
    %44 = vector.shape_cast %43 : vector<1x32x96xf32> to vector<32x96xf32>
    %cst_28 = arith.constant dense<0.000000e+00> : vector<10x96xf32>
    %45 = tpu.matmul %42, %44, %cst_28 {dimension_numbers = #tpu.dot_dimension_numbers<[1], [0], [0], [1], [0, 0, 1, 1], [], []>} : vector<10x32xf32>, vector<32x96xf32>, vector<10x96xf32> -> vector<10x96xf32>
    %c0_29 = arith.constant 0 : index
    %c0_30 = arith.constant 0 : index
    %c0_31 = arith.constant 0 : index
    %46 = vector.load %arg9[%c0_29, %c0_30, %c0_31] : memref<2x1x96xf32, #tpu.memory_space<vmem>>, vector<1x1x96xf32>
    %47 = vector.shape_cast %46 : vector<1x1x96xf32> to vector<1x96xf32>
    %48 = vector.broadcast %47 : vector<1x96xf32> to vector<10x96xf32>
    %49 = arith.addf %45, %48 : vector<10x96xf32>
    %50 = vector.extract_strided_slice %49 {offsets = [0, 0], sizes = [10, 32], strides = [1, 1]} : vector<10x96xf32> to vector<10x32xf32>
    %51 = vector.extract_strided_slice %49 {offsets = [0, 32], sizes = [10, 32], strides = [1, 1]} : vector<10x96xf32> to vector<10x32xf32>
    %52 = vector.extract_strided_slice %49 {offsets = [0, 64], sizes = [10, 32], strides = [1, 1]} : vector<10x96xf32> to vector<10x32xf32>
    %53 = vector.extract_strided_slice %50 {offsets = [0, 0], sizes = [10, 8], strides = [1, 1]} : vector<10x32xf32> to vector<10x8xf32>
    %54 = vector.extract_strided_slice %51 {offsets = [0, 0], sizes = [10, 8], strides = [1, 1]} : vector<10x32xf32> to vector<10x8xf32>
    %55 = vector.extract_strided_slice %52 {offsets = [0, 0], sizes = [10, 8], strides = [1, 1]} : vector<10x32xf32> to vector<10x8xf32>
    %cst_32 = arith.constant dense<0.000000e+00> : vector<10x10xf32>
    %56 = tpu.matmul %53, %54, %cst_32 {dimension_numbers = #tpu.dot_dimension_numbers<[1], [1], [0], [0], [0, 0, 1, 0], [], []>} : vector<10x8xf32>, vector<10x8xf32>, vector<10x10xf32> -> vector<10x10xf32>
    %57 = arith.addf %56, %16 : vector<10x10xf32>
    %cst_33 = arith.constant dense<0xFF800000> : vector<10xf32>
    %58 = vector.multi_reduction <maximumf>, %57, %cst_33 [1] : vector<10x10xf32> to vector<10xf32>
    %59 = vector.shape_cast %58 : vector<10xf32> to vector<10x1xf32>
    %60 = vector.broadcast %59 : vector<10x1xf32> to vector<10x10xf32>
    %61 = arith.subf %57, %60 : vector<10x10xf32>
    %62 = math.exp %61 : vector<10x10xf32>
    %cst_34 = arith.constant dense<0.000000e+00> : vector<10xf32>
    %63 = vector.multi_reduction <add>, %62, %cst_34 [1] : vector<10x10xf32> to vector<10xf32>
    %64 = vector.shape_cast %63 : vector<10xf32> to vector<10x1xf32>
    %65 = vector.broadcast %64 : vector<10x1xf32> to vector<10x10xf32>
    %66 = arith.divf %62, %65 : vector<10x10xf32>
    %cst_35 = arith.constant dense<0.000000e+00> : vector<10x8xf32>
    %67 = tpu.matmul %66, %55, %cst_35 {dimension_numbers = #tpu.dot_dimension_numbers<[1], [0], [0], [1], [0, 0, 1, 1], [], []>} : vector<10x10xf32>, vector<10x8xf32>, vector<10x8xf32> -> vector<10x8xf32>
    %68 = vector.extract_strided_slice %50 {offsets = [0, 8], sizes = [10, 8], strides = [1, 1]} : vector<10x32xf32> to vector<10x8xf32>
    %69 = vector.extract_strided_slice %51 {offsets = [0, 8], sizes = [10, 8], strides = [1, 1]} : vector<10x32xf32> to vector<10x8xf32>
    %70 = vector.extract_strided_slice %52 {offsets = [0, 8], sizes = [10, 8], strides = [1, 1]} : vector<10x32xf32> to vector<10x8xf32>
    %cst_36 = arith.constant dense<0.000000e+00> : vector<10x10xf32>
    %71 = tpu.matmul %68, %69, %cst_36 {dimension_numbers = #tpu.dot_dimension_numbers<[1], [1], [0], [0], [0, 0, 1, 0], [], []>} : vector<10x8xf32>, vector<10x8xf32>, vector<10x10xf32> -> vector<10x10xf32>
    %72 = arith.addf %71, %16 : vector<10x10xf32>
    %cst_37 = arith.constant dense<0xFF800000> : vector<10xf32>
    %73 = vector.multi_reduction <maximumf>, %72, %cst_37 [1] : vector<10x10xf32> to vector<10xf32>
    %74 = vector.shape_cast %73 : vector<10xf32> to vector<10x1xf32>
    %75 = vector.broadcast %74 : vector<10x1xf32> to vector<10x10xf32>
    %76 = arith.subf %72, %75 : vector<10x10xf32>
    %77 = math.exp %76 : vector<10x10xf32>
    %cst_38 = arith.constant dense<0.000000e+00> : vector<10xf32>
    %78 = vector.multi_reduction <add>, %77, %cst_38 [1] : vector<10x10xf32> to vector<10xf32>
    %79 = vector.shape_cast %78 : vector<10xf32> to vector<10x1xf32>
    %80 = vector.broadcast %79 : vector<10x1xf32> to vector<10x10xf32>
    %81 = arith.divf %77, %80 : vector<10x10xf32>
    %cst_39 = arith.constant dense<0.000000e+00> : vector<10x8xf32>
    %82 = tpu.matmul %81, %70, %cst_39 {dimension_numbers = #tpu.dot_dimension_numbers<[1], [0], [0], [1], [0, 0, 1, 1], [], []>} : vector<10x10xf32>, vector<10x8xf32>, vector<10x8xf32> -> vector<10x8xf32>
    %83 = vector.extract_strided_slice %50 {offsets = [0, 16], sizes = [10, 8], strides = [1, 1]} : vector<10x32xf32> to vector<10x8xf32>
    %84 = vector.extract_strided_slice %51 {offsets = [0, 16], sizes = [10, 8], strides = [1, 1]} : vector<10x32xf32> to vector<10x8xf32>
    %85 = vector.extract_strided_slice %52 {offsets = [0, 16], sizes = [10, 8], strides = [1, 1]} : vector<10x32xf32> to vector<10x8xf32>
    %cst_40 = arith.constant dense<0.000000e+00> : vector<10x10xf32>
    %86 = tpu.matmul %83, %84, %cst_40 {dimension_numbers = #tpu.dot_dimension_numbers<[1], [1], [0], [0], [0, 0, 1, 0], [], []>} : vector<10x8xf32>, vector<10x8xf32>, vector<10x10xf32> -> vector<10x10xf32>
    %87 = arith.addf %86, %16 : vector<10x10xf32>
    %cst_41 = arith.constant dense<0xFF800000> : vector<10xf32>
    %88 = vector.multi_reduction <maximumf>, %87, %cst_41 [1] : vector<10x10xf32> to vector<10xf32>
    %89 = vector.shape_cast %88 : vector<10xf32> to vector<10x1xf32>
    %90 = vector.broadcast %89 : vector<10x1xf32> to vector<10x10xf32>
    %91 = arith.subf %87, %90 : vector<10x10xf32>
    %92 = math.exp %91 : vector<10x10xf32>
    %cst_42 = arith.constant dense<0.000000e+00> : vector<10xf32>
    %93 = vector.multi_reduction <add>, %92, %cst_42 [1] : vector<10x10xf32> to vector<10xf32>
    %94 = vector.shape_cast %93 : vector<10xf32> to vector<10x1xf32>
    %95 = vector.broadcast %94 : vector<10x1xf32> to vector<10x10xf32>
    %96 = arith.divf %92, %95 : vector<10x10xf32>
    %cst_43 = arith.constant dense<0.000000e+00> : vector<10x8xf32>
    %97 = tpu.matmul %96, %85, %cst_43 {dimension_numbers = #tpu.dot_dimension_numbers<[1], [0], [0], [1], [0, 0, 1, 1], [], []>} : vector<10x10xf32>, vector<10x8xf32>, vector<10x8xf32> -> vector<10x8xf32>
    %98 = vector.extract_strided_slice %50 {offsets = [0, 24], sizes = [10, 8], strides = [1, 1]} : vector<10x32xf32> to vector<10x8xf32>
    %99 = vector.extract_strided_slice %51 {offsets = [0, 24], sizes = [10, 8], strides = [1, 1]} : vector<10x32xf32> to vector<10x8xf32>
    %100 = vector.extract_strided_slice %52 {offsets = [0, 24], sizes = [10, 8], strides = [1, 1]} : vector<10x32xf32> to vector<10x8xf32>
    %cst_44 = arith.constant dense<0.000000e+00> : vector<10x10xf32>
    %101 = tpu.matmul %98, %99, %cst_44 {dimension_numbers = #tpu.dot_dimension_numbers<[1], [1], [0], [0], [0, 0, 1, 0], [], []>} : vector<10x8xf32>, vector<10x8xf32>, vector<10x10xf32> -> vector<10x10xf32>
    %102 = arith.addf %101, %16 : vector<10x10xf32>
    %cst_45 = arith.constant dense<0xFF800000> : vector<10xf32>
    %103 = vector.multi_reduction <maximumf>, %102, %cst_45 [1] : vector<10x10xf32> to vector<10xf32>
    %104 = vector.shape_cast %103 : vector<10xf32> to vector<10x1xf32>
    %105 = vector.broadcast %104 : vector<10x1xf32> to vector<10x10xf32>
    %106 = arith.subf %102, %105 : vector<10x10xf32>
    %107 = math.exp %106 : vector<10x10xf32>
    %cst_46 = arith.constant dense<0.000000e+00> : vector<10xf32>
    %108 = vector.multi_reduction <add>, %107, %cst_46 [1] : vector<10x10xf32> to vector<10xf32>
    %109 = vector.shape_cast %108 : vector<10xf32> to vector<10x1xf32>
    %110 = vector.broadcast %109 : vector<10x1xf32> to vector<10x10xf32>
    %111 = arith.divf %107, %110 : vector<10x10xf32>
    %cst_47 = arith.constant dense<0.000000e+00> : vector<10x8xf32>
    %112 = tpu.matmul %111, %100, %cst_47 {dimension_numbers = #tpu.dot_dimension_numbers<[1], [0], [0], [1], [0, 0, 1, 1], [], []>} : vector<10x10xf32>, vector<10x8xf32>, vector<10x8xf32> -> vector<10x8xf32>
    %113 = tpu.concatenate %67, %82, %97, %112 in 1 : vector<10x8xf32>, vector<10x8xf32>, vector<10x8xf32>, vector<10x8xf32> -> vector<10x32xf32>
    %c0_48 = arith.constant 0 : index
    %c0_49 = arith.constant 0 : index
    %c0_50 = arith.constant 0 : index
    %114 = vector.load %arg10[%c0_48, %c0_49, %c0_50] : memref<2x32x32xf32, #tpu.memory_space<vmem>>, vector<1x32x32xf32>
    %115 = vector.shape_cast %114 : vector<1x32x32xf32> to vector<32x32xf32>
    %cst_51 = arith.constant dense<0.000000e+00> : vector<10x32xf32>
    %116 = tpu.matmul %113, %115, %cst_51 {dimension_numbers = #tpu.dot_dimension_numbers<[1], [0], [0], [1], [0, 0, 1, 1], [], []>} : vector<10x32xf32>, vector<32x32xf32>, vector<10x32xf32> -> vector<10x32xf32>
    %c0_52 = arith.constant 0 : index
    %c0_53 = arith.constant 0 : index
    %c0_54 = arith.constant 0 : index
    %117 = vector.load %arg11[%c0_52, %c0_53, %c0_54] : memref<2x1x32xf32, #tpu.memory_space<vmem>>, vector<1x1x32xf32>
    %118 = vector.shape_cast %117 : vector<1x1x32xf32> to vector<1x32xf32>
    %119 = vector.broadcast %118 : vector<1x32xf32> to vector<10x32xf32>
    %120 = arith.addf %116, %119 : vector<10x32xf32>
    %121 = arith.addf %15, %120 : vector<10x32xf32>
    %c0_55 = arith.constant 0 : index
    %c0_56 = arith.constant 0 : index
    %c0_57 = arith.constant 0 : index
    %122 = vector.load %arg12[%c0_55, %c0_56, %c0_57] : memref<2x1x32xf32, #tpu.memory_space<vmem>>, vector<1x1x32xf32>
    %123 = vector.shape_cast %122 : vector<1x1x32xf32> to vector<1x32xf32>
    %c0_58 = arith.constant 0 : index
    %c0_59 = arith.constant 0 : index
    %c0_60 = arith.constant 0 : index
    %124 = vector.load %arg13[%c0_58, %c0_59, %c0_60] : memref<2x1x32xf32, #tpu.memory_space<vmem>>, vector<1x1x32xf32>
    %125 = vector.shape_cast %124 : vector<1x1x32xf32> to vector<1x32xf32>
    %cst_61 = arith.constant dense<0.000000e+00> : vector<10xf32>
    %126 = vector.multi_reduction <add>, %121, %cst_61 [1] : vector<10x32xf32> to vector<10xf32>
    %127 = vector.shape_cast %126 : vector<10xf32> to vector<10x1xf32>
    %cst_62 = arith.constant 3.200000e+01 : f32
    %128 = vector.broadcast %cst_62 : f32 to vector<10x1xf32>
    %129 = arith.divf %127, %128 : vector<10x1xf32>
    %130 = vector.broadcast %129 : vector<10x1xf32> to vector<10x32xf32>
    %131 = arith.subf %121, %130 : vector<10x32xf32>
    %132 = arith.mulf %131, %131 : vector<10x32xf32>
    %cst_63 = arith.constant dense<0.000000e+00> : vector<10xf32>
    %133 = vector.multi_reduction <add>, %132, %cst_63 [1] : vector<10x32xf32> to vector<10xf32>
    %134 = vector.shape_cast %133 : vector<10xf32> to vector<10x1xf32>
    %cst_64 = arith.constant 3.200000e+01 : f32
    %135 = vector.broadcast %cst_64 : f32 to vector<10x1xf32>
    %136 = arith.divf %134, %135 : vector<10x1xf32>
    %137 = vector.broadcast %129 : vector<10x1xf32> to vector<10x32xf32>
    %138 = arith.subf %121, %137 : vector<10x32xf32>
    %cst_65 = arith.constant 9.99999997E-7 : f32
    %139 = vector.broadcast %cst_65 : f32 to vector<10x1xf32>
    %140 = arith.addf %136, %139 : vector<10x1xf32>
    %141 = math.rsqrt %140 : vector<10x1xf32>
    %142 = vector.broadcast %141 : vector<10x1xf32> to vector<10x32xf32>
    %143 = arith.mulf %138, %142 : vector<10x32xf32>
    %144 = vector.broadcast %123 : vector<1x32xf32> to vector<10x32xf32>
    %145 = arith.mulf %143, %144 : vector<10x32xf32>
    %146 = vector.broadcast %125 : vector<1x32xf32> to vector<10x32xf32>
    %147 = arith.addf %145, %146 : vector<10x32xf32>
    %c0_66 = arith.constant 0 : index
    %c0_67 = arith.constant 0 : index
    %c0_68 = arith.constant 0 : index
    %148 = vector.load %arg14[%c0_66, %c0_67, %c0_68] : memref<2x32x64xf32, #tpu.memory_space<vmem>>, vector<1x32x64xf32>
    %149 = vector.shape_cast %148 : vector<1x32x64xf32> to vector<32x64xf32>
    %cst_69 = arith.constant dense<0.000000e+00> : vector<10x64xf32>
    %150 = tpu.matmul %147, %149, %cst_69 {dimension_numbers = #tpu.dot_dimension_numbers<[1], [0], [0], [1], [0, 0, 1, 1], [], []>} : vector<10x32xf32>, vector<32x64xf32>, vector<10x64xf32> -> vector<10x64xf32>
    %c0_70 = arith.constant 0 : index
    %c0_71 = arith.constant 0 : index
    %c0_72 = arith.constant 0 : index
    %151 = vector.load %arg15[%c0_70, %c0_71, %c0_72] : memref<2x1x64xf32, #tpu.memory_space<vmem>>, vector<1x1x64xf32>
    %152 = vector.shape_cast %151 : vector<1x1x64xf32> to vector<1x64xf32>
    %153 = vector.broadcast %152 : vector<1x64xf32> to vector<10x64xf32>
    %154 = arith.addf %150, %153 : vector<10x64xf32>
    %cst_73 = arith.constant 5.000000e-01 : f32
    %155 = vector.broadcast %cst_73 : f32 to vector<10x64xf32>
    %156 = arith.mulf %155, %154 : vector<10x64xf32>
    %cst_74 = arith.constant 0.707106769 : f32
    %157 = vector.broadcast %cst_74 : f32 to vector<10x64xf32>
    %158 = arith.mulf %154, %157 : vector<10x64xf32>
    %159 = math.absf %158 : vector<10x64xf32>
    %cst_75 = arith.constant 0.327591091 : f32
    %160 = vector.broadcast %cst_75 : f32 to vector<10x64xf32>
    %161 = arith.mulf %160, %159 : vector<10x64xf32>
    %cst_76 = arith.constant 1.000000e+00 : f32
    %162 = vector.broadcast %cst_76 : f32 to vector<10x64xf32>
    %163 = arith.addf %162, %161 : vector<10x64xf32>
    %cst_77 = arith.constant 1.000000e+00 : f32
    %164 = vector.broadcast %cst_77 : f32 to vector<10x64xf32>
    %165 = arith.divf %164, %163 : vector<10x64xf32>
    %cst_78 = arith.constant 1.06140542 : f32
    %166 = vector.broadcast %cst_78 : f32 to vector<10x64xf32>
    %167 = arith.mulf %166, %165 : vector<10x64xf32>
    %cst_79 = arith.constant -1.45315206 : f32
    %168 = vector.broadcast %cst_79 : f32 to vector<10x64xf32>
    %169 = arith.addf %167, %168 : vector<10x64xf32>
    %170 = arith.mulf %169, %165 : vector<10x64xf32>
    %cst_80 = arith.constant 1.42141378 : f32
    %171 = vector.broadcast %cst_80 : f32 to vector<10x64xf32>
    %172 = arith.addf %170, %171 : vector<10x64xf32>
    %173 = arith.mulf %172, %165 : vector<10x64xf32>
    %cst_81 = arith.constant -0.284496725 : f32
    %174 = vector.broadcast %cst_81 : f32 to vector<10x64xf32>
    %175 = arith.addf %173, %174 : vector<10x64xf32>
    %176 = arith.mulf %175, %165 : vector<10x64xf32>
    %cst_82 = arith.constant 0.254829586 : f32
    %177 = vector.broadcast %cst_82 : f32 to vector<10x64xf32>
    %178 = arith.addf %176, %177 : vector<10x64xf32>
    %179 = arith.mulf %178, %165 : vector<10x64xf32>
    %cst_83 = arith.constant 0.000000e+00 : f32
    %180 = vector.broadcast %cst_83 : f32 to vector<10x64xf32>
    %181 = arith.subf %180, %159 : vector<10x64xf32>
    %182 = arith.mulf %181, %159 : vector<10x64xf32>
    %183 = math.exp %182 : vector<10x64xf32>
    %184 = arith.mulf %179, %183 : vector<10x64xf32>
    %cst_84 = arith.constant 1.000000e+00 : f32
    %185 = vector.broadcast %cst_84 : f32 to vector<10x64xf32>
    %186 = arith.subf %185, %184 : vector<10x64xf32>
    %cst_85 = arith.constant 0.000000e+00 : f32
    %187 = vector.broadcast %cst_85 : f32 to vector<10x64xf32>
    %188 = arith.cmpf oge, %158, %187 : vector<10x64xf32>
    %cst_86 = arith.constant 0.000000e+00 : f32
    %189 = vector.broadcast %cst_86 : f32 to vector<10x64xf32>
    %190 = arith.subf %189, %186 : vector<10x64xf32>
    %191 = arith.select %188, %186, %190 : vector<10x64xi1>, vector<10x64xf32>
    %cst_87 = arith.constant 1.000000e+00 : f32
    %192 = vector.broadcast %cst_87 : f32 to vector<10x64xf32>
    %193 = arith.addf %192, %191 : vector<10x64xf32>
    %194 = arith.mulf %156, %193 : vector<10x64xf32>
    %c0_88 = arith.constant 0 : index
    %c0_89 = arith.constant 0 : index
    %c0_90 = arith.constant 0 : index
    %195 = vector.load %arg16[%c0_88, %c0_89, %c0_90] : memref<2x64x32xf32, #tpu.memory_space<vmem>>, vector<1x64x32xf32>
    %196 = vector.shape_cast %195 : vector<1x64x32xf32> to vector<64x32xf32>
    %cst_91 = arith.constant dense<0.000000e+00> : vector<10x32xf32>
    %197 = tpu.matmul %194, %196, %cst_91 {dimension_numbers = #tpu.dot_dimension_numbers<[1], [0], [0], [1], [0, 0, 1, 1], [], []>} : vector<10x64xf32>, vector<64x32xf32>, vector<10x32xf32> -> vector<10x32xf32>
    %c0_92 = arith.constant 0 : index
    %c0_93 = arith.constant 0 : index
    %c0_94 = arith.constant 0 : index
    %198 = vector.load %arg17[%c0_92, %c0_93, %c0_94] : memref<2x1x32xf32, #tpu.memory_space<vmem>>, vector<1x1x32xf32>
    %199 = vector.shape_cast %198 : vector<1x1x32xf32> to vector<1x32xf32>
    %200 = vector.broadcast %199 : vector<1x32xf32> to vector<10x32xf32>
    %201 = arith.addf %197, %200 : vector<10x32xf32>
    %202 = arith.addf %121, %201 : vector<10x32xf32>
    %c1_95 = arith.constant 1 : index
    %c0_96 = arith.constant 0 : index
    %c0_97 = arith.constant 0 : index
    %203 = vector.load %arg6[%c1_95, %c0_96, %c0_97] : memref<2x1x32xf32, #tpu.memory_space<vmem>>, vector<1x1x32xf32>
    %204 = vector.shape_cast %203 : vector<1x1x32xf32> to vector<1x32xf32>
    %c1_98 = arith.constant 1 : index
    %c0_99 = arith.constant 0 : index
    %c0_100 = arith.constant 0 : index
    %205 = vector.load %arg7[%c1_98, %c0_99, %c0_100] : memref<2x1x32xf32, #tpu.memory_space<vmem>>, vector<1x1x32xf32>
    %206 = vector.shape_cast %205 : vector<1x1x32xf32> to vector<1x32xf32>
    %cst_101 = arith.constant dense<0.000000e+00> : vector<10xf32>
    %207 = vector.multi_reduction <add>, %202, %cst_101 [1] : vector<10x32xf32> to vector<10xf32>
    %208 = vector.shape_cast %207 : vector<10xf32> to vector<10x1xf32>
    %cst_102 = arith.constant 3.200000e+01 : f32
    %209 = vector.broadcast %cst_102 : f32 to vector<10x1xf32>
    %210 = arith.divf %208, %209 : vector<10x1xf32>
    %211 = vector.broadcast %210 : vector<10x1xf32> to vector<10x32xf32>
    %212 = arith.subf %202, %211 : vector<10x32xf32>
    %213 = arith.mulf %212, %212 : vector<10x32xf32>
    %cst_103 = arith.constant dense<0.000000e+00> : vector<10xf32>
    %214 = vector.multi_reduction <add>, %213, %cst_103 [1] : vector<10x32xf32> to vector<10xf32>
    %215 = vector.shape_cast %214 : vector<10xf32> to vector<10x1xf32>
    %cst_104 = arith.constant 3.200000e+01 : f32
    %216 = vector.broadcast %cst_104 : f32 to vector<10x1xf32>
    %217 = arith.divf %215, %216 : vector<10x1xf32>
    %218 = vector.broadcast %210 : vector<10x1xf32> to vector<10x32xf32>
    %219 = arith.subf %202, %218 : vector<10x32xf32>
    %cst_105 = arith.constant 9.99999997E-7 : f32
    %220 = vector.broadcast %cst_105 : f32 to vector<10x1xf32>
    %221 = arith.addf %217, %220 : vector<10x1xf32>
    %222 = math.rsqrt %221 : vector<10x1xf32>
    %223 = vector.broadcast %222 : vector<10x1xf32> to vector<10x32xf32>
    %224 = arith.mulf %219, %223 : vector<10x32xf32>
    %225 = vector.broadcast %204 : vector<1x32xf32> to vector<10x32xf32>
    %226 = arith.mulf %224, %225 : vector<10x32xf32>
    %227 = vector.broadcast %206 : vector<1x32xf32> to vector<10x32xf32>
    %228 = arith.addf %226, %227 : vector<10x32xf32>
    %c1_106 = arith.constant 1 : index
    %c0_107 = arith.constant 0 : index
    %c0_108 = arith.constant 0 : index
    %229 = vector.load %arg8[%c1_106, %c0_107, %c0_108] : memref<2x32x96xf32, #tpu.memory_space<vmem>>, vector<1x32x96xf32>
    %230 = vector.shape_cast %229 : vector<1x32x96xf32> to vector<32x96xf32>
    %cst_109 = arith.constant dense<0.000000e+00> : vector<10x96xf32>
    %231 = tpu.matmul %228, %230, %cst_109 {dimension_numbers = #tpu.dot_dimension_numbers<[1], [0], [0], [1], [0, 0, 1, 1], [], []>} : vector<10x32xf32>, vector<32x96xf32>, vector<10x96xf32> -> vector<10x96xf32>
    %c1_110 = arith.constant 1 : index
    %c0_111 = arith.constant 0 : index
    %c0_112 = arith.constant 0 : index
    %232 = vector.load %arg9[%c1_110, %c0_111, %c0_112] : memref<2x1x96xf32, #tpu.memory_space<vmem>>, vector<1x1x96xf32>
    %233 = vector.shape_cast %232 : vector<1x1x96xf32> to vector<1x96xf32>
    %234 = vector.broadcast %233 : vector<1x96xf32> to vector<10x96xf32>
    %235 = arith.addf %231, %234 : vector<10x96xf32>
    %236 = vector.extract_strided_slice %235 {offsets = [0, 0], sizes = [10, 32], strides = [1, 1]} : vector<10x96xf32> to vector<10x32xf32>
    %237 = vector.extract_strided_slice %235 {offsets = [0, 32], sizes = [10, 32], strides = [1, 1]} : vector<10x96xf32> to vector<10x32xf32>
    %238 = vector.extract_strided_slice %235 {offsets = [0, 64], sizes = [10, 32], strides = [1, 1]} : vector<10x96xf32> to vector<10x32xf32>
    %239 = vector.extract_strided_slice %236 {offsets = [0, 0], sizes = [10, 8], strides = [1, 1]} : vector<10x32xf32> to vector<10x8xf32>
    %240 = vector.extract_strided_slice %237 {offsets = [0, 0], sizes = [10, 8], strides = [1, 1]} : vector<10x32xf32> to vector<10x8xf32>
    %241 = vector.extract_strided_slice %238 {offsets = [0, 0], sizes = [10, 8], strides = [1, 1]} : vector<10x32xf32> to vector<10x8xf32>
    %cst_113 = arith.constant dense<0.000000e+00> : vector<10x10xf32>
    %242 = tpu.matmul %239, %240, %cst_113 {dimension_numbers = #tpu.dot_dimension_numbers<[1], [1], [0], [0], [0, 0, 1, 0], [], []>} : vector<10x8xf32>, vector<10x8xf32>, vector<10x10xf32> -> vector<10x10xf32>
    %243 = arith.addf %242, %16 : vector<10x10xf32>
    %cst_114 = arith.constant dense<0xFF800000> : vector<10xf32>
    %244 = vector.multi_reduction <maximumf>, %243, %cst_114 [1] : vector<10x10xf32> to vector<10xf32>
    %245 = vector.shape_cast %244 : vector<10xf32> to vector<10x1xf32>
    %246 = vector.broadcast %245 : vector<10x1xf32> to vector<10x10xf32>
    %247 = arith.subf %243, %246 : vector<10x10xf32>
    %248 = math.exp %247 : vector<10x10xf32>
    %cst_115 = arith.constant dense<0.000000e+00> : vector<10xf32>
    %249 = vector.multi_reduction <add>, %248, %cst_115 [1] : vector<10x10xf32> to vector<10xf32>
    %250 = vector.shape_cast %249 : vector<10xf32> to vector<10x1xf32>
    %251 = vector.broadcast %250 : vector<10x1xf32> to vector<10x10xf32>
    %252 = arith.divf %248, %251 : vector<10x10xf32>
    %cst_116 = arith.constant dense<0.000000e+00> : vector<10x8xf32>
    %253 = tpu.matmul %252, %241, %cst_116 {dimension_numbers = #tpu.dot_dimension_numbers<[1], [0], [0], [1], [0, 0, 1, 1], [], []>} : vector<10x10xf32>, vector<10x8xf32>, vector<10x8xf32> -> vector<10x8xf32>
    %254 = vector.extract_strided_slice %236 {offsets = [0, 8], sizes = [10, 8], strides = [1, 1]} : vector<10x32xf32> to vector<10x8xf32>
    %255 = vector.extract_strided_slice %237 {offsets = [0, 8], sizes = [10, 8], strides = [1, 1]} : vector<10x32xf32> to vector<10x8xf32>
    %256 = vector.extract_strided_slice %238 {offsets = [0, 8], sizes = [10, 8], strides = [1, 1]} : vector<10x32xf32> to vector<10x8xf32>
    %cst_117 = arith.constant dense<0.000000e+00> : vector<10x10xf32>
    %257 = tpu.matmul %254, %255, %cst_117 {dimension_numbers = #tpu.dot_dimension_numbers<[1], [1], [0], [0], [0, 0, 1, 0], [], []>} : vector<10x8xf32>, vector<10x8xf32>, vector<10x10xf32> -> vector<10x10xf32>
    %258 = arith.addf %257, %16 : vector<10x10xf32>
    %cst_118 = arith.constant dense<0xFF800000> : vector<10xf32>
    %259 = vector.multi_reduction <maximumf>, %258, %cst_118 [1] : vector<10x10xf32> to vector<10xf32>
    %260 = vector.shape_cast %259 : vector<10xf32> to vector<10x1xf32>
    %261 = vector.broadcast %260 : vector<10x1xf32> to vector<10x10xf32>
    %262 = arith.subf %258, %261 : vector<10x10xf32>
    %263 = math.exp %262 : vector<10x10xf32>
    %cst_119 = arith.constant dense<0.000000e+00> : vector<10xf32>
    %264 = vector.multi_reduction <add>, %263, %cst_119 [1] : vector<10x10xf32> to vector<10xf32>
    %265 = vector.shape_cast %264 : vector<10xf32> to vector<10x1xf32>
    %266 = vector.broadcast %265 : vector<10x1xf32> to vector<10x10xf32>
    %267 = arith.divf %263, %266 : vector<10x10xf32>
    %cst_120 = arith.constant dense<0.000000e+00> : vector<10x8xf32>
    %268 = tpu.matmul %267, %256, %cst_120 {dimension_numbers = #tpu.dot_dimension_numbers<[1], [0], [0], [1], [0, 0, 1, 1], [], []>} : vector<10x10xf32>, vector<10x8xf32>, vector<10x8xf32> -> vector<10x8xf32>
    %269 = vector.extract_strided_slice %236 {offsets = [0, 16], sizes = [10, 8], strides = [1, 1]} : vector<10x32xf32> to vector<10x8xf32>
    %270 = vector.extract_strided_slice %237 {offsets = [0, 16], sizes = [10, 8], strides = [1, 1]} : vector<10x32xf32> to vector<10x8xf32>
    %271 = vector.extract_strided_slice %238 {offsets = [0, 16], sizes = [10, 8], strides = [1, 1]} : vector<10x32xf32> to vector<10x8xf32>
    %cst_121 = arith.constant dense<0.000000e+00> : vector<10x10xf32>
    %272 = tpu.matmul %269, %270, %cst_121 {dimension_numbers = #tpu.dot_dimension_numbers<[1], [1], [0], [0], [0, 0, 1, 0], [], []>} : vector<10x8xf32>, vector<10x8xf32>, vector<10x10xf32> -> vector<10x10xf32>
    %273 = arith.addf %272, %16 : vector<10x10xf32>
    %cst_122 = arith.constant dense<0xFF800000> : vector<10xf32>
    %274 = vector.multi_reduction <maximumf>, %273, %cst_122 [1] : vector<10x10xf32> to vector<10xf32>
    %275 = vector.shape_cast %274 : vector<10xf32> to vector<10x1xf32>
    %276 = vector.broadcast %275 : vector<10x1xf32> to vector<10x10xf32>
    %277 = arith.subf %273, %276 : vector<10x10xf32>
    %278 = math.exp %277 : vector<10x10xf32>
    %cst_123 = arith.constant dense<0.000000e+00> : vector<10xf32>
    %279 = vector.multi_reduction <add>, %278, %cst_123 [1] : vector<10x10xf32> to vector<10xf32>
    %280 = vector.shape_cast %279 : vector<10xf32> to vector<10x1xf32>
    %281 = vector.broadcast %280 : vector<10x1xf32> to vector<10x10xf32>
    %282 = arith.divf %278, %281 : vector<10x10xf32>
    %cst_124 = arith.constant dense<0.000000e+00> : vector<10x8xf32>
    %283 = tpu.matmul %282, %271, %cst_124 {dimension_numbers = #tpu.dot_dimension_numbers<[1], [0], [0], [1], [0, 0, 1, 1], [], []>} : vector<10x10xf32>, vector<10x8xf32>, vector<10x8xf32> -> vector<10x8xf32>
    %284 = vector.extract_strided_slice %236 {offsets = [0, 24], sizes = [10, 8], strides = [1, 1]} : vector<10x32xf32> to vector<10x8xf32>
    %285 = vector.extract_strided_slice %237 {offsets = [0, 24], sizes = [10, 8], strides = [1, 1]} : vector<10x32xf32> to vector<10x8xf32>
    %286 = vector.extract_strided_slice %238 {offsets = [0, 24], sizes = [10, 8], strides = [1, 1]} : vector<10x32xf32> to vector<10x8xf32>
    %cst_125 = arith.constant dense<0.000000e+00> : vector<10x10xf32>
    %287 = tpu.matmul %284, %285, %cst_125 {dimension_numbers = #tpu.dot_dimension_numbers<[1], [1], [0], [0], [0, 0, 1, 0], [], []>} : vector<10x8xf32>, vector<10x8xf32>, vector<10x10xf32> -> vector<10x10xf32>
    %288 = arith.addf %287, %16 : vector<10x10xf32>
    %cst_126 = arith.constant dense<0xFF800000> : vector<10xf32>
    %289 = vector.multi_reduction <maximumf>, %288, %cst_126 [1] : vector<10x10xf32> to vector<10xf32>
    %290 = vector.shape_cast %289 : vector<10xf32> to vector<10x1xf32>
    %291 = vector.broadcast %290 : vector<10x1xf32> to vector<10x10xf32>
    %292 = arith.subf %288, %291 : vector<10x10xf32>
    %293 = math.exp %292 : vector<10x10xf32>
    %cst_127 = arith.constant dense<0.000000e+00> : vector<10xf32>
    %294 = vector.multi_reduction <add>, %293, %cst_127 [1] : vector<10x10xf32> to vector<10xf32>
    %295 = vector.shape_cast %294 : vector<10xf32> to vector<10x1xf32>
    %296 = vector.broadcast %295 : vector<10x1xf32> to vector<10x10xf32>
    %297 = arith.divf %293, %296 : vector<10x10xf32>
    %cst_128 = arith.constant dense<0.000000e+00> : vector<10x8xf32>
    %298 = tpu.matmul %297, %286, %cst_128 {dimension_numbers = #tpu.dot_dimension_numbers<[1], [0], [0], [1], [0, 0, 1, 1], [], []>} : vector<10x10xf32>, vector<10x8xf32>, vector<10x8xf32> -> vector<10x8xf32>
    %299 = tpu.concatenate %253, %268, %283, %298 in 1 : vector<10x8xf32>, vector<10x8xf32>, vector<10x8xf32>, vector<10x8xf32> -> vector<10x32xf32>
    %c1_129 = arith.constant 1 : index
    %c0_130 = arith.constant 0 : index
    %c0_131 = arith.constant 0 : index
    %300 = vector.load %arg10[%c1_129, %c0_130, %c0_131] : memref<2x32x32xf32, #tpu.memory_space<vmem>>, vector<1x32x32xf32>
    %301 = vector.shape_cast %300 : vector<1x32x32xf32> to vector<32x32xf32>
    %cst_132 = arith.constant dense<0.000000e+00> : vector<10x32xf32>
    %302 = tpu.matmul %299, %301, %cst_132 {dimension_numbers = #tpu.dot_dimension_numbers<[1], [0], [0], [1], [0, 0, 1, 1], [], []>} : vector<10x32xf32>, vector<32x32xf32>, vector<10x32xf32> -> vector<10x32xf32>
    %c1_133 = arith.constant 1 : index
    %c0_134 = arith.constant 0 : index
    %c0_135 = arith.constant 0 : index
    %303 = vector.load %arg11[%c1_133, %c0_134, %c0_135] : memref<2x1x32xf32, #tpu.memory_space<vmem>>, vector<1x1x32xf32>
    %304 = vector.shape_cast %303 : vector<1x1x32xf32> to vector<1x32xf32>
    %305 = vector.broadcast %304 : vector<1x32xf32> to vector<10x32xf32>
    %306 = arith.addf %302, %305 : vector<10x32xf32>
    %307 = arith.addf %202, %306 : vector<10x32xf32>
    %c1_136 = arith.constant 1 : index
    %c0_137 = arith.constant 0 : index
    %c0_138 = arith.constant 0 : index
    %308 = vector.load %arg12[%c1_136, %c0_137, %c0_138] : memref<2x1x32xf32, #tpu.memory_space<vmem>>, vector<1x1x32xf32>
    %309 = vector.shape_cast %308 : vector<1x1x32xf32> to vector<1x32xf32>
    %c1_139 = arith.constant 1 : index
    %c0_140 = arith.constant 0 : index
    %c0_141 = arith.constant 0 : index
    %310 = vector.load %arg13[%c1_139, %c0_140, %c0_141] : memref<2x1x32xf32, #tpu.memory_space<vmem>>, vector<1x1x32xf32>
    %311 = vector.shape_cast %310 : vector<1x1x32xf32> to vector<1x32xf32>
    %cst_142 = arith.constant dense<0.000000e+00> : vector<10xf32>
    %312 = vector.multi_reduction <add>, %307, %cst_142 [1] : vector<10x32xf32> to vector<10xf32>
    %313 = vector.shape_cast %312 : vector<10xf32> to vector<10x1xf32>
    %cst_143 = arith.constant 3.200000e+01 : f32
    %314 = vector.broadcast %cst_143 : f32 to vector<10x1xf32>
    %315 = arith.divf %313, %314 : vector<10x1xf32>
    %316 = vector.broadcast %315 : vector<10x1xf32> to vector<10x32xf32>
    %317 = arith.subf %307, %316 : vector<10x32xf32>
    %318 = arith.mulf %317, %317 : vector<10x32xf32>
    %cst_144 = arith.constant dense<0.000000e+00> : vector<10xf32>
    %319 = vector.multi_reduction <add>, %318, %cst_144 [1] : vector<10x32xf32> to vector<10xf32>
    %320 = vector.shape_cast %319 : vector<10xf32> to vector<10x1xf32>
    %cst_145 = arith.constant 3.200000e+01 : f32
    %321 = vector.broadcast %cst_145 : f32 to vector<10x1xf32>
    %322 = arith.divf %320, %321 : vector<10x1xf32>
    %323 = vector.broadcast %315 : vector<10x1xf32> to vector<10x32xf32>
    %324 = arith.subf %307, %323 : vector<10x32xf32>
    %cst_146 = arith.constant 9.99999997E-7 : f32
    %325 = vector.broadcast %cst_146 : f32 to vector<10x1xf32>
    %326 = arith.addf %322, %325 : vector<10x1xf32>
    %327 = math.rsqrt %326 : vector<10x1xf32>
    %328 = vector.broadcast %327 : vector<10x1xf32> to vector<10x32xf32>
    %329 = arith.mulf %324, %328 : vector<10x32xf32>
    %330 = vector.broadcast %309 : vector<1x32xf32> to vector<10x32xf32>
    %331 = arith.mulf %329, %330 : vector<10x32xf32>
    %332 = vector.broadcast %311 : vector<1x32xf32> to vector<10x32xf32>
    %333 = arith.addf %331, %332 : vector<10x32xf32>
    %c1_147 = arith.constant 1 : index
    %c0_148 = arith.constant 0 : index
    %c0_149 = arith.constant 0 : index
    %334 = vector.load %arg14[%c1_147, %c0_148, %c0_149] : memref<2x32x64xf32, #tpu.memory_space<vmem>>, vector<1x32x64xf32>
    %335 = vector.shape_cast %334 : vector<1x32x64xf32> to vector<32x64xf32>
    %cst_150 = arith.constant dense<0.000000e+00> : vector<10x64xf32>
    %336 = tpu.matmul %333, %335, %cst_150 {dimension_numbers = #tpu.dot_dimension_numbers<[1], [0], [0], [1], [0, 0, 1, 1], [], []>} : vector<10x32xf32>, vector<32x64xf32>, vector<10x64xf32> -> vector<10x64xf32>
    %c1_151 = arith.constant 1 : index
    %c0_152 = arith.constant 0 : index
    %c0_153 = arith.constant 0 : index
    %337 = vector.load %arg15[%c1_151, %c0_152, %c0_153] : memref<2x1x64xf32, #tpu.memory_space<vmem>>, vector<1x1x64xf32>
    %338 = vector.shape_cast %337 : vector<1x1x64xf32> to vector<1x64xf32>
    %339 = vector.broadcast %338 : vector<1x64xf32> to vector<10x64xf32>
    %340 = arith.addf %336, %339 : vector<10x64xf32>
    %cst_154 = arith.constant 5.000000e-01 : f32
    %341 = vector.broadcast %cst_154 : f32 to vector<10x64xf32>
    %342 = arith.mulf %341, %340 : vector<10x64xf32>
    %cst_155 = arith.constant 0.707106769 : f32
    %343 = vector.broadcast %cst_155 : f32 to vector<10x64xf32>
    %344 = arith.mulf %340, %343 : vector<10x64xf32>
    %345 = math.absf %344 : vector<10x64xf32>
    %cst_156 = arith.constant 0.327591091 : f32
    %346 = vector.broadcast %cst_156 : f32 to vector<10x64xf32>
    %347 = arith.mulf %346, %345 : vector<10x64xf32>
    %cst_157 = arith.constant 1.000000e+00 : f32
    %348 = vector.broadcast %cst_157 : f32 to vector<10x64xf32>
    %349 = arith.addf %348, %347 : vector<10x64xf32>
    %cst_158 = arith.constant 1.000000e+00 : f32
    %350 = vector.broadcast %cst_158 : f32 to vector<10x64xf32>
    %351 = arith.divf %350, %349 : vector<10x64xf32>
    %cst_159 = arith.constant 1.06140542 : f32
    %352 = vector.broadcast %cst_159 : f32 to vector<10x64xf32>
    %353 = arith.mulf %352, %351 : vector<10x64xf32>
    %cst_160 = arith.constant -1.45315206 : f32
    %354 = vector.broadcast %cst_160 : f32 to vector<10x64xf32>
    %355 = arith.addf %353, %354 : vector<10x64xf32>
    %356 = arith.mulf %355, %351 : vector<10x64xf32>
    %cst_161 = arith.constant 1.42141378 : f32
    %357 = vector.broadcast %cst_161 : f32 to vector<10x64xf32>
    %358 = arith.addf %356, %357 : vector<10x64xf32>
    %359 = arith.mulf %358, %351 : vector<10x64xf32>
    %cst_162 = arith.constant -0.284496725 : f32
    %360 = vector.broadcast %cst_162 : f32 to vector<10x64xf32>
    %361 = arith.addf %359, %360 : vector<10x64xf32>
    %362 = arith.mulf %361, %351 : vector<10x64xf32>
    %cst_163 = arith.constant 0.254829586 : f32
    %363 = vector.broadcast %cst_163 : f32 to vector<10x64xf32>
    %364 = arith.addf %362, %363 : vector<10x64xf32>
    %365 = arith.mulf %364, %351 : vector<10x64xf32>
    %cst_164 = arith.constant 0.000000e+00 : f32
    %366 = vector.broadcast %cst_164 : f32 to vector<10x64xf32>
    %367 = arith.subf %366, %345 : vector<10x64xf32>
    %368 = arith.mulf %367, %345 : vector<10x64xf32>
    %369 = math.exp %368 : vector<10x64xf32>
    %370 = arith.mulf %365, %369 : vector<10x64xf32>
    %cst_165 = arith.constant 1.000000e+00 : f32
    %371 = vector.broadcast %cst_165 : f32 to vector<10x64xf32>
    %372 = arith.subf %371, %370 : vector<10x64xf32>
    %cst_166 = arith.constant 0.000000e+00 : f32
    %373 = vector.broadcast %cst_166 : f32 to vector<10x64xf32>
    %374 = arith.cmpf oge, %344, %373 : vector<10x64xf32>
    %cst_167 = arith.constant 0.000000e+00 : f32
    %375 = vector.broadcast %cst_167 : f32 to vector<10x64xf32>
    %376 = arith.subf %375, %372 : vector<10x64xf32>
    %377 = arith.select %374, %372, %376 : vector<10x64xi1>, vector<10x64xf32>
    %cst_168 = arith.constant 1.000000e+00 : f32
    %378 = vector.broadcast %cst_168 : f32 to vector<10x64xf32>
    %379 = arith.addf %378, %377 : vector<10x64xf32>
    %380 = arith.mulf %342, %379 : vector<10x64xf32>
    %c1_169 = arith.constant 1 : index
    %c0_170 = arith.constant 0 : index
    %c0_171 = arith.constant 0 : index
    %381 = vector.load %arg16[%c1_169, %c0_170, %c0_171] : memref<2x64x32xf32, #tpu.memory_space<vmem>>, vector<1x64x32xf32>
    %382 = vector.shape_cast %381 : vector<1x64x32xf32> to vector<64x32xf32>
    %cst_172 = arith.constant dense<0.000000e+00> : vector<10x32xf32>
    %383 = tpu.matmul %380, %382, %cst_172 {dimension_numbers = #tpu.dot_dimension_numbers<[1], [0], [0], [1], [0, 0, 1, 1], [], []>} : vector<10x64xf32>, vector<64x32xf32>, vector<10x32xf32> -> vector<10x32xf32>
    %c1_173 = arith.constant 1 : index
    %c0_174 = arith.constant 0 : index
    %c0_175 = arith.constant 0 : index
    %384 = vector.load %arg17[%c1_173, %c0_174, %c0_175] : memref<2x1x32xf32, #tpu.memory_space<vmem>>, vector<1x1x32xf32>
    %385 = vector.shape_cast %384 : vector<1x1x32xf32> to vector<1x32xf32>
    %386 = vector.broadcast %385 : vector<1x32xf32> to vector<10x32xf32>
    %387 = arith.addf %383, %386 : vector<10x32xf32>
    %388 = arith.addf %307, %387 : vector<10x32xf32>
    %389 = vector.extract_strided_slice %388 {offsets = [0, 0], sizes = [1, 32], strides = [1, 1]} : vector<10x32xf32> to vector<1x32xf32>
    %390 = vector.extract_strided_slice %388 {offsets = [5, 0], sizes = [1, 32], strides = [1, 1]} : vector<10x32xf32> to vector<1x32xf32>
    %391 = tpu.concatenate %389, %390 in 0 : vector<1x32xf32>, vector<1x32xf32> -> vector<2x32xf32>
    %c0_176 = arith.constant 0 : index
    %c0_177 = arith.constant 0 : index
    %392 = vector.load %arg18[%c0_176, %c0_177] : memref<1x32xf32, #tpu.memory_space<vmem>>, vector<1x32xf32>
    %c0_178 = arith.constant 0 : index
    %c0_179 = arith.constant 0 : index
    %393 = vector.load %arg19[%c0_178, %c0_179] : memref<1x32xf32, #tpu.memory_space<vmem>>, vector<1x32xf32>
    %cst_180 = arith.constant dense<0.000000e+00> : vector<2xf32>
    %394 = vector.multi_reduction <add>, %391, %cst_180 [1] : vector<2x32xf32> to vector<2xf32>
    %395 = vector.shape_cast %394 : vector<2xf32> to vector<2x1xf32>
    %cst_181 = arith.constant 3.200000e+01 : f32
    %396 = vector.broadcast %cst_181 : f32 to vector<2x1xf32>
    %397 = arith.divf %395, %396 : vector<2x1xf32>
    %398 = vector.broadcast %397 : vector<2x1xf32> to vector<2x32xf32>
    %399 = arith.subf %391, %398 : vector<2x32xf32>
    %400 = arith.mulf %399, %399 : vector<2x32xf32>
    %cst_182 = arith.constant dense<0.000000e+00> : vector<2xf32>
    %401 = vector.multi_reduction <add>, %400, %cst_182 [1] : vector<2x32xf32> to vector<2xf32>
    %402 = vector.shape_cast %401 : vector<2xf32> to vector<2x1xf32>
    %cst_183 = arith.constant 3.200000e+01 : f32
    %403 = vector.broadcast %cst_183 : f32 to vector<2x1xf32>
    %404 = arith.divf %402, %403 : vector<2x1xf32>
    %405 = vector.broadcast %397 : vector<2x1xf32> to vector<2x32xf32>
    %406 = arith.subf %391, %405 : vector<2x32xf32>
    %cst_184 = arith.constant 9.99999997E-7 : f32
    %407 = vector.broadcast %cst_184 : f32 to vector<2x1xf32>
    %408 = arith.addf %404, %407 : vector<2x1xf32>
    %409 = math.rsqrt %408 : vector<2x1xf32>
    %410 = vector.broadcast %409 : vector<2x1xf32> to vector<2x32xf32>
    %411 = arith.mulf %406, %410 : vector<2x32xf32>
    %412 = vector.broadcast %392 : vector<1x32xf32> to vector<2x32xf32>
    %413 = arith.mulf %411, %412 : vector<2x32xf32>
    %414 = vector.broadcast %393 : vector<1x32xf32> to vector<2x32xf32>
    %415 = arith.addf %413, %414 : vector<2x32xf32>
    %c0_185 = arith.constant 0 : index
    %c0_186 = arith.constant 0 : index
    %416 = vector.load %arg20[%c0_185, %c0_186] : memref<32x128xf32, #tpu.memory_space<vmem>>, vector<32x128xf32>
    %cst_187 = arith.constant dense<0.000000e+00> : vector<2x128xf32>
    %417 = tpu.matmul %415, %416, %cst_187 {dimension_numbers = #tpu.dot_dimension_numbers<[1], [0], [0], [1], [0, 0, 1, 1], [], []>} : vector<2x32xf32>, vector<32x128xf32>, vector<2x128xf32> -> vector<2x128xf32>
    %c0_188 = arith.constant 0 : index
    %c0_189 = arith.constant 0 : index
    %418 = vector.load %arg21[%c0_188, %c0_189] : memref<1x128xf32, #tpu.memory_space<vmem>>, vector<1x128xf32>
    %419 = vector.broadcast %418 : vector<1x128xf32> to vector<2x128xf32>
    %420 = arith.addf %417, %419 : vector<2x128xf32>
    %c0_190 = arith.constant 0 : index
    %c0_191 = arith.constant 0 : index
    %421 = vector.load %arg22[%c0_190, %c0_191] : memref<2x128xf32, #tpu.memory_space<vmem>>, vector<2x128xf32>
    tpu.vector_store %arg22[%c0_190, %c0_191], %420 {strides = array<i32>} : memref<2x128xf32, #tpu.memory_space<vmem>>, vector<2x128xf32>,
    return
  }
}

</mosaic_0001>

<bundles_post_ra>
// kernel: vit_forward.1
= control target key start
LH: loop header
LB: loop body
LE: loop exit
PB: predicated region body
PF: predicated region fallthrough
CT: control target
= control target key end

     0   :  { %s3137_s0 = inlined_call_operand.vmem [shape: f32[8,192], index: 0, kind: input, shape index: {}]   ;;  %s3138_s1 = inlined_call_operand.vmem [shape: f32[10,10], index: 1, kind: input, shape index: {}]   ;;  %s3139_s2 = inlined_call_operand.vmem [shape: f32[192,32], index: 2, kind: input, shape index: {}]   ;;  %s3140_s3 = inlined_call_operand.vmem [shape: f32[1,32], index: 3, kind: input, shape index: {}]   ;;  %s3141_s4 = inlined_call_operand.vmem [shape: f32[1,32], index: 4, kind: input, shape index: {}]   ;;  %s3142_s5 = inlined_call_operand.vmem [shape: f32[5,32], index: 5, kind: input, shape index: {}]   ;;  %s3143_s6 = inlined_call_operand.vmem [shape: f32[2,1,32], index: 6, kind: input, shape index: {}]   ;;  %s3144_s7 = inlined_call_operand.vmem [shape: f32[2,1,32], index: 7, kind: input, shape index: {}]   ;;  %s3145_s8 = inlined_call_operand.vmem [shape: f32[2,32,96], index: 8, kind: input, shape index: {}]   ;;  %s3146_s9 = inlined_call_operand.vmem [shape: f32[2,1,96], index: 9, kind: input, shape index: {}]   ;;  %s3147_s10 = inlined_call_operand.vmem [shape: f32[2,32,32], index: 10, kind: input, shape index: {}]   ;;  %s3148_s11 = inlined_call_operand.vmem [shape: f32[2,1,32], index: 11, kind: input, shape index: {}]   ;;  %s3149_s12 = inlined_call_operand.vmem [shape: f32[2,1,32], index: 12, kind: input, shape index: {}]   ;;  %s3150_s13 = inlined_call_operand.vmem [shape: f32[2,1,32], index: 13, kind: input, shape index: {}]   ;;  %s3151_s14 = inlined_call_operand.vmem [shape: f32[2,32,64], index: 14, kind: input, shape index: {}]   ;;  %s3152_s15 = inlined_call_operand.vmem [shape: f32[2,1,64], index: 15, kind: input, shape index: {}]   ;;  %s3153_s16 = inlined_call_operand.vmem [shape: f32[2,64,32], index: 16, kind: input, shape index: {}]   ;;  %s3154_s17 = inlined_call_operand.vmem [shape: f32[2,1,32], index: 17, kind: input, shape index: {}]   ;;  %s3155_s18 = inlined_call_operand.vmem [shape: f32[1,32], index: 18, kind: input, shape index: {}]   ;;  %s3156_s19 = inlined_call_operand.vmem [shape: f32[1,32], index: 19, kind: input, shape index: {}]   ;;  %s3157_s20 = inlined_call_operand.vmem [shape: f32[32,128], index: 20, kind: input, shape index: {}]   ;;  %s3158_s21 = inlined_call_operand.vmem [shape: f32[1,128], index: 21, kind: input, shape index: {}]   ;;  %s3159_s22 = inlined_call_operand.hbm [shape: f32[2,128], index: 22, kind: output, shape index: {}]  }
   0x1   :  { %3187 = sst [smem:[#allocation5_spill]] %s3137_s0 }
   0x2   :  { %3188 = sst [smem:[#allocation6_spill]] %s3138_s1 }
   0x3   :  { %3189 = sst [smem:[#allocation7_spill]] %s3139_s2 }
   0x4   :  { %3190 = sst [smem:[#allocation8_spill]] %s3140_s3 }
   0x5   :  { %3191 = sst [smem:[#allocation9_spill]] %s3141_s4 }
   0x6   :  { %3192 = sst [smem:[#allocation10_spill]] %s3142_s5 }
   0x7   :  { %3193 = sst [smem:[#allocation11_spill]] %s3143_s6 }
   0x8   :  { %s3194_s29 = sld [smem:[#allocation7_spill]] }
   0xe   :  { %v89_v0 = vld [vmem:[%s3194_s29 + $0x78] sm:$0xff]  ;;  %v88_v1 = vld [vmem:[%s3194_s29 + $0x70] sm:$0xff]  ;;  %v87_v2 = vld [vmem:[%s3194_s29 + $0x68] sm:$0xff] }
   0xf   :  { %106 = vmatpush.msra.mxu0 %v89_v0  ;;  %v97_v3 = vld [vmem:[%s3194_s29 + $0xb8] sm:$0xff]  ;;  %v86_v4 = vld [vmem:[%s3194_s29 + $0x60] sm:$0xff]  ;;  %v96_v5 = vld [vmem:[%s3194_s29 + $0xb0] sm:$0xff] }
  0x10   :  { %134 = vmatpush.msra.mxu1 %v97_v3  ;;  %v95_v6 = vld [vmem:[%s3194_s29 + $0xa8] sm:$0xff]  ;;  %v85_v7 = vld [vmem:[%s3194_s29 + $0x58] sm:$0xff]  ;;  %v84_v8 = vld [vmem:[%s3194_s29 + $0x50] sm:$0xff] }
  0x11   :  { %107 = vmatpush.msra.mxu0 %v88_v1  ;;  %v94_v9 = vld [vmem:[%s3194_s29 + $0xa0] sm:$0xff]  ;;  %v83_v10 = vld [vmem:[%s3194_s29 + $0x48] sm:$0xff]  ;;  %v93_v11 = vld [vmem:[%s3194_s29 + $0x98] sm:$0xff] }
  0x12   :  { %135 = vmatpush.msra.mxu1 %v96_v5  ;;  %v92_v12 = vld [vmem:[%s3194_s29 + $0x90] sm:$0xff]  ;;  %v82_v13 = vld [vmem:[%s3194_s29 + $0x40] sm:$0xff]  ;;  %v91_v14 = vld [vmem:[%s3194_s29 + $0x88] sm:$0xff] }
  0x13   :  { %108 = vmatpush.msra.mxu0 %v87_v2  ;;  %v81_v15 = vld [vmem:[%s3194_s29 + $0x38] sm:$0xff]  ;;  %v90_v16 = vld [vmem:[%s3194_s29 + $0x80] sm:$0xff] }
  0x14   :  { %136 = vmatpush.msra.mxu1 %v95_v6 }
  0x15   :  { %109 = vmatpush.msra.mxu0 %v86_v4 }
  0x16   :  { %137 = vmatpush.msra.mxu1 %v94_v9 }
  0x17   :  { %110 = vmatpush.msra.mxu0 %v85_v7 }
  0x18   :  { %138 = vmatpush.msra.mxu1 %v93_v11 }
  0x19   :  { %111 = vmatpush.msra.mxu0 %v84_v8 }
  0x1a   :  { %139 = vmatpush.msra.mxu1 %v92_v12 }
  0x1b   :  { %112 = vmatpush.msra.mxu0 %v83_v10 }
  0x1d   :  { %113 = vmatpush.msra.mxu0 %v82_v13 }
  0x1e   :  { %27 = vsyncpa [#allocation3], 0  ;;  %v80_v17 = vld [vmem:[%s3194_s29 + $0x30] sm:$0xff]  ;;  %140 = vmatpush.msra.mxu1 %v91_v14  ;;  %s3195_s25 = sld [smem:[#allocation5_spill]]  ;;  %vm3184_vm0 = vcmask 523264   ;;  %v79_v19 = vld [vmem:[%s3194_s29 + $0x28] sm:$0xff] }
  0x1f   :  { %114 = vmatpush.msra.mxu0 %v81_v15  ;;  %v78_v20 = vld [vmem:[%s3194_s29 + $0x20] sm:$0xff]  ;;  %v77_v21 = vld [vmem:[%s3194_s29 + $0x18] sm:$0xff]  ;;  %v76_v22 = vld [vmem:[%s3194_s29 + $0x10] sm:$0xff]  ;;  %s3196_s3 = sld [smem:[#allocation8_spill]]  ;;  %vm3183_vm1 = vcmask 1040384   ;;  %vm166_vm2 = vcmask 1044480  }
  0x20   :  { %141 = vmatpush.msra.mxu1 %v90_v16  ;;  %v75_v23 = vld [vmem:[%s3194_s29 + $0x8] sm:$0xff]  ;;  %v74_v24 = vld [vmem:[%s3194_s29] sm:$0xff]  ;;  %s3197_s4 = sld [smem:[#allocation10_spill]]  ;;  %vm168_vm3 = vcmask 1045504   ;;  %vm3186_vm4 = vcmask 261120   ;;  %vm3185_vm5 = vcmask 254976  }
  0x21   :  { %115 = vmatpush.msra.mxu0 %v80_v17  ;;  %s3198_s1 = sld [smem:[#allocation9_spill]]  ;;  %v2283_v46 = vmov 32.0   ;;  %v240_v63 = vld [vmem:[%s3145_s8 + $0x18] sm:$0xff]  ;;  %v239_v0 = vld [vmem:[%s3145_s8 + $0x10] sm:$0xff]  ;;  %v238_v1 = vld [vmem:[%s3145_s8 + $0x8] sm:$0xff]  ;;  %s2285_s24 = smov 120  }
  0x22   :  { %2155 = vrcp.f32 %v2283_v46  ;;  %263 = vmatpush.msra.mxu2 %v240_v63  ;;  %v237_v2 = vld [vmem:[%s3145_s8] sm:$0xff]  ;;  %s3199_s0 = sld [smem:[#allocation11_spill]]  ;;  %s3173_s6 = smov 80   ;;  %vm280_vm13 = vcmask 64512   ;;  %vm312_vm14 = vcmask 80896   ;;  %vm316_vm15 = vcmask 74752  }
  0x23   :  { %116 = vmatpush.msra.mxu0 %v79_v19  ;;  %s2287_s26 = smov 96   ;;  %s3175_s2 = smov 112  }
  0x24   :  { %v73_v18 = vld [vmem:[%s3195_s25 + $0x8] sm:$0xff]  ;;  %v72_v25 = vld [vmem:[%s3195_s25] sm:$0xff]  ;;  %264 = vmatpush.msra.mxu2 %v239_v0  ;;  %s2284_s25 = smov 88   ;;  %s3177_s27 = smov 72  }
  0x25   :  { %2017 = vmatmul.msk.f32.vlgmr.msra.gmra.mxu1 %vm3184_vm0, %v73_v18  ;;  %117 = vmatpush.msra.mxu0 %v78_v20  ;;  %v2135_v26 = vld [vmem:[%s3196_s3] ss:$0 sm:$0xff]  ;;  %s2290_s3 = smov 104   ;;  %s3171_s29 = smov 56  }
  0x26   :  { %v149_v27 = vld [vmem:[%s3197_s4 + $0x1] sm:$0xf]  ;;  %v147_v29 = vld [vmem:[%s3197_s4] sm:$0x1]  ;;  %265 = vmatpush.msra.mxu2 %v238_v1  ;;  %s3200_s4 = sld [smem:[#allocation6_spill]]  ;;  %s3169_s5 = smov 64  }
  0x27   :  { %118 = vmatpush.msra.mxu0 %v77_v21  ;;  %v146_v28 = vld [vmem:[%s3198_s1] sm:$0x1]  ;;  %v152_v33 = vrot.slane %v149_v27, 4  ;;  %s3167_s28 = smov 40   ;;  %s3165_s30 = smov 48  }
  0x28   :  { %v148_v34 = vadd.f32 %v147_v29, %v146_v28  ;;  %v2156_v47 = vpop.eup %2155  ;;  %266 = vmatpush.msra.mxu2 %v237_v2  ;;  %v2136_v17 = vld [vmem:[%s3199_s0] ss:$0 sm:$0xff]  ;;  %s3181_s23 = smov 8   ;;  %s3179_s1 = smov 24  }
  0x29   :  { %119 = vmatpush.msra.mxu0 %v76_v22  ;;  %v183_v48 = vmul.f32 32.0, %v2156_v47  ;;  %vm187_vm6 = vweird.f32 %v2156_v47  ;;  %v2137_v21 = vld [vmem:[%s3144_s7] ss:$0 sm:$0xff] }
  0x2a   :  { %v159_v38 = vperm.slane %v148_v34, 0 }
  0x2b   :  { %120 = vmatpush.msra.mxu0 %v75_v23  ;;  %v184_v49 = vsub.f32 1.0, %v183_v48 }
  0x2c   :  { %v171_v0 = vld [vmem:[%s3200_s4 + $0x8] sm:$0x3] }
  0x2d   :  { %121 = vmatpush.msra.mxu0 %v74_v24  ;;  %v185_v50 = vmul.f32 %v2156_v47, %v184_v49 }
  0x2e   :  { %122 = vmatmul.f32.vlgmr.msra.gmra.mxu0 %v72_v25 }
  0x2f   :  { %v186_v51 = vadd.f32 %v2156_v47, %v185_v50 }
  0x31   :  { %v2515_v52 = vsel %vm187_vm6, %v2156_v47, %v186_v51 }
  0xa2   :  { %v143_v31 = vpop.f32.mrf.mxu1 }
  0xab   :  { %v123_v30 = vpop.f32.mrf.mxu0 }
  0xac   :  { %v124_v32 = vadd.f32 %v2135_v26, %v123_v30 }
  0xae   :  { %v144_v35 = vadd.f32 %v143_v31, %v124_v32  ;;  %v2138_v31 = vld [vmem:[%s3146_s9] ss:$0 sm:$0xff] }
  0xb0   :  { %v150_v36 = vadd.f32 %v149_v27, %v144_v35  ;;  %v154_v37 = vadd.f32 %v152_v33, %v144_v35 }
  0xb2   :  { %v156_v39 = vrot.slane %v150_v36, 7  ;;  %v2505_v40 = vrot.slane %v154_v37, 6 }
  0xb4   :  { %v165_v41 = vsel %vm3183_vm1, %v148_v34, %v156_v39  ;;  %v179_v45 = vsel %vm3185_vm5, %v2505_v40, 0.0 }
  0xb5   :  { %v167_v42 = vsel %vm166_vm2, %v165_v41, %v159_v38  ;;  %vm373_vm2 = vcmask 1041408  }
  0xb6   :  { %v2509_v43 = vsel %vm168_vm3, %v167_v42, %v2505_v40 }
  0xb7   :  { %v175_v44 = vsel %vm3186_vm4, %v2509_v43, 0.0 }
  0xb8   :  { %176 = vadd.xlane.f32.xlu0 %v175_v44 }
  0xc0   :  { %180 = vadd.xlane.f32.xlu0 %v179_v45 }
 0x12b   :  { %v177_v53 = vpop.xlane.xlu0 %176 }
 0x12c   :  { %v189_v54 = vmul.f32 %v2515_v52, %v177_v53  ;;  %v170_v53 = vld [vmem:[%s3200_s4] sm:$0xff] }
 0x12e   :  { %v191_v55 = vsub.f32 %v2509_v43, %v189_v54 }
 0x130   :  { %v193_v56 = vmul.f32 %v191_v55, %v191_v55 }
 0x132   :  { %v195_v57 = vsel %vm3186_vm4, %v193_v56, 0.0 }
 0x133   :  { %196 = vadd.xlane.f32.xlu1 %v195_v57  ;;  %v181_v58 = vpop.xlane.xlu0 %180 }
 0x134   :  { %v190_v59 = vmul.f32 %v2515_v52, %v181_v58 }
 0x136   :  { %v192_v60 = vsub.f32 %v2505_v40, %v190_v59 }
 0x138   :  { %v194_v61 = vmul.f32 %v192_v60, %v192_v60 }
 0x13a   :  { %v198_v62 = vsel %vm3185_vm5, %v194_v61, 0.0 }
 0x13b   :  { %199 = vadd.xlane.f32.xlu1 %v198_v62 }
 0x1a6   :  { %v197_v3 = vpop.xlane.xlu1 %196 }
 0x1a7   :  { %v201_v4 = vmul.f32 %v197_v3, %v2515_v52 }
 0x1a9   :  { %v203_v5 = vadd.f32 1e-06, %v201_v4 }
 0x1ab   :  { %2157 = vrsqrt.f32 %v203_v5  ;;  %vm211_vm8 = vweird.f32 %v203_v5 }
 0x1ae   :  { %v200_v6 = vpop.xlane.xlu1 %199 }
 0x1af   :  { %v202_v7 = vmul.f32 %v200_v6, %v2515_v52 }
 0x1b1   :  { %v2158_v8 = vpop.eup %2157  ;;  %v204_v9 = vadd.f32 1e-06, %v202_v7 }
 0x1b2   :  { %v206_v10 = vmul.f32 %v2158_v8, %v203_v5  ;;  %vm212_vm7 = vweird.f32 %v2158_v8 }
 0x1b3   :  { %2159 = vrsqrt.f32 %v204_v9  ;;  %vm213_vm9 = vmor %vm211_vm8, %vm212_vm7  ;;  %vm221_vm11 = vweird.f32 %v204_v9 }
 0x1b4   :  { %v207_v11 = vmul.f32 %v2158_v8, %v206_v10 }
 0x1b6   :  { %v208_v12 = vmul.f32 0.5, %v207_v11 }
 0x1b8   :  { %v209_v13 = vsub.f32 1.5, %v208_v12 }
 0x1b9   :  { %v2160_v14 = vpop.eup %2159 }
 0x1ba   :  { %v210_v15 = vmul.f32 %v2158_v8, %v209_v13  ;;  %v216_v16 = vmul.f32 %v2160_v14, %v204_v9  ;;  %vm222_vm10 = vweird.f32 %v2160_v14 }
 0x1bb   :  { %vm223_vm12 = vmor %vm221_vm11, %vm222_vm10 }
 0x1bc   :  { %v214_v18 = vsel %vm213_vm9, %v2158_v8, %v210_v15  ;;  %v217_v19 = vmul.f32 %v2160_v14, %v216_v16 }
 0x1bd   :  { %v225_v20 = vmul.f32 %v214_v18, %v191_v55 }
 0x1be   :  { %v218_v22 = vmul.f32 0.5, %v217_v19 }
 0x1bf   :  { %v230_v23 = vmul.f32 %v2136_v17, %v225_v20 }
 0x1c0   :  { %v219_v24 = vsub.f32 1.5, %v218_v22 }
 0x1c1   :  { %v235_v25 = vadd.f32 %v2137_v21, %v230_v23 }
 0x1c2   :  { %v220_v26 = vmul.f32 %v2160_v14, %v219_v24 }
 0x1c3   :  { %2018 = vmatmul.msk.f32.vlgmr.msra.gmra.mxu2 %vm3186_vm4, %v235_v25 }
 0x1c4   :  { %v224_v27 = vsel %vm223_vm12, %v2160_v14, %v220_v26 }
 0x1c5   :  { %v226_v28 = vmul.f32 %v224_v27, %v192_v60 }
 0x1c7   :  { %v231_v29 = vmul.f32 %v2136_v17, %v226_v28 }
 0x1c9   :  { %v236_v30 = vadd.f32 %v2137_v21, %v231_v29 }
 0x1cb   :  { %2019 = vmatmul.msk.f32.gmra.mxu2 %vm3186_vm4, %v236_v30 }
 0x246   :  { %v268_v32 = vpop.f32.mrf.mxu2 }
 0x247   :  { %v2548_v33 = vadd.f32 %v2138_v31, %v268_v32 }
 0x249   :  { %403 = vrot.lane.b32.xlu2 %v2548_v33, %s2284_s25  ;;  %399 = vrot.lane.b32.xlu1 %v2548_v33, %s2285_s24 }
 0x24e   :  { %v271_v34 = vpop.f32.mrf.mxu2 }
 0x24f   :  { %v2554_v35 = vadd.f32 %v2138_v31, %v271_v34 }
 0x251   :  { %528 = vrot.lane.b32.xlu1 %v2554_v35, %s3173_s6  ;;  %278 = vrot.lane.b32.xlu0 %v2554_v35, %s2287_s26 }
 0x252   :  { %405 = vrot.lane.b32.xlu2 %v2554_v35, %s2284_s25 }
 0x259   :  { %522 = vrot.lane.b32.xlu1 %v2548_v33, %s3175_s2  ;;  %649 = vrot.lane.b32.xlu0 %v2548_v33, %s3177_s27 }
 0x25a   :  { %276 = vrot.lane.b32.xlu2 %v2548_v33, %s2287_s26 }
 0x261   :  { %526 = vrot.lane.b32.xlu0 %v2548_v33, %s3173_s6 }
 0x262   :  { %401 = vrot.lane.b32.xlu2 %v2554_v35, %s2285_s24 }
 0x269   :  { %524 = vrot.lane.b32.xlu0 %v2554_v35, %s3175_s2  ;;  %s3206_s2 = smov 40  }
 0x26a   :  { %651 = vrot.lane.b32.xlu2 %v2554_v35, %s3177_s27  ;;  %s3209_s27 = smov 24  }
 0x272   :  { %645 = vrot.lane.b32.xlu2 %v2548_v33, %s2290_s3 }
 0x27a   :  { %647 = vrot.lane.b32.xlu2 %v2554_v35, %s2290_s3 }
 0x2a3   :  { %v404_v36 = vpop.permute.xlu2 %403 }
 0x2ac   :  { %v406_v37 = vpop.permute.xlu2 %405 }
 0x2ad   :  { %2027 = vmatpush.xpose.msk.msrb.mxu2 %vm280_vm13, %v406_v37 }
 0x2b1   :  { %2028 = vmatpush.xpose.msk.msrb.mxu2 %vm280_vm13, %v404_v36 }
 0x2b4   :  { %v277_v38 = vpop.permute.xlu2 %276 }
 0x2bb   :  { %v400_v39 = vpop.permute.xlu1 %399 }
 0x2bc   :  { %v402_v41 = vpop.permute.xlu2 %401  ;;  %2029 = vmatmul.msk.f32.vlgmr.msrb.gmra.mxu2 %vm280_vm13, %v400_v39 }
 0x2c3   :  { %v279_v42 = vpop.permute.xlu0 %278  ;;  %v529_v44 = vpop.permute.xlu1 %528 }
 0x2c4   :  { %v652_v45 = vpop.permute.xlu2 %651  ;;  %2020 = vmatpush.xpose.msk.msra.mxu3 %vm280_vm13, %v279_v42  ;;  %2030 = vmatmul.msk.f32.gmra.mxu2 %vm280_vm13, %v402_v41 }
 0x2c5   :  { %2034 = vmatpush.xpose.msk.msrb.mxu0 %vm280_vm13, %v529_v44  ;;  %2041 = vmatpush.xpose.msk.msra.mxu2 %vm280_vm13, %v652_v45 }
 0x2c8   :  { %2021 = vmatpush.xpose.msk.msra.mxu3 %vm280_vm13, %v277_v38 }
 0x2cb   :  { %v650_v46 = vpop.permute.xlu0 %649  ;;  %2022 = vmatmul.msk.f32.vlgmr.msra.gmra.mxu3 %vm280_vm13, %v2548_v33  ;;  %v523_v49 = vpop.permute.xlu1 %522 }
 0x2cc   :  { %v646_v47 = vpop.permute.xlu2 %645  ;;  %2042 = vmatpush.xpose.msk.msra.mxu2 %vm280_vm13, %v650_v46 }
 0x2cf   :  { %2043 = vmatmul.msk.f32.vlgmr.msra.gmra.mxu2 %vm280_vm13, %v646_v47 }
 0x2d3   :  { %v527_v48 = vpop.permute.xlu0 %526  ;;  %2023 = vmatmul.msk.f32.gmra.mxu3 %vm280_vm13, %v2554_v35 }
 0x2d4   :  { %2035 = vmatpush.xpose.msk.msrb.mxu0 %vm280_vm13, %v527_v48  ;;  %v648_v50 = vpop.permute.xlu2 %647 }
 0x2d7   :  { %2036 = vmatmul.msk.f32.vlgmr.msrb.gmra.mxu0 %vm280_vm13, %v523_v49  ;;  %2044 = vmatmul.msk.f32.gmra.mxu2 %vm280_vm13, %v648_v50 }
 0x2db   :  { %v525_v51 = vpop.permute.xlu0 %524 }
 0x2df   :  { %2037 = vmatmul.msk.f32.gmra.mxu0 %vm280_vm13, %v525_v51 }
 0x33f   :  { %v432_v54 = vpop.f32.mrf.mxu2 }
 0x340   :  { %v433_v55 = vadd.f32 %v432_v54, %v170_v53 }
 0x342   :  { %v438_v56 = vsel %vm312_vm14, %v433_v55, -inf }
 0x343   :  { %439 = vmax.xlane.f32.xlu2 %v438_v56 }
 0x347   :  { %v435_v57 = vpop.f32.mrf.mxu2 }
 0x348   :  { %v436_v6 = vadd.f32 %v435_v57, %v171_v0 }
 0x34a   :  { %v441_v11 = vsel %vm316_vm15, %v436_v6, -inf }
 0x34e   :  { %v306_v58 = vpop.f32.mrf.mxu3 }
 0x34f   :  { %v307_v59 = vadd.f32 %v306_v58, %v170_v53 }
 0x351   :  { %v313_v60 = vsel %vm312_vm14, %v307_v59, -inf }
 0x352   :  { %314 = vmax.xlane.f32.xlu1 %v313_v60  ;;  %v678_v61 = vpop.f32.mrf.mxu2 }
 0x353   :  { %v679_v13 = vadd.f32 %v678_v61, %v170_v53 }
 0x354   :  { %v555_v62 = vpop.f32.mrf.mxu0 }
 0x355   :  { %v556_v63 = vadd.f32 %v555_v62, %v170_v53  ;;  %v684_v14 = vsel %vm312_vm14, %v679_v13, -inf }
 0x356   :  { %v309_v1 = vpop.f32.mrf.mxu3 }
 0x357   :  { %v310_v2 = vadd.f32 %v309_v1, %v171_v0  ;;  %v561_v3 = vsel %vm312_vm14, %v556_v63, -inf }
 0x358   :  { %562 = vmax.xlane.f32.xlu0 %v561_v3 }
 0x359   :  { %v317_v4 = vsel %vm316_vm15, %v310_v2, -inf }
 0x35a   :  { %v681_v5 = vpop.f32.mrf.mxu2  ;;  %318 = vmax.xlane.f32.xlu2 %v317_v4 }
 0x35b   :  { %v682_v8 = vadd.f32 %v681_v5, %v171_v0 }
 0x35c   :  { %v558_v7 = vpop.f32.mrf.mxu0 }
 0x35d   :  { %v2608_v9 = vadd.f32 %v558_v7, %v171_v0  ;;  %v687_v12 = vsel %vm316_vm15, %v682_v8, -inf }
 0x35f   :  { %v564_v10 = vsel %vm316_vm15, %v2608_v9, -inf }
 0x360   :  { %565 = vmax.xlane.f32.xlu1 %v564_v10  ;;  %442 = vmax.xlane.f32.xlu0 %v441_v11 }
 0x362   :  { %688 = vmax.xlane.f32.xlu2 %v687_v12 }
 0x368   :  { %685 = vmax.xlane.f32.xlu1 %v684_v14 }
 0x3b6   :  { %v440_v15 = vpop.xlane.xlu2 %439 }
 0x3b7   :  { %v444_v16 = vsub.f32 %v433_v55, %v440_v15 }
 0x3b9   :  { %v446_v17 = vmul.f32 1.442695, %v444_v16 }
 0x3bb   :  { %2161 = vpow2.f32 %v446_v17 }
 0x3c1   :  { %v2615_v18 = vpop.eup %2161 }
 0x3c2   :  { %v450_v19 = vsel %vm312_vm14, %v2615_v18, 0.0 }
 0x3c3   :  { %451 = vadd.xlane.f32.xlu0 %v450_v19 }
 0x3c5   :  { %v315_v20 = vpop.xlane.xlu1 %314 }
 0x3c6   :  { %v320_v21 = vsub.f32 %v307_v59, %v315_v20 }
 0x3c8   :  { %v322_v22 = vmul.f32 1.442695, %v320_v21 }
 0x3ca   :  { %2163 = vpow2.f32 %v322_v22 }
 0x3cb   :  { %v563_v23 = vpop.xlane.xlu0 %562 }
 0x3cc   :  { %v567_v24 = vsub.f32 %v556_v63, %v563_v23 }
 0x3cd   :  { %v319_v37 = vpop.xlane.xlu2 %318 }
 0x3ce   :  { %v569_v25 = vmul.f32 1.442695, %v567_v24  ;;  %v321_v38 = vsub.f32 %v310_v2, %v319_v37 }
 0x3d0   :  { %v2619_v26 = vpop.eup %2163  ;;  %2165 = vpow2.f32 %v569_v25  ;;  %v324_v39 = vmul.f32 1.442695, %v321_v38 }
 0x3d1   :  { %v326_v27 = vsel %vm312_vm14, %v2619_v26, 0.0 }
 0x3d2   :  { %327 = vadd.xlane.f32.xlu2 %v326_v27 }
 0x3d3   :  { %v443_v28 = vpop.xlane.xlu0 %442  ;;  %v566_v41 = vpop.xlane.xlu1 %565 }
 0x3d4   :  { %v445_v29 = vsub.f32 %v436_v6, %v443_v28  ;;  %v568_v56 = vsub.f32 %v2608_v9, %v566_v41 }
 0x3d5   :  { %v689_v48 = vpop.xlane.xlu2 %688 }
 0x3d6   :  { %v2623_v30 = vpop.eup %2165  ;;  %v448_v31 = vmul.f32 1.442695, %v445_v29  ;;  %v691_v49 = vsub.f32 %v682_v8, %v689_v48  ;;  %v571_v57 = vmul.f32 1.442695, %v568_v56 }
 0x3d7   :  { %486 = vrot.lane.b32.xlu0 %v2548_v33, %s3171_s29  ;;  %v573_v32 = vsel %vm312_vm14, %v2623_v30, 0.0 }
 0x3d8   :  { %2167 = vpow2.f32 %v448_v31  ;;  %v694_v50 = vmul.f32 1.442695, %v691_v49 }
 0x3d9   :  { %2169 = vpow2.f32 %v324_v39 }
 0x3da   :  { %574 = vadd.xlane.f32.xlu2 %v573_v32 }
 0x3db   :  { %v686_v45 = vpop.xlane.xlu1 %685 }
 0x3dc   :  { %v690_v46 = vsub.f32 %v679_v13, %v686_v45 }
 0x3de   :  { %v2629_v34 = vpop.eup %2167  ;;  %v692_v47 = vmul.f32 1.442695, %v690_v46 }
 0x3df   :  { %v453_v36 = vsel %vm316_vm15, %v2629_v34, 0.0  ;;  %v2637_v42 = vpop.eup %2169 }
 0x3e0   :  { %454 = vadd.xlane.f32.xlu1 %v453_v36  ;;  %v329_v44 = vsel %vm316_vm15, %v2637_v42, 0.0  ;;  %2171 = vpow2.f32 %v692_v47 }
 0x3e1   :  { %2173 = vpow2.f32 %v694_v50 }
 0x3e2   :  { %2175 = vpow2.f32 %v571_v57 }
 0x3e6   :  { %v2643_v51 = vpop.eup %2171 }
 0x3e7   :  { %v696_v53 = vsel %vm312_vm14, %v2643_v51, 0.0  ;;  %v2647_v54 = vpop.eup %2173 }
 0x3e8   :  { %v699_v55 = vsel %vm316_vm15, %v2647_v54, 0.0  ;;  %v2654_v58 = vpop.eup %2175 }
 0x3e9   :  { %v576_v59 = vsel %vm316_vm15, %v2654_v58, 0.0 }
 0x3f2   :  { %364 = vrot.lane.b32.xlu2 %v2554_v35, %s3169_s5 }
 0x3f9   :  { %488 = vrot.lane.b32.xlu1 %v2554_v35, %s3171_s29 }
 0x401   :  { %330 = vadd.xlane.f32.xlu0 %v329_v44 }
 0x415   :  { %362 = vrot.lane.b32.xlu0 %v2548_v33, %s3169_s5 }
 0x41b   :  { %697 = vadd.xlane.f32.xlu2 %v696_v53 }
 0x423   :  { %700 = vadd.xlane.f32.xlu1 %v699_v55 }
 0x433   :  { %734 = vrot.lane.b32.xlu2 %v2554_v35, %s3167_s28 }
 0x436   :  { %v452_v61 = vpop.xlane.xlu0 %451 }
 0x437   :  { %2177 = vrcp.f32 %v452_v61  ;;  %v467_v8 = vand.u32 2147483648, %v452_v61  ;;  %vm461_vm6 = vweird.f32 %v452_v61 }
 0x439   :  { %v468_v11 = vor.u32 1.1754944e-38, %v467_v8 }
 0x43b   :  { %732 = vrot.lane.b32.xlu2 %v2548_v33, %s3167_s28 }
 0x43d   :  { %v2178_v0 = vpop.eup %2177 }
 0x43e   :  { %v457_v2 = vmul.f32 %v2178_v0, %v452_v61  ;;  %vm462_vm3 = vweird.f32 %v2178_v0 }
 0x43f   :  { %577 = vadd.xlane.f32.xlu0 %v576_v59  ;;  %vm463_vm7 = vmor %vm461_vm6, %vm462_vm3 }
 0x440   :  { %v458_v3 = vsub.f32 1.0, %v457_v2 }
 0x443   :  { %611 = vrot.lane.b32.xlu2 %v2554_v35, %s3165_s30  ;;  %v459_v35 = vmul.f32 %v2178_v0, %v458_v3 }
 0x445   :  { %v2662_v60 = vpop.xlane.xlu2 %327  ;;  %v460_v6 = vadd.f32 %v2178_v0, %v459_v35 }
 0x446   :  { %v343_v36 = vand.u32 2147483648, %v2662_v60  ;;  %vm337_vm6 = vweird.f32 %v2662_v60  ;;  %v341_v38 = vand.u32 2147483647, %v2662_v60 }
 0x447   :  { %v464_v10 = vsel %vm463_vm7, %v2178_v0, %v460_v6 }
 0x448   :  { %v344_v44 = vor.u32 1.1754944e-38, %v343_v36 }
 0x449   :  { %v487_v15 = vpop.permute.xlu0 %486 }
 0x44b   :  { %609 = vrot.lane.b32.xlu2 %v2548_v33, %s3165_s30  ;;  %v465_v33 = vand.u32 2147483647, %v452_v61  ;;  %s2297_s30 = smov 16  }
 0x44d   :  { %v2666_v62 = vpop.xlane.xlu2 %574  ;;  %vm466_vm8 = vcmp.eq.f32.partialorder %v465_v33, 8.507059e+37 }
 0x44e   :  { %v469_v12 = vsel %vm466_vm8, %v468_v11, %v464_v10  ;;  %vm342_vm8 = vcmp.eq.f32.partialorder %v341_v38, 8.507059e+37 }
 0x44f   :  { %v470_v17 = vmul.f32 %v2615_v18, %v469_v12 }
 0x453   :  { %v455_v63 = vpop.xlane.xlu1 %454 }
 0x454   :  { %2179 = vrcp.f32 %v455_v63  ;;  %v482_v16 = vand.u32 2147483648, %v455_v63  ;;  %vm476_vm10 = vweird.f32 %v455_v63  ;;  %v480_v19 = vand.u32 2147483647, %v455_v63 }
 0x455   :  { %v365_v1 = vpop.permute.xlu2 %364  ;;  %2181 = vrcp.f32 %v2662_v60 }
 0x456   :  { %2024 = vmatpush.msk.msrb.mxu1 %vm373_vm2, %v365_v1  ;;  %v483_v22 = vor.u32 1.1754944e-38, %v482_v16  ;;  %vm481_vm12 = vcmp.eq.f32.partialorder %v480_v19, 8.507059e+37  ;;  %v590_v19 = vand.u32 2147483648, %v2666_v62 }
 0x45a   :  { %v2180_v4 = vpop.eup %2179 }
 0x45b   :  { %v472_v5 = vmul.f32 %v2180_v4, %v455_v63  ;;  %vm477_vm9 = vweird.f32 %v2180_v4  ;;  %v2182_v20 = vpop.eup %2181 }
 0x45c   :  { %vm478_vm11 = vmor %vm476_vm10, %vm477_vm9  ;;  %v333_v23 = vmul.f32 %v2182_v20, %v2662_v60  ;;  %vm338_vm3 = vweird.f32 %v2182_v20 }
 0x45d   :  { %v473_v7 = vsub.f32 1.0, %v472_v5  ;;  %vm339_vm7 = vmor %vm337_vm6, %vm338_vm3 }
 0x45e   :  { %v334_v27 = vsub.f32 1.0, %v333_v23 }
 0x45f   :  { %v474_v9 = vmul.f32 %v2180_v4, %v473_v7 }
 0x460   :  { %v335_v18 = vmul.f32 %v2182_v20, %v334_v27  ;;  %v591_v27 = vor.u32 1.1754944e-38, %v590_v19 }
 0x461   :  { %v475_v14 = vadd.f32 %v2180_v4, %v474_v9 }
 0x462   :  { %v336_v32 = vadd.f32 %v2182_v20, %v335_v18 }
 0x463   :  { %v479_v21 = vsel %vm478_vm11, %v2180_v4, %v475_v14 }
 0x464   :  { %v484_v24 = vsel %vm481_vm12, %v483_v22, %v479_v21  ;;  %v340_v41 = vsel %vm339_vm7, %v2182_v20, %v336_v32  ;;  %v588_v21 = vand.u32 2147483647, %v2666_v62 }
 0x465   :  { %v485_v28 = vmul.f32 %v2629_v34, %v484_v24  ;;  %v345_v34 = vsel %vm342_vm8, %v344_v44, %v340_v41 }
 0x466   :  { %v346_v48 = vmul.f32 %v2619_v26, %v345_v34 }
 0x46b   :  { %v489_v13 = vpop.permute.xlu1 %488 }
 0x46c   :  { %2031 = vmatpush.msk.msrb.mxu3 %vm373_vm2, %v489_v13 }
 0x46e   :  { %514 = vmatpush.msrb.mxu3 %v487_v15 }
 0x46f   :  { %2032 = vmatmul.msk.f32.vlgmr.msrb.gmra.mxu3 %vm312_vm14, %v470_v17 }
 0x474   :  { %v331_v25 = vpop.xlane.xlu0 %330 }
 0x475   :  { %2183 = vrcp.f32 %v331_v25  ;;  %v358_v46 = vand.u32 2147483648, %v331_v25  ;;  %vm352_vm10 = vweird.f32 %v331_v25  ;;  %v356_v49 = vand.u32 2147483647, %v331_v25 }
 0x476   :  { %2185 = vrcp.f32 %v2666_v62 }
 0x477   :  { %2033 = vmatmul.msk.f32.gmra.mxu3 %vm312_vm14, %v485_v28  ;;  %v359_v53 = vor.u32 1.1754944e-38, %v358_v46  ;;  %vm357_vm12 = vcmp.eq.f32.partialorder %v356_v49, 8.507059e+37 }
 0x47b   :  { %v2184_v29 = vpop.eup %2183 }
 0x47c   :  { %v348_v31 = vmul.f32 %v2184_v29, %v331_v25  ;;  %vm353_vm9 = vweird.f32 %v2184_v29  ;;  %v2186_v59 = vpop.eup %2185 }
 0x47d   :  { %vm354_vm11 = vmor %vm352_vm10, %vm353_vm9  ;;  %v580_v0 = vmul.f32 %v2186_v59, %v2666_v62  ;;  %vm585_vm10 = vweird.f32 %v2186_v59 }
 0x47e   :  { %v349_v37 = vsub.f32 1.0, %v348_v31 }
 0x47f   :  { %v581_v35 = vsub.f32 1.0, %v580_v0 }
 0x480   :  { %v350_v39 = vmul.f32 %v2184_v29, %v349_v37 }
 0x481   :  { %v582_v10 = vmul.f32 %v2186_v59, %v581_v35 }
 0x482   :  { %v351_v45 = vadd.f32 %v2184_v29, %v350_v39 }
 0x483   :  { %v583_v16 = vadd.f32 %v2186_v59, %v582_v10 }
 0x484   :  { %v355_v50 = vsel %vm354_vm11, %v2184_v29, %v351_v45 }
 0x485   :  { %v360_v55 = vsel %vm357_vm12, %v359_v53, %v355_v50 }
 0x486   :  { %v361_v57 = vmul.f32 %v2637_v42, %v360_v55  ;;  %v803_v55 = vld [vmem:[%s3147_s10 + $0x18] sm:$0xff] }
 0x487   :  { %v363_v47 = vpop.permute.xlu0 %362  ;;  %826 = vmatpush.msra.mxu0 %v803_v55 }
 0x488   :  { %391 = vmatpush.msrb.mxu1 %v363_v47 }
 0x489   :  { %2025 = vmatmul.msk.f32.vlgmr.msrb.gmra.mxu1 %vm312_vm14, %v346_v48 }
 0x48e   :  { %v698_v56 = vpop.xlane.xlu2 %697 }
 0x48f   :  { %2187 = vrcp.f32 %v698_v56  ;;  %v713_v2 = vand.u32 2147483648, %v698_v56  ;;  %v711_v4 = vand.u32 2147483647, %v698_v56  ;;  %vm707_vm6 = vweird.f32 %v698_v56 }
 0x491   :  { %2026 = vmatmul.msk.f32.gmra.mxu1 %vm312_vm14, %v361_v57  ;;  %v714_v6 = vor.u32 1.1754944e-38, %v713_v2  ;;  %vm712_vm8 = vcmp.eq.f32.partialorder %v711_v4, 8.507059e+37  ;;  %v801_v57 = vld [vmem:[%s3147_s10 + $0x8] sm:$0xff] }
 0x495   :  { %v2188_v60 = vpop.eup %2187 }
 0x496   :  { %v703_v26 = vmul.f32 %v2188_v60, %v698_v56  ;;  %v735_v61 = vpop.permute.xlu2 %734  ;;  %v701_v63 = vpop.xlane.xlu1 %700  ;;  %vm708_vm3 = vweird.f32 %v2188_v60  ;;  %v802_v56 = vld [vmem:[%s3147_s10 + $0x10] sm:$0xff] }
 0x497   :  { %2189 = vrcp.f32 %v701_v63  ;;  %2045 = vmatpush.msk.msra.mxu3 %vm373_vm2, %v735_v61  ;;  %vm709_vm7 = vmor %vm707_vm6, %vm708_vm3  ;;  %v728_v13 = vand.u32 2147483648, %v701_v63  ;;  %v726_v15 = vand.u32 2147483647, %v701_v63  ;;  %vm722_vm11 = vweird.f32 %v701_v63  ;;  %827 = vmatpush.msra.mxu0 %v802_v56 }
 0x498   :  { %v704_v1 = vsub.f32 1.0, %v703_v26  ;;  %vm584_vm3 = vweird.f32 %v2666_v62 }
 0x499   :  { %v729_v20 = vor.u32 1.1754944e-38, %v728_v13  ;;  %vm727_vm6 = vcmp.eq.f32.partialorder %v726_v15, 8.507059e+37  ;;  %828 = vmatpush.msra.mxu0 %v801_v57 }
 0x49a   :  { %v705_v3 = vmul.f32 %v2188_v60, %v704_v1 }
 0x49c   :  { %v706_v5 = vadd.f32 %v2188_v60, %v705_v3 }
 0x49d   :  { %v2190_v42 = vpop.eup %2189 }
 0x49e   :  { %v710_v7 = vsel %vm709_vm7, %v2188_v60, %v706_v5  ;;  %v718_v8 = vmul.f32 %v2190_v42, %v701_v63  ;;  %v733_v33 = vpop.permute.xlu2 %732  ;;  %vm723_vm9 = vweird.f32 %v2190_v42  ;;  %vm586_vm7 = vmor %vm584_vm3, %vm585_vm10  ;;  %vm794_vm3 = vcmask 130048  }
 0x49f   :  { %v715_v9 = vsel %vm712_vm8, %v714_v6, %v710_v7  ;;  %760 = vmatpush.msra.mxu3 %v733_v33  ;;  %vm724_vm12 = vmor %vm722_vm11, %vm723_vm9  ;;  %v587_v24 = vsel %vm586_vm7, %v2186_v59, %v583_v16  ;;  %vm589_vm8 = vcmp.eq.f32.partialorder %v588_v21, 8.507059e+37  ;;  %v800_v59 = vld [vmem:[%s3147_s10] sm:$0xff] }
 0x4a0   :  { %v719_v11 = vsub.f32 1.0, %v718_v8  ;;  %v716_v12 = vmul.f32 %v2643_v51, %v715_v9  ;;  %v592_v28 = vsel %vm589_vm8, %v591_v27, %v587_v24  ;;  %829 = vmatpush.msra.mxu0 %v800_v59  ;;  %v2139_v6 = vld [vmem:[%s3148_s11] ss:$0 sm:$0xff]  ;;  %v896_v24 = vld [vmem:[%s3151_s14 + $0x8] sm:$0xff] }
 0x4a1   :  { %v593_v29 = vmul.f32 %v2623_v30, %v592_v28 }
 0x4a2   :  { %v720_v14 = vmul.f32 %v2190_v42, %v719_v11  ;;  %2046 = vmatmul.msk.f32.vlgmr.msra.gmra.mxu3 %vm312_vm14, %v716_v12 }
 0x4a4   :  { %v721_v17 = vadd.f32 %v2190_v42, %v720_v14 }
 0x4a6   :  { %v612_v22 = vpop.permute.xlu2 %611  ;;  %v725_v51 = vsel %vm724_vm12, %v2190_v42, %v721_v17 }
 0x4a7   :  { %2038 = vmatpush.msk.msra.mxu1 %vm373_vm2, %v612_v22  ;;  %v730_v23 = vsel %vm727_vm6, %v729_v20, %v725_v51  ;;  %vm797_vm6 = vcmask 195584   ;;  %v898_v51 = vld [vmem:[%s3151_s14 + $0x18] sm:$0xff] }
 0x4a8   :  { %v731_v25 = vmul.f32 %v2647_v54, %v730_v23  ;;  %v897_v23 = vld [vmem:[%s3151_s14 + $0x10] sm:$0xff] }
 0x4aa   :  { %2047 = vmatmul.msk.f32.gmra.mxu3 %vm312_vm14, %v731_v25  ;;  %v895_v25 = vld [vmem:[%s3151_s14] sm:$0xff] }
 0x4ae   :  { %v610_v18 = vpop.permute.xlu2 %609 }
 0x4af   :  { %637 = vmatpush.msra.mxu1 %v610_v18 }
 0x4b0   :  { %2039 = vmatmul.msk.f32.vlgmr.msra.gmra.mxu1 %vm312_vm14, %v593_v29 }
 0x4b1   :  { %921 = vmatpush.msrb.mxu1 %v898_v51 }
 0x4b2   :  { %v578_v62 = vpop.xlane.xlu0 %577 }
 0x4b3   :  { %2191 = vrcp.f32 %v578_v62  ;;  %v605_v37 = vand.u32 2147483648, %v578_v62  ;;  %v603_v54 = vand.u32 2147483647, %v578_v62  ;;  %vm599_vm10 = vweird.f32 %v578_v62  ;;  %922 = vmatpush.msrb.mxu1 %v897_v23 }
 0x4b5   :  { %v606_v41 = vor.u32 1.1754944e-38, %v605_v37  ;;  %vm604_vm12 = vcmp.eq.f32.partialorder %v603_v54, 8.507059e+37  ;;  %923 = vmatpush.msrb.mxu1 %v896_v24 }
 0x4b7   :  { %924 = vmatpush.msrb.mxu1 %v895_v25 }
 0x4b9   :  { %v2192_v31 = vpop.eup %2191 }
 0x4ba   :  { %v595_v32 = vmul.f32 %v2192_v31, %v578_v62  ;;  %vm600_vm9 = vweird.f32 %v2192_v31 }
 0x4bb   :  { %vm601_vm11 = vmor %vm599_vm10, %vm600_vm9 }
 0x4bc   :  { %v596_v36 = vsub.f32 1.0, %v595_v32 }
 0x4be   :  { %v597_v38 = vmul.f32 %v2192_v31, %v596_v36 }
 0x4c0   :  { %v598_v39 = vadd.f32 %v2192_v31, %v597_v38 }
 0x4c2   :  { %v602_v44 = vsel %vm601_vm11, %v2192_v31, %v598_v39 }
 0x4c3   :  { %v607_v34 = vsel %vm604_vm12, %v606_v41, %v602_v44 }
 0x4c4   :  { %v608_v30 = vmul.f32 %v2654_v58, %v607_v34  ;;  %v2140_v34 = vld [vmem:[%s3149_s12] ss:$0 sm:$0xff] }
 0x4c6   :  { %2040 = vmatmul.msk.f32.gmra.mxu1 %vm312_vm14, %v608_v30 }
 0x4f2   :  { %v516_v45 = vpop.f32.mrf.mxu3 }
 0x4f3   :  { %770 = vrot.lane.b32.xlu1 %v516_v45, %s3181_s23 }
 0x4fa   :  { %v519_v47 = vpop.f32.mrf.mxu3 }
 0x506   :  { %v393_v46 = vpop.f32.mrf.mxu1 }
 0x50e   :  { %v396_v48 = vpop.f32.mrf.mxu1 }
 0x525   :  { %v762_v49 = vpop.f32.mrf.mxu3 }
 0x526   :  { %786 = vrot.lane.b32.xlu0 %v762_v49, %s3179_s1 }
 0x52d   :  { %v639_v50 = vpop.f32.mrf.mxu1  ;;  %v765_v53 = vpop.f32.mrf.mxu3 }
 0x52e   :  { %778 = vrot.lane.b32.xlu2 %v639_v50, %s2297_s30  ;;  %788 = vrot.lane.b32.xlu1 %v765_v53, %s3179_s1 }
 0x536   :  { %772 = vrot.lane.b32.xlu2 %v519_v47, %s3181_s23  ;;  %v2141_v47 = vld [vmem:[%s3150_s13] ss:$0 sm:$0xff]  ;;  %s3203_s23 = smov 80  }
 0x543   :  { %v642_v58 = vpop.f32.mrf.mxu1 }
 0x544   :  { %780 = vrot.lane.b32.xlu2 %v642_v58, %s2297_s30 }
 0x565   :  { %v771_v26 = vpop.permute.xlu1 %770 }
 0x566   :  { %v792_v63 = vsel %vm280_vm13, %v393_v46, %v771_v26 }
 0x588   :  { %v779_v60 = vpop.permute.xlu2 %778 }
 0x589   :  { %v795_v0 = vsel %vm794_vm3, %v792_v63, %v779_v60  ;;  %v2142_v60 = vld [vmem:[%s3152_s15] ss:$0 sm:$0xff] }
 0x590   :  { %v773_v61 = vpop.permute.xlu2 %772 }
 0x591   :  { %v793_v3 = vsel %vm280_vm13, %v396_v48, %v773_v61 }
 0x598   :  { %v787_v1 = vpop.permute.xlu0 %786 }
 0x599   :  { %v798_v2 = vsel %vm797_vm6, %v795_v0, %v787_v1 }
 0x59a   :  { %2048 = vmatmul.msk.f32.vlgmr.msra.gmra.mxu0 %vm3186_vm4, %v798_v2 }
 0x59e   :  { %v781_v4 = vpop.permute.xlu2 %780 }
 0x59f   :  { %v796_v35 = vsel %vm794_vm3, %v793_v3, %v781_v4 }
 0x5a0   :  { %v789_v5 = vpop.permute.xlu1 %788 }
 0x5a1   :  { %v799_v42 = vsel %vm797_vm6, %v796_v35, %v789_v5  ;;  %v1019_v35 = vld [vmem:[%s3153_s16 + $0x38] sm:$0xff] }
 0x5a2   :  { %2049 = vmatmul.msk.f32.gmra.mxu0 %vm3186_vm4, %v799_v42  ;;  %1038 = vmatpush.msrb.mxu2 %v1019_v35  ;;  %v1018_v42 = vld [vmem:[%s3153_s16 + $0x30] sm:$0xff] }
 0x5a4   :  { %1039 = vmatpush.msrb.mxu2 %v1018_v42 }
 0x617   :  { %v831_v7 = vpop.f32.mrf.mxu0 }
 0x618   :  { %v832_v8 = vadd.f32 %v2139_v6, %v831_v7  ;;  %v1017_v7 = vld [vmem:[%s3153_s16 + $0x28] sm:$0xff] }
 0x619   :  { %1040 = vmatpush.msrb.mxu2 %v1017_v7 }
 0x61a   :  { %v2728_v33 = vadd.f32 %v832_v8, %v2509_v43 }
 0x61c   :  { %v841_v9 = vsel %vm3186_vm4, %v2728_v33, 0.0 }
 0x61d   :  { %842 = vadd.xlane.f32.xlu0 %v841_v9 }
 0x61f   :  { %v834_v10 = vpop.f32.mrf.mxu0 }
 0x620   :  { %v835_v11 = vadd.f32 %v2139_v6, %v834_v10  ;;  %v1016_v10 = vld [vmem:[%s3153_s16 + $0x20] sm:$0xff] }
 0x621   :  { %1041 = vmatpush.msrb.mxu2 %v1016_v10 }
 0x622   :  { %v2733_v12 = vadd.f32 %v835_v11, %v2505_v40 }
 0x624   :  { %v844_v13 = vsel %vm3185_vm5, %v2733_v12, 0.0 }
 0x625   :  { %845 = vadd.xlane.f32.xlu2 %v844_v13 }
 0x690   :  { %v843_v14 = vpop.xlane.xlu0 %842 }
 0x691   :  { %v847_v15 = vmul.f32 %v843_v14, %v2515_v52  ;;  %v1015_v14 = vld [vmem:[%s3153_s16 + $0x18] sm:$0xff] }
 0x692   :  { %1042 = vmatpush.msrb.mxu2 %v1015_v14 }
 0x693   :  { %v849_v16 = vsub.f32 %v2728_v33, %v847_v15 }
 0x695   :  { %v851_v43 = vmul.f32 %v849_v16, %v849_v16 }
 0x697   :  { %v853_v17 = vsel %vm3186_vm4, %v851_v43, 0.0  ;;  %v1014_v43 = vld [vmem:[%s3153_s16 + $0x10] sm:$0xff] }
 0x698   :  { %854 = vadd.xlane.f32.xlu1 %v853_v17  ;;  %v846_v19 = vpop.xlane.xlu2 %845  ;;  %1043 = vmatpush.msrb.mxu2 %v1014_v43 }
 0x699   :  { %v848_v20 = vmul.f32 %v846_v19, %v2515_v52 }
 0x69b   :  { %v850_v21 = vsub.f32 %v2733_v12, %v848_v20  ;;  %v1013_v20 = vld [vmem:[%s3153_s16 + $0x8] sm:$0xff] }
 0x69c   :  { %1044 = vmatpush.msrb.mxu2 %v1013_v20 }
 0x69d   :  { %v852_v40 = vmul.f32 %v850_v21, %v850_v21 }
 0x69f   :  { %v856_v22 = vsel %vm3185_vm5, %v852_v40, 0.0 }
 0x6a0   :  { %857 = vadd.xlane.f32.xlu0 %v856_v22 }
 0x70b   :  { %v855_v27 = vpop.xlane.xlu1 %854 }
 0x70c   :  { %v859_v28 = vmul.f32 %v855_v27, %v2515_v52 }
 0x70e   :  { %v861_v18 = vadd.f32 1e-06, %v859_v28 }
 0x710   :  { %2193 = vrsqrt.f32 %v861_v18  ;;  %vm869_vm8 = vweird.f32 %v861_v18 }
 0x713   :  { %v858_v29 = vpop.xlane.xlu0 %857 }
 0x714   :  { %v860_v62 = vmul.f32 %v858_v29, %v2515_v52 }
 0x716   :  { %v2194_v31 = vpop.eup %2193  ;;  %v862_v32 = vadd.f32 1e-06, %v860_v62 }
 0x717   :  { %v864_v36 = vmul.f32 %v2194_v31, %v861_v18  ;;  %vm870_vm7 = vweird.f32 %v2194_v31 }
 0x718   :  { %2195 = vrsqrt.f32 %v862_v32  ;;  %vm871_vm9 = vmor %vm869_vm8, %vm870_vm7  ;;  %vm879_vm11 = vweird.f32 %v862_v32 }
 0x719   :  { %v865_v37 = vmul.f32 %v2194_v31, %v864_v36 }
 0x71b   :  { %v866_v38 = vmul.f32 0.5, %v865_v37 }
 0x71d   :  { %v867_v54 = vsub.f32 1.5, %v866_v38 }
 0x71e   :  { %v2196_v39 = vpop.eup %2195 }
 0x71f   :  { %v868_v41 = vmul.f32 %v2194_v31, %v867_v54  ;;  %v874_v44 = vmul.f32 %v2196_v39, %v862_v32  ;;  %vm880_vm10 = vweird.f32 %v2196_v39 }
 0x720   :  { %vm881_vm12 = vmor %vm879_vm11, %vm880_vm10 }
 0x721   :  { %v872_v30 = vsel %vm871_vm9, %v2194_v31, %v868_v41  ;;  %v875_v45 = vmul.f32 %v2196_v39, %v874_v44 }
 0x722   :  { %v883_v46 = vmul.f32 %v872_v30, %v849_v16 }
 0x723   :  { %v876_v48 = vmul.f32 0.5, %v875_v45 }
 0x724   :  { %v888_v49 = vmul.f32 %v2140_v34, %v883_v46 }
 0x725   :  { %v877_v50 = vsub.f32 1.5, %v876_v48 }
 0x726   :  { %v893_v53 = vadd.f32 %v2141_v47, %v888_v49 }
 0x727   :  { %v878_v58 = vmul.f32 %v2196_v39, %v877_v50 }
 0x728   :  { %2050 = vmatmul.msk.f32.vlgmr.msrb.gmra.mxu1 %vm3186_vm4, %v893_v53 }
 0x729   :  { %v882_v55 = vsel %vm881_vm12, %v2196_v39, %v878_v58 }
 0x72a   :  { %v884_v56 = vmul.f32 %v882_v55, %v850_v21  ;;  %v1012_v21 = vld [vmem:[%s3153_s16] sm:$0xff] }
 0x72b   :  { %1045 = vmatpush.msrb.mxu2 %v1012_v21 }
 0x72c   :  { %v889_v57 = vmul.f32 %v2140_v34, %v884_v56 }
 0x72e   :  { %v894_v59 = vadd.f32 %v2141_v47, %v889_v57 }
 0x730   :  { %2051 = vmatmul.msk.f32.gmra.mxu1 %vm3186_vm4, %v894_v59 }
 0x7a5   :  { %v926_v26 = vpop.f32.mrf.mxu1 }
 0x7a6   :  { %v2768_v61 = vadd.f32 %v2142_v60, %v926_v26 }
 0x7a8   :  { %v2771_v63 = vmul.f32 0.70710677, %v2768_v61  ;;  %v932_v7 = vmul.f32 0.5, %v2768_v61  ;;  %v2143_v61 = vld [vmem:[%s3154_s17] ss:$0 sm:$0xff] }
 0x7aa   :  { %v936_v0 = vand.u32 2147483647, %v2771_v63 }
 0x7ac   :  { %v938_v1 = vmul.f32 0.3275911, %v936_v0  ;;  %v990_v25 = vsub.f32 0.0, %v936_v0 }
 0x7ad   :  { %v929_v2 = vpop.f32.mrf.mxu1 }
 0x7ae   :  { %v940_v3 = vadd.f32 1.0, %v938_v1  ;;  %v2774_v4 = vadd.f32 %v2142_v60, %v929_v2  ;;  %v992_v31 = vmul.f32 %v990_v25, %v936_v0 }
 0x7b0   :  { %2197 = vrcp.f32 %v940_v3  ;;  %v2780_v5 = vmul.f32 0.70710677, %v2774_v4  ;;  %v953_v16 = vand.u32 2147483648, %v940_v3  ;;  %v951_v19 = vand.u32 2147483647, %v940_v3 }
 0x7b1   :  { %vm947_vm8 = vweird.f32 %v940_v3  ;;  %v994_v41 = vmul.f32 1.442695, %v992_v31  ;;  %v2058_v31 = vld [vmem:[%s3145_s8 + $0x30] sm:$0xff] }
 0x7b2   :  { %v937_v6 = vand.u32 2147483647, %v2780_v5  ;;  %v954_v22 = vor.u32 1.1754944e-38, %v953_v16  ;;  %vm952_vm10 = vcmp.eq.f32.partialorder %v951_v19, 8.507059e+37  ;;  %v933_v16 = vmul.f32 0.5, %v2774_v4 }
 0x7b4   :  { %v939_v8 = vmul.f32 0.3275911, %v937_v6  ;;  %v991_v30 = vsub.f32 0.0, %v937_v6 }
 0x7b6   :  { %v2198_v9 = vpop.eup %2197  ;;  %v941_v13 = vadd.f32 1.0, %v939_v8  ;;  %v993_v50 = vmul.f32 %v991_v30, %v937_v6 }
 0x7b7   :  { %v943_v11 = vmul.f32 %v2198_v9, %v940_v3  ;;  %vm948_vm7 = vweird.f32 %v2198_v9 }
 0x7b8   :  { %2199 = vrcp.f32 %v941_v13  ;;  %vm949_vm9 = vmor %vm947_vm8, %vm948_vm7  ;;  %v968_v62 = vand.u32 2147483648, %v941_v13  ;;  %v966_v36 = vand.u32 2147483647, %v941_v13  ;;  %vm962_vm12 = vweird.f32 %v941_v13 }
 0x7b9   :  { %v944_v15 = vsub.f32 1.0, %v943_v11  ;;  %2201 = vpow2.f32 %v994_v41  ;;  %v996_v57 = vmul.f32 1.442695, %v993_v50  ;;  %v2144_v50 = vld [vmem:[%s3199_s0 + $0x1] ss:$0 sm:$0xff] }
 0x7ba   :  { %v969_v39 = vor.u32 1.1754944e-38, %v968_v62  ;;  %vm967_vm8 = vcmp.eq.f32.partialorder %v966_v36, 8.507059e+37  ;;  %v2059_v62 = vld [vmem:[%s3145_s8 + $0x38] sm:$0xff]  ;;  %v2056_v36 = vld [vmem:[%s3145_s8 + $0x20] sm:$0xff] }
 0x7bb   :  { %v945_v17 = vmul.f32 %v2198_v9, %v944_v15  ;;  %2203 = vpow2.f32 %v996_v57  ;;  %1141 = vmatpush.msrb.mxu3 %v2059_v62  ;;  %v2145_v57 = vld [vmem:[%s3144_s7 + $0x1] ss:$0 sm:$0xff]  ;;  %s3201_s7 = smov 72  }
 0x7bd   :  { %v946_v40 = vadd.f32 %v2198_v9, %v945_v17  ;;  %1142 = vmatpush.msrb.mxu3 %v2058_v31 }
 0x7be   :  { %v2200_v51 = vpop.eup %2199 }
 0x7bf   :  { %v950_v23 = vsel %vm949_vm9, %v2198_v9, %v946_v40  ;;  %v958_v27 = vmul.f32 %v2200_v51, %v941_v13  ;;  %vm963_vm11 = vweird.f32 %v2200_v51  ;;  %v2202_v59 = vpop.eup %2201  ;;  %vm1002_vm9 = vcmp.ge.f32.partialorder %v2771_v63, 0.0 }
 0x7c0   :  { %v955_v24 = vsel %vm952_vm10, %v954_v22, %v950_v23  ;;  %vm964_vm7 = vmor %vm962_vm12, %vm963_vm11  ;;  %vm1003_vm10 = vcmp.ge.f32.partialorder %v2780_v5, 0.0 }
 0x7c1   :  { %v972_v28 = vmul.f32 1.0614054, %v955_v24  ;;  %v959_v18 = vsub.f32 1.0, %v958_v27  ;;  %v2204_v9 = vpop.eup %2203 }
 0x7c3   :  { %v974_v29 = vadd.f32 -1.4531521, %v972_v28  ;;  %v960_v32 = vmul.f32 %v2200_v51, %v959_v18 }
 0x7c5   :  { %v976_v37 = vmul.f32 %v974_v29, %v955_v24  ;;  %v961_v38 = vadd.f32 %v2200_v51, %v960_v32  ;;  %v2057_v32 = vld [vmem:[%s3145_s8 + $0x28] sm:$0xff]  ;;  %s3207_s8 = smov 48  }
 0x7c6   :  { %1143 = vmatpush.msrb.mxu3 %v2057_v32 }
 0x7c7   :  { %v978_v54 = vadd.f32 1.4214138, %v976_v37  ;;  %v965_v44 = vsel %vm964_vm7, %v2200_v51, %v961_v38 }
 0x7c8   :  { %v970_v45 = vsel %vm967_vm8, %v969_v39, %v965_v44  ;;  %1144 = vmatpush.msrb.mxu3 %v2056_v36 }
 0x7c9   :  { %v980_v34 = vmul.f32 %v978_v54, %v955_v24  ;;  %v973_v46 = vmul.f32 1.0614054, %v970_v45 }
 0x7cb   :  { %v982_v47 = vadd.f32 -0.28449672, %v980_v34  ;;  %v975_v48 = vadd.f32 -1.4531521, %v973_v46 }
 0x7cd   :  { %v984_v49 = vmul.f32 %v982_v47, %v955_v24  ;;  %v977_v53 = vmul.f32 %v975_v48, %v970_v45 }
 0x7cf   :  { %v986_v58 = vadd.f32 0.2548296, %v984_v49  ;;  %v979_v55 = vadd.f32 1.4214138, %v977_v53 }
 0x7d1   :  { %v988_v56 = vmul.f32 %v986_v58, %v955_v24  ;;  %v981_v60 = vmul.f32 %v979_v55, %v970_v45 }
 0x7d3   :  { %v998_v26 = vmul.f32 %v2202_v59, %v988_v56  ;;  %v983_v0 = vadd.f32 -0.28449672, %v981_v60 }
 0x7d5   :  { %v1000_v1 = vsub.f32 1.0, %v998_v26  ;;  %v985_v2 = vmul.f32 %v983_v0, %v970_v45 }
 0x7d7   :  { %v1004_v3 = vsub.f32 0.0, %v1000_v1  ;;  %v987_v35 = vadd.f32 0.2548296, %v985_v2 }
 0x7d9   :  { %v1006_v42 = vsel %vm1002_vm9, %v1000_v1, %v1004_v3  ;;  %v989_v8 = vmul.f32 %v987_v35, %v970_v45 }
 0x7da   :  { %v1008_v6 = vadd.f32 1.0, %v1006_v42 }
 0x7db   :  { %v999_v11 = vmul.f32 %v2204_v9, %v989_v8 }
 0x7dc   :  { %v1010_v10 = vmul.f32 %v1008_v6, %v932_v7  ;;  %v2146_v7 = vld [vmem:[%s3146_s9 + $0x1] ss:$0 sm:$0xff]  ;;  %s3202_s9 = smov 112  }
 0x7dd   :  { %v1001_v13 = vsub.f32 1.0, %v999_v11 }
 0x7de   :  { %2052 = vmatmul.msk.f32.vlgmr.msrb.gmra.mxu2 %vm3184_vm0, %v1010_v10 }
 0x7df   :  { %v1005_v14 = vsub.f32 0.0, %v1001_v13 }
 0x7e1   :  { %v1007_v15 = vsel %vm1003_vm10, %v1001_v13, %v1005_v14 }
 0x7e2   :  { %v1009_v43 = vadd.f32 1.0, %v1007_v15 }
 0x7e4   :  { %v1011_v63 = vmul.f32 %v1009_v43, %v933_v16 }
 0x7e6   :  { %2053 = vmatmul.msk.f32.gmra.mxu2 %vm3184_vm0, %v1011_v63 }
 0x861   :  { %v1047_v17 = vpop.f32.mrf.mxu2 }
 0x862   :  { %v1048_v19 = vadd.f32 %v2143_v61, %v1047_v17 }
 0x864   :  { %v2814_v20 = vadd.f32 %v1048_v19, %v2728_v33 }
 0x866   :  { %v1059_v21 = vsel %vm3186_vm4, %v2814_v20, 0.0 }
 0x867   :  { %1060 = vadd.xlane.f32.xlu2 %v1059_v21 }
 0x869   :  { %v1050_v5 = vpop.f32.mrf.mxu2 }
 0x86a   :  { %v1051_v40 = vadd.f32 %v2143_v61, %v1050_v5 }
 0x86c   :  { %v2819_v4 = vadd.f32 %v1051_v40, %v2733_v12 }
 0x86e   :  { %v1062_v22 = vsel %vm3185_vm5, %v2819_v4, 0.0 }
 0x86f   :  { %1063 = vadd.xlane.f32.xlu1 %v1062_v22 }
 0x8da   :  { %v1061_v51 = vpop.xlane.xlu2 %1060 }
 0x8db   :  { %v1065_v23 = vmul.f32 %v1061_v51, %v2515_v52 }
 0x8dd   :  { %v1067_v24 = vsub.f32 %v2814_v20, %v1065_v23  ;;  %v2255_v23 = vld [vmem:[%s3200_s4] sm:$0xff] }
 0x8df   :  { %v1069_v33 = vmul.f32 %v1067_v24, %v1067_v24 }
 0x8e1   :  { %v1071_v25 = vsel %vm3186_vm4, %v1069_v33, 0.0 }
 0x8e2   :  { %1072 = vadd.xlane.f32.xlu0 %v1071_v25  ;;  %v1064_v27 = vpop.xlane.xlu1 %1063 }
 0x8e3   :  { %v1066_v28 = vmul.f32 %v1064_v27, %v2515_v52 }
 0x8e5   :  { %v1068_v18 = vsub.f32 %v2819_v4, %v1066_v28 }
 0x8e7   :  { %v1070_v12 = vmul.f32 %v1068_v18, %v1068_v18 }
 0x8e9   :  { %v1074_v29 = vsel %vm3185_vm5, %v1070_v12, 0.0  ;;  %v2911_v12 = vld [vmem:[%s3200_s4 + $0x8] sm:$0x3]  ;;  %s3205_s4 = smov 64  }
 0x8ea   :  { %1075 = vadd.xlane.f32.xlu2 %v1074_v29 }
 0x955   :  { %v1073_v37 = vpop.xlane.xlu0 %1072 }
 0x956   :  { %v1077_v38 = vmul.f32 %v1073_v37, %v2515_v52 }
 0x958   :  { %v1079_v54 = vadd.f32 1e-06, %v1077_v38 }
 0x95a   :  { %2205 = vrsqrt.f32 %v1079_v54  ;;  %vm1087_vm12 = vweird.f32 %v1079_v54 }
 0x95d   :  { %v1076_v39 = vpop.xlane.xlu2 %1075 }
 0x95e   :  { %v1078_v41 = vmul.f32 %v1076_v39, %v2515_v52 }
 0x960   :  { %v2206_v44 = vpop.eup %2205  ;;  %v1080_v30 = vadd.f32 1e-06, %v1078_v41 }
 0x961   :  { %v1082_v34 = vmul.f32 %v2206_v44, %v1079_v54  ;;  %vm1088_vm11 = vweird.f32 %v2206_v44 }
 0x962   :  { %2207 = vrsqrt.f32 %v1080_v30  ;;  %vm1089_vm7 = vmor %vm1087_vm12, %vm1088_vm11  ;;  %vm1097_vm9 = vweird.f32 %v1080_v30 }
 0x963   :  { %v1083_v45 = vmul.f32 %v2206_v44, %v1082_v34 }
 0x965   :  { %v1084_v46 = vmul.f32 0.5, %v1083_v45 }
 0x967   :  { %v1085_v47 = vsub.f32 1.5, %v1084_v46 }
 0x968   :  { %v2208_v48 = vpop.eup %2207 }
 0x969   :  { %v1086_v49 = vmul.f32 %v2206_v44, %v1085_v47  ;;  %v1092_v53 = vmul.f32 %v2208_v48, %v1080_v30  ;;  %vm1098_vm8 = vweird.f32 %v2208_v48 }
 0x96a   :  { %vm1099_vm10 = vmor %vm1097_vm9, %vm1098_vm8 }
 0x96b   :  { %v1090_v58 = vsel %vm1089_vm7, %v2206_v44, %v1086_v49  ;;  %v1093_v56 = vmul.f32 %v2208_v48, %v1092_v53 }
 0x96c   :  { %v1101_v55 = vmul.f32 %v1090_v58, %v1067_v24 }
 0x96d   :  { %v1094_v60 = vmul.f32 0.5, %v1093_v56 }
 0x96e   :  { %v1106_v59 = vmul.f32 %v2144_v50, %v1101_v55 }
 0x96f   :  { %v1095_v26 = vsub.f32 1.5, %v1094_v60 }
 0x970   :  { %v1111_v0 = vadd.f32 %v2145_v57, %v1106_v59 }
 0x971   :  { %v1096_v1 = vmul.f32 %v2208_v48, %v1095_v26 }
 0x972   :  { %2061 = vmatmul.msk.f32.vlgmr.msrb.gmra.mxu3 %vm3186_vm4, %v1111_v0 }
 0x973   :  { %v1100_v2 = vsel %vm1099_vm10, %v2208_v48, %v1096_v1 }
 0x974   :  { %v1102_v3 = vmul.f32 %v1100_v2, %v1068_v18 }
 0x976   :  { %v1107_v35 = vmul.f32 %v2144_v50, %v1102_v3 }
 0x978   :  { %v1112_v42 = vadd.f32 %v2145_v57, %v1107_v35 }
 0x97a   :  { %2062 = vmatmul.msk.f32.gmra.mxu3 %vm3186_vm4, %v1112_v42 }
 0x9f5   :  { %v1146_v6 = vpop.f32.mrf.mxu3 }
 0x9f6   :  { %v2854_v8 = vadd.f32 %v2146_v7, %v1146_v6 }
 0x9f8   :  { %1273 = vrot.lane.b32.xlu2 %v2854_v8, %s2285_s24  ;;  %1277 = vrot.lane.b32.xlu0 %v2854_v8, %s2284_s25 }
 0x9fd   :  { %v1149_v9 = vpop.f32.mrf.mxu3 }
 0x9fe   :  { %v2860_v10 = vadd.f32 %v2146_v7, %v1149_v9 }
 0xa00   :  { %1275 = vrot.lane.b32.xlu2 %v2860_v10, %s2285_s24  ;;  %1156 = vrot.lane.b32.xlu0 %v2860_v10, %s2287_s26  ;;  %s3204_s24 = smov 56  }
 0xa01   :  { %1279 = vrot.lane.b32.xlu1 %v2860_v10, %s2284_s25 }
 0xa08   :  { %1519 = vrot.lane.b32.xlu2 %v2854_v8, %s2290_s3  ;;  %1525 = vrot.lane.b32.xlu0 %v2860_v10, %s3201_s7 }
 0xa09   :  { %1154 = vrot.lane.b32.xlu1 %v2854_v8, %s2287_s26 }
 0xa10   :  { %1396 = vrot.lane.b32.xlu2 %v2854_v8, %s3202_s9  ;;  %1402 = vrot.lane.b32.xlu0 %v2860_v10, %s3203_s23 }
 0xa11   :  { %1523 = vrot.lane.b32.xlu1 %v2854_v8, %s3201_s7  ;;  %s2298_s7 = smov [#allocation2]  }
 0xa18   :  { %1360 = vrot.lane.b32.xlu0 %v2854_v8, %s3204_s24 }
 0xa19   :  { %1400 = vrot.lane.b32.xlu1 %v2854_v8, %s3203_s23 }
 0xa21   :  { %1362 = vrot.lane.b32.xlu1 %v2860_v10, %s3204_s24  ;;  %s2008_s24 = sshll.u32 %s3159_s22, 4  ;;  %s2009_s24 = int_to_ptr.hbm [resolvable:$true] %s2008_s24 }
 0xa52   :  { %v1274_v13 = vpop.permute.xlu2 %1273 }
 0xa5a   :  { %v1276_v16 = vpop.permute.xlu2 %1275 }
 0xa62   :  { %v1520_v19 = vpop.permute.xlu2 %1519 }
 0xa6a   :  { %v1278_v11 = vpop.permute.xlu0 %1277  ;;  %v1397_v5 = vpop.permute.xlu2 %1396 }
 0xa72   :  { %v1157_v14 = vpop.permute.xlu0 %1156 }
 0xa73   :  { %v1280_v15 = vpop.permute.xlu1 %1279  ;;  %2063 = vmatpush.xpose.msk.msrb.mxu0 %vm280_vm13, %v1157_v14 }
 0xa74   :  { %2070 = vmatpush.xpose.msk.msra.mxu2 %vm280_vm13, %v1280_v15 }
 0xa78   :  { %2071 = vmatpush.xpose.msk.msra.mxu2 %vm280_vm13, %v1278_v11 }
 0xa7a   :  { %v1526_v43 = vpop.permute.xlu0 %1525 }
 0xa7b   :  { %v1155_v63 = vpop.permute.xlu1 %1154  ;;  %2072 = vmatmul.msk.f32.vlgmr.msra.gmra.mxu2 %vm280_vm13, %v1274_v13 }
 0xa7c   :  { %2064 = vmatpush.xpose.msk.msrb.mxu0 %vm280_vm13, %v1155_v63  ;;  %2084 = vmatpush.xpose.msk.msrb.mxu2 %vm280_vm13, %v1526_v43 }
 0xa7f   :  { %2065 = vmatmul.msk.f32.vlgmr.msrb.gmra.mxu0 %vm280_vm13, %v2854_v8 }
 0xa82   :  { %v1403_v61 = vpop.permute.xlu0 %1402 }
 0xa83   :  { %v1524_v17 = vpop.permute.xlu1 %1523  ;;  %2073 = vmatmul.msk.f32.gmra.mxu2 %vm280_vm13, %v1276_v16  ;;  %2077 = vmatpush.xpose.msk.msra.mxu0 %vm280_vm13, %v1403_v61 }
 0xa84   :  { %2085 = vmatpush.xpose.msk.msrb.mxu2 %vm280_vm13, %v1524_v17 }
 0xa87   :  { %2066 = vmatmul.msk.f32.gmra.mxu0 %vm280_vm13, %v2860_v10 }
 0xa8a   :  { %v1361_v22 = vpop.permute.xlu0 %1360 }
 0xa8b   :  { %v1401_v21 = vpop.permute.xlu1 %1400  ;;  %2086 = vmatmul.msk.f32.vlgmr.msrb.gmra.mxu2 %vm280_vm13, %v1520_v19 }
 0xa8c   :  { %2078 = vmatpush.xpose.msk.msra.mxu0 %vm280_vm13, %v1401_v21 }
 0xa8f   :  { %2079 = vmatmul.msk.f32.vlgmr.msra.gmra.mxu0 %vm280_vm13, %v1397_v5 }
 0xa93   :  { %v1363_v40 = vpop.permute.xlu1 %1362 }
 0xa94   :  { %2074 = vmatpush.msk.msra.mxu3 %vm373_vm2, %v1363_v40 }
 0xa96   :  { %1388 = vmatpush.msra.mxu3 %v1361_v22 }
 0xafc   :  { %v1183_v51 = vpop.f32.mrf.mxu0 }
 0xafd   :  { %v1184_v24 = vadd.f32 %v2255_v23, %v1183_v51 }
 0xafe   :  { %v1306_v33 = vpop.f32.mrf.mxu2 }
 0xaff   :  { %v1307_v25 = vadd.f32 %v2255_v23, %v1306_v33  ;;  %v1189_v27 = vsel %vm312_vm14, %v1184_v24, -inf }
 0xb00   :  { %1190 = vmax.xlane.f32.xlu1 %v1189_v27 }
 0xb01   :  { %v1312_v28 = vsel %vm312_vm14, %v1307_v25, -inf }
 0xb02   :  { %1313 = vmax.xlane.f32.xlu0 %v1312_v28 }
 0xb04   :  { %v1186_v18 = vpop.f32.mrf.mxu0 }
 0xb05   :  { %v1187_v29 = vadd.f32 %v2911_v12, %v1186_v18 }
 0xb06   :  { %v1309_v62 = vpop.f32.mrf.mxu2 }
 0xb07   :  { %v1310_v31 = vadd.f32 %v2911_v12, %v1309_v62  ;;  %v1192_v32 = vsel %vm316_vm15, %v1187_v29, -inf }
 0xb09   :  { %v1315_v36 = vsel %vm316_vm15, %v1310_v31, -inf }
 0xb0a   :  { %1193 = vmax.xlane.f32.xlu0 %v1192_v32  ;;  %1316 = vmax.xlane.f32.xlu2 %v1315_v36 }
 0xb0c   :  { %v1429_v37 = vpop.f32.mrf.mxu0 }
 0xb0d   :  { %v1430_v38 = vadd.f32 %v2255_v23, %v1429_v37 }
 0xb0e   :  { %v1552_v54 = vpop.f32.mrf.mxu2 }
 0xb0f   :  { %v1553_v39 = vadd.f32 %v2255_v23, %v1552_v54  ;;  %v1435_v41 = vsel %vm312_vm14, %v1430_v38, -inf }
 0xb10   :  { %1436 = vmax.xlane.f32.xlu1 %v1435_v41 }
 0xb11   :  { %v1558_v44 = vsel %vm312_vm14, %v1553_v39, -inf }
 0xb12   :  { %1559 = vmax.xlane.f32.xlu2 %v1558_v44 }
 0xb1e   :  { %1237 = vrot.lane.b32.xlu0 %v2854_v8, %s3205_s4 }
 0xb26   :  { %1606 = vrot.lane.b32.xlu0 %v2854_v8, %s3206_s2 }
 0xb29   :  { %1608 = vrot.lane.b32.xlu1 %v2860_v10, %s3206_s2 }
 0xb2a   :  { %1239 = vrot.lane.b32.xlu2 %v2860_v10, %s3205_s4 }
 0xb73   :  { %v1191_v34 = vpop.xlane.xlu1 %1190 }
 0xb74   :  { %v1195_v30 = vsub.f32 %v1184_v24, %v1191_v34 }
 0xb75   :  { %v1314_v45 = vpop.xlane.xlu0 %1313 }
 0xb76   :  { %v1197_v46 = vmul.f32 1.442695, %v1195_v30  ;;  %v1318_v47 = vsub.f32 %v1307_v25, %v1314_v45 }
 0xb78   :  { %2209 = vpow2.f32 %v1197_v46  ;;  %v1320_v48 = vmul.f32 1.442695, %v1318_v47 }
 0xb7a   :  { %2211 = vpow2.f32 %v1320_v48 }
 0xb7d   :  { %v1194_v49 = vpop.xlane.xlu0 %1193  ;;  %v1317_v50 = vpop.xlane.xlu2 %1316 }
 0xb7e   :  { %v2927_v53 = vpop.eup %2209  ;;  %v1196_v58 = vsub.f32 %v1187_v29, %v1194_v49  ;;  %v1319_v55 = vsub.f32 %v1310_v31, %v1317_v50 }
 0xb7f   :  { %v1201_v56 = vsel %vm312_vm14, %v2927_v53, 0.0 }
 0xb80   :  { %v2931_v57 = vpop.eup %2211  ;;  %v1199_v59 = vmul.f32 1.442695, %v1196_v58  ;;  %v1322_v60 = vmul.f32 1.442695, %v1319_v55  ;;  %1202 = vadd.xlane.f32.xlu2 %v1201_v56 }
 0xb81   :  { %v1324_v26 = vsel %vm312_vm14, %v2931_v57, 0.0 }
 0xb82   :  { %2213 = vpow2.f32 %v1199_v59  ;;  %1325 = vadd.xlane.f32.xlu0 %v1324_v26 }
 0xb83   :  { %2215 = vpow2.f32 %v1322_v60  ;;  %v1437_v0 = vpop.xlane.xlu1 %1436 }
 0xb84   :  { %v1441_v1 = vsub.f32 %v1430_v38, %v1437_v0 }
 0xb85   :  { %v1560_v2 = vpop.xlane.xlu2 %1559 }
 0xb86   :  { %v1443_v3 = vmul.f32 1.442695, %v1441_v1  ;;  %v1564_v35 = vsub.f32 %v1553_v39, %v1560_v2 }
 0xb88   :  { %v2935_v42 = vpop.eup %2213  ;;  %2217 = vpow2.f32 %v1443_v3  ;;  %v1566_v9 = vmul.f32 1.442695, %v1564_v35 }
 0xb89   :  { %v2937_v7 = vpop.eup %2215  ;;  %v1204_v6 = vsel %vm316_vm15, %v2935_v42, 0.0 }
 0xb8a   :  { %1205 = vadd.xlane.f32.xlu0 %v1204_v6  ;;  %v1327_v11 = vsel %vm316_vm15, %v2937_v7, 0.0  ;;  %2219 = vpow2.f32 %v1566_v9 }
 0xb8b   :  { %1328 = vadd.xlane.f32.xlu1 %v1327_v11 }
 0xb8d   :  { %v1240_v13 = vpop.permute.xlu2 %1239 }
 0xb8e   :  { %v2943_v14 = vpop.eup %2217  ;;  %2067 = vmatpush.msk.msra.mxu1 %vm373_vm2, %v1240_v13 }
 0xb8f   :  { %v1447_v15 = vsel %vm312_vm14, %v2943_v14, 0.0 }
 0xb90   :  { %v1238_v16 = vpop.permute.xlu0 %1237  ;;  %1448 = vadd.xlane.f32.xlu2 %v1447_v15  ;;  %v2948_v43 = vpop.eup %2219 }
 0xb91   :  { %1265 = vmatpush.msra.mxu1 %v1238_v16  ;;  %v1570_v63 = vsel %vm312_vm14, %v2948_v43, 0.0 }
 0xb98   :  { %1571 = vadd.xlane.f32.xlu2 %v1570_v63  ;;  %v1607_v17 = vpop.permute.xlu0 %1606 }
 0xb9b   :  { %v1609_v61 = vpop.permute.xlu1 %1608 }
 0xb9c   :  { %2088 = vmatpush.msk.msrb.mxu3 %vm373_vm2, %v1609_v61 }
 0xb9e   :  { %1521 = vrot.lane.b32.xlu0 %v2860_v10, %s2290_s3  ;;  %1634 = vmatpush.msrb.mxu3 %v1607_v17  ;;  %s3208_s3 = smov 8  }
 0xba4   :  { %1485 = vrot.lane.b32.xlu1 %v2860_v10, %s3207_s8 }
 0xbac   :  { %1398 = vrot.lane.b32.xlu1 %v2860_v10, %s3202_s9 }
 0xbb0   :  { %1483 = vrot.lane.b32.xlu2 %v2854_v8, %s3207_s8 }
 0xbf3   :  { %v1203_v19 = vpop.xlane.xlu2 %1202 }
 0xbf4   :  { %2221 = vrcp.f32 %v1203_v19  ;;  %v1216_v33 = vand.u32 2147483647, %v1203_v19  ;;  %v1218_v25 = vand.u32 2147483648, %v1203_v19  ;;  %vm1212_vm12 = vweird.f32 %v1203_v19 }
 0xbf5   :  { %v1326_v21 = vpop.xlane.xlu0 %1325 }
 0xbf6   :  { %2223 = vrcp.f32 %v1326_v21  ;;  %v1341_v8 = vand.u32 2147483648, %v1326_v21  ;;  %v1339_v62 = vand.u32 2147483647, %v1326_v21  ;;  %v1219_v31 = vor.u32 1.1754944e-38, %v1218_v25 }
 0xbf7   :  { %vm1217_vm9 = vcmp.eq.f32.partialorder %v1216_v33, 8.507059e+37  ;;  %vm1335_vm10 = vweird.f32 %v1326_v21 }
 0xbf8   :  { %v1342_v39 = vor.u32 1.1754944e-38, %v1341_v8  ;;  %vm1340_vm0 = vcmp.eq.f32.partialorder %v1339_v62, 8.507059e+37 }
 0xbfa   :  { %v2222_v5 = vpop.eup %2221 }
 0xbfb   :  { %v1208_v40 = vmul.f32 %v2222_v5, %v1203_v19  ;;  %vm1213_vm11 = vweird.f32 %v2222_v5 }
 0xbfc   :  { %v2224_v22 = vpop.eup %2223  ;;  %vm1214_vm8 = vmor %vm1212_vm12, %vm1213_vm11 }
 0xbfd   :  { %v1209_v51 = vsub.f32 1.0, %v1208_v40  ;;  %v1331_v23 = vmul.f32 %v2224_v22, %v1326_v21  ;;  %v1206_v24 = vpop.xlane.xlu0 %1205  ;;  %vm1336_vm7 = vweird.f32 %v2224_v22 }
 0xbfe   :  { %2225 = vrcp.f32 %v1206_v24  ;;  %v1329_v27 = vpop.xlane.xlu1 %1328  ;;  %vm1337_vm1 = vmor %vm1335_vm10, %vm1336_vm7  ;;  %v1233_v49 = vand.u32 2147483648, %v1206_v24  ;;  %v1231_v55 = vand.u32 2147483647, %v1206_v24 }
 0xbff   :  { %v1210_v28 = vmul.f32 %v2222_v5, %v1209_v51  ;;  %v1332_v10 = vsub.f32 1.0, %v1331_v23  ;;  %2227 = vrcp.f32 %v1329_v27  ;;  %v1356_v60 = vand.u32 2147483648, %v1329_v27 }
 0xc00   :  { %v1354_v26 = vand.u32 2147483647, %v1329_v27  ;;  %v1234_v2 = vor.u32 1.1754944e-38, %v1233_v49  ;;  %vm1350_vm12 = vweird.f32 %v1329_v27 }
 0xc01   :  { %v1211_v18 = vadd.f32 %v2222_v5, %v1210_v28  ;;  %v1333_v29 = vmul.f32 %v2224_v22, %v1332_v10  ;;  %v1357_v6 = vor.u32 1.1754944e-38, %v1356_v60 }
 0xc02   :  { %vm1355_vm10 = vcmp.eq.f32.partialorder %v1354_v26, 8.507059e+37 }
 0xc03   :  { %v1215_v32 = vsel %vm1214_vm8, %v2222_v5, %v1211_v18  ;;  %v1334_v36 = vadd.f32 %v2224_v22, %v1333_v29  ;;  %v1449_v37 = vpop.xlane.xlu2 %1448  ;;  %vm1232_vm8 = vcmp.eq.f32.partialorder %v1231_v55, 8.507059e+37 }
 0xc04   :  { %v2226_v38 = vpop.eup %2225  ;;  %v1220_v54 = vsel %vm1217_vm9, %v1219_v31, %v1215_v32  ;;  %2229 = vrcp.f32 %v1449_v37  ;;  %v1464_v9 = vand.u32 2147483648, %v1449_v37  ;;  %v1462_v63 = vand.u32 2147483647, %v1449_v37 }
 0xc05   :  { %v2228_v41 = vpop.eup %2227  ;;  %v1338_v44 = vsel %vm1337_vm1, %v2224_v22, %v1334_v36  ;;  %v1223_v34 = vmul.f32 %v2226_v38, %v1206_v24  ;;  %v1221_v30 = vmul.f32 %v2927_v53, %v1220_v54  ;;  %vm1228_vm11 = vweird.f32 %v2226_v38 }
 0xc06   :  { %v1343_v45 = vsel %vm1340_vm0, %v1342_v39, %v1338_v44  ;;  %v1346_v46 = vmul.f32 %v2228_v41, %v1329_v27  ;;  %vm1227_vm1 = vweird.f32 %v1206_v24  ;;  %vm1351_vm0 = vweird.f32 %v2228_v41 }
 0xc07   :  { %v1224_v47 = vsub.f32 1.0, %v1223_v34  ;;  %2068 = vmatmul.msk.f32.vlgmr.msra.gmra.mxu1 %vm312_vm14, %v1221_v30  ;;  %v1344_v48 = vmul.f32 %v2931_v57, %v1343_v45  ;;  %vm1229_vm7 = vmor %vm1227_vm1, %vm1228_vm11  ;;  %vm1458_vm4 = vweird.f32 %v1449_v37  ;;  %v1465_v22 = vor.u32 1.1754944e-38, %v1464_v9  ;;  %v2094_v45 = vld [vmem:[%s3147_s10 + $0x38] sm:$0xff] }
 0xc08   :  { %v1347_v50 = vsub.f32 1.0, %v1346_v46  ;;  %vm1352_vm9 = vmor %vm1350_vm12, %vm1351_vm0  ;;  %vm1463_vm1 = vcmp.eq.f32.partialorder %v1462_v63, 8.507059e+37  ;;  %v2093_v46 = vld [vmem:[%s3147_s10 + $0x30] sm:$0xff]  ;;  %1700 = vmatpush.msrb.mxu0 %v2094_v45 }
 0xc09   :  { %v1225_v58 = vmul.f32 %v2226_v38, %v1224_v47  ;;  %2075 = vmatmul.msk.f32.vlgmr.msra.gmra.mxu3 %vm312_vm14, %v1344_v48  ;;  %v2092_v47 = vld [vmem:[%s3147_s10 + $0x28] sm:$0xff] }
 0xc0a   :  { %v2230_v56 = vpop.eup %2229  ;;  %v1348_v59 = vmul.f32 %v2228_v41, %v1347_v50  ;;  %1701 = vmatpush.msrb.mxu0 %v2093_v46 }
 0xc0b   :  { %v1454_v53 = vmul.f32 %v2230_v56, %v1449_v37  ;;  %v1572_v0 = vpop.xlane.xlu2 %1571  ;;  %v1226_v1 = vadd.f32 %v2226_v38, %v1225_v58  ;;  %vm1459_vm5 = vweird.f32 %v2230_v56 }
 0xc0c   :  { %2231 = vrcp.f32 %v1572_v0  ;;  %v1349_v35 = vadd.f32 %v2228_v41, %v1348_v59  ;;  %vm1460_vm11 = vmor %vm1458_vm4, %vm1459_vm5  ;;  %v1587_v24 = vand.u32 2147483648, %v1572_v0  ;;  %v1585_v27 = vand.u32 2147483647, %v1572_v0  ;;  %1702 = vmatpush.msrb.mxu0 %v2092_v47 }
 0xc0d   :  { %v1455_v57 = vsub.f32 1.0, %v1454_v53  ;;  %v1230_v3 = vsel %vm1229_vm7, %v2226_v38, %v1226_v1  ;;  %vm1581_vm4 = vweird.f32 %v1572_v0 }
 0xc0e   :  { %v1235_v11 = vsel %vm1232_vm8, %v1234_v2, %v1230_v3  ;;  %v1353_v16 = vsel %vm1352_vm9, %v2228_v41, %v1349_v35  ;;  %v1588_v8 = vor.u32 1.1754944e-38, %v1587_v24  ;;  %vm1586_vm12 = vcmp.eq.f32.partialorder %v1585_v27, 8.507059e+37 }
 0xc0f   :  { %v1456_v13 = vmul.f32 %v2230_v56, %v1455_v57  ;;  %v1236_v15 = vmul.f32 %v2935_v42, %v1235_v11  ;;  %v1358_v17 = vsel %vm1355_vm10, %v1357_v6, %v1353_v16  ;;  %v3007_v6 = vld [vmem:[%s3148_s11 + $0x1] ss:$0 sm:$0xff] }
 0xc10   :  { %v1522_v61 = vpop.permute.xlu0 %1521  ;;  %v1359_v21 = vmul.f32 %v2937_v7, %v1358_v17 }
 0xc11   :  { %v1457_v19 = vadd.f32 %v2230_v56, %v1456_v13  ;;  %2069 = vmatmul.msk.f32.gmra.mxu1 %vm312_vm14, %v1236_v15  ;;  %2087 = vmatmul.msk.f32.gmra.mxu2 %vm280_vm13, %v1522_v61 }
 0xc12   :  { %v2232_v5 = vpop.eup %2231  ;;  %2076 = vmatmul.msk.f32.gmra.mxu3 %vm312_vm14, %v1359_v21 }
 0xc13   :  { %v1461_v40 = vsel %vm1460_vm11, %v2230_v56, %v1457_v19  ;;  %v1577_v51 = vmul.f32 %v2232_v5, %v1572_v0  ;;  %vm1582_vm0 = vweird.f32 %v2232_v5  ;;  %v1484_v7 = vpop.permute.xlu2 %1483 }
 0xc14   :  { %v1466_v42 = vsel %vm1463_vm1, %v1465_v22, %v1461_v40  ;;  %vm1583_vm5 = vmor %vm1581_vm4, %vm1582_vm0 }
 0xc15   :  { %v1578_v23 = vsub.f32 1.0, %v1577_v51  ;;  %v1467_v28 = vmul.f32 %v2943_v14, %v1466_v42 }
 0xc16   :  { %v1486_v33 = vpop.permute.xlu1 %1485 }
 0xc17   :  { %v1579_v25 = vmul.f32 %v2232_v5, %v1578_v23  ;;  %2081 = vmatpush.msk.msrb.mxu1 %vm373_vm2, %v1486_v33  ;;  %vm3210_vm2 = vcmask 261120  }
 0xc18   :  { %vm3211_vm7 = vmmov %vm3210_vm2 }
 0xc19   :  { %v1580_v10 = vadd.f32 %v2232_v5, %v1579_v25  ;;  %1511 = vmatpush.msrb.mxu1 %v1484_v7 }
 0xc1a   :  { %2082 = vmatmul.msk.f32.vlgmr.msrb.gmra.mxu1 %vm312_vm14, %v1467_v28 }
 0xc1b   :  { %v1584_v18 = vsel %vm1583_vm5, %v2232_v5, %v1580_v10  ;;  %vm3212_vm5 = vmmov %vm3210_vm2 }
 0xc1c   :  { %v1589_v29 = vsel %vm1586_vm12, %v1588_v8, %v1584_v18 }
 0xc1d   :  { %v1590_v62 = vmul.f32 %v2948_v43, %v1589_v29 }
 0xc1e   :  { %v1399_v31 = vpop.permute.xlu1 %1398 }
 0xc1f   :  { %2080 = vmatmul.msk.f32.gmra.mxu0 %vm280_vm13, %v1399_v31  ;;  %2089 = vmatmul.msk.f32.vlgmr.msrb.gmra.mxu3 %vm312_vm14, %v1590_v62 }
 0xc84   :  { %v1267_v32 = vpop.f32.mrf.mxu1 }
 0xc8c   :  { %v1390_v36 = vpop.f32.mrf.mxu3 }
 0xc8d   :  { %1644 = vrot.lane.b32.xlu2 %v1390_v36, %s3208_s3 }
 0xc8e   :  { %v2977_v14 = vpop.f32.mrf.mxu1 }
 0xc94   :  { %v1555_v39 = vpop.f32.mrf.mxu2 }
 0xc95   :  { %v1393_v38 = vpop.f32.mrf.mxu3  ;;  %v1556_v43 = vadd.f32 %v2911_v12, %v1555_v39 }
 0xc97   :  { %v1513_v37 = vpop.f32.mrf.mxu1  ;;  %v1561_v41 = vsel %vm316_vm15, %v1556_v43, -inf }
 0xc98   :  { %1652 = vrot.lane.b32.xlu0 %v1513_v37, %s2297_s30 }
 0xc9c   :  { %v1432_v44 = vpop.f32.mrf.mxu0 }
 0xc9d   :  { %v1433_v34 = vadd.f32 %v2911_v12, %v1432_v44  ;;  %v2091_v12 = vld [vmem:[%s3147_s10 + $0x20] sm:$0xff]  ;;  %v2101_v44 = vld [vmem:[%s3151_s14 + $0x28] sm:$0xff] }
 0xc9e   :  { %1703 = vmatpush.msrb.mxu0 %v2091_v12 }
 0xc9f   :  { %v1438_v30 = vsel %vm316_vm15, %v1433_v34, -inf }
 0xca2   :  { %v1636_v54 = vpop.f32.mrf.mxu3 }
 0xca3   :  { %1660 = vrot.lane.b32.xlu1 %v1636_v54, %s3209_s27 }
 0xcb6   :  { %1562 = vmax.xlane.f32.xlu2 %v1561_v41  ;;  %v2102_v41 = vld [vmem:[%s3151_s14 + $0x30] sm:$0xff] }
 0xcc2   :  { %1439 = vmax.xlane.f32.xlu0 %v1438_v30 }
 0xce7   :  { %v1645_v48 = vpop.permute.xlu2 %1644 }
 0xce8   :  { %v1666_v50 = vsel %vm280_vm13, %v1267_v32, %v1645_v48 }
 0xd0a   :  { %v1653_v49 = vpop.permute.xlu0 %1652 }
 0xd0b   :  { %v1668_v58 = vsel %vm794_vm3, %v1666_v50, %v1653_v49 }
 0xd15   :  { %v1661_v55 = vpop.permute.xlu1 %1660 }
 0xd16   :  { %v1670_v56 = vsel %vm797_vm6, %v1668_v58, %v1661_v55  ;;  %v3038_v55 = vld [vmem:[%s3149_s12 + $0x1] ss:$0 sm:$0xff] }
 0xd17   :  { %2096 = vmatmul.msk.f32.vlgmr.msrb.gmra.mxu0 %vm3210_vm2, %v1670_v56 }
 0xd29   :  { %v1563_v59 = vpop.xlane.xlu2 %1562 }
 0xd2a   :  { %v1565_v60 = vsub.f32 %v1556_v43, %v1563_v59  ;;  %v2103_v43 = vld [vmem:[%s3151_s14 + $0x38] sm:$0xff] }
 0xd2b   :  { %1799 = vmatpush.msra.mxu1 %v2103_v43 }
 0xd2c   :  { %v1568_v26 = vmul.f32 1.442695, %v1565_v60  ;;  %v3043_v60 = vld [vmem:[%s3150_s13 + $0x1] ss:$0 sm:$0xff] }
 0xd2d   :  { %1800 = vmatpush.msra.mxu1 %v2102_v41 }
 0xd2e   :  { %2233 = vpow2.f32 %v1568_v26 }
 0xd2f   :  { %1801 = vmatpush.msra.mxu1 %v2101_v44 }
 0xd34   :  { %v2234_v53 = vpop.eup %2233 }
 0xd35   :  { %v1440_v0 = vpop.xlane.xlu0 %1439  ;;  %v1573_v1 = vsel %vm316_vm15, %v2234_v53, 0.0 }
 0xd36   :  { %v1442_v2 = vsub.f32 %v1433_v34, %v1440_v0  ;;  %1574 = vadd.xlane.f32.xlu1 %v1573_v1  ;;  %v2100_v34 = vld [vmem:[%s3151_s14 + $0x20] sm:$0xff] }
 0xd37   :  { %1802 = vmatpush.msra.mxu1 %v2100_v34 }
 0xd38   :  { %v1445_v57 = vmul.f32 1.442695, %v1442_v2 }
 0xd3a   :  { %2235 = vpow2.f32 %v1445_v57 }
 0xd40   :  { %v2236_v3 = vpop.eup %2235 }
 0xd41   :  { %v1450_v35 = vsel %vm316_vm15, %v2236_v3, 0.0 }
 0xd42   :  { %1451 = vadd.xlane.f32.xlu2 %v1450_v35 }
 0xd5a   :  { %1646 = vrot.lane.b32.xlu2 %v1393_v38, %s3208_s3 }
 0xd94   :  { %v1705_v9 = vpop.f32.mrf.mxu0 }
 0xd95   :  { %v1706_v11 = vadd.f32 %v3007_v6, %v1705_v9  ;;  %v3056_v9 = vld [vmem:[%s3152_s15 + $0x1] ss:$0 sm:$0xff]  ;;  %s2006_s15 = sshll.u32 %s2298_s7, 4  ;;  %s2007_s15 = int_to_ptr.vmem [resolvable:$true] %s2006_s15 }
 0xd97   :  { %v3011_v13 = vadd.f32 %v1706_v11, %v2814_v20 }
 0xd99   :  { %v1717_v15 = vsel %vm3211_vm7, %v3011_v13, 0.0  ;;  %vm3213_vm7 = vmmov %vm3212_vm5 }
 0xd9a   :  { %1718 = vadd.xlane.f32.xlu0 %v1717_v15 }
 0xda9   :  { %v1575_v16 = vpop.xlane.xlu1 %1574 }
 0xdaa   :  { %2237 = vrcp.f32 %v1575_v16  ;;  %v1602_v19 = vand.u32 2147483648, %v1575_v16  ;;  %v1600_v40 = vand.u32 2147483647, %v1575_v16  ;;  %vm1596_vm8 = vweird.f32 %v1575_v16 }
 0xdac   :  { %v1603_v51 = vor.u32 1.1754944e-38, %v1602_v19  ;;  %vm1601_vm10 = vcmp.eq.f32.partialorder %v1600_v40, 8.507059e+37  ;;  %v2113_v19 = vld [vmem:[%s3153_s16 + $0x70] sm:$0xff]  ;;  %v2111_v40 = vld [vmem:[%s3153_s16 + $0x60] sm:$0xff] }
 0xdb0   :  { %v2238_v63 = vpop.eup %2237 }
 0xdb1   :  { %v1592_v61 = vmul.f32 %v2238_v63, %v1575_v16  ;;  %vm1597_vm15 = vweird.f32 %v2238_v63 }
 0xdb2   :  { %vm1598_vm9 = vmor %vm1596_vm8, %vm1597_vm15 }
 0xdb3   :  { %v1593_v17 = vsub.f32 1.0, %v1592_v61  ;;  %vm3214_vm15 = vmmov %vm3212_vm5 }
 0xdb5   :  { %v1594_v21 = vmul.f32 %v2238_v63, %v1593_v17  ;;  %v1452_v5 = vpop.xlane.xlu2 %1451  ;;  %v2114_v17 = vld [vmem:[%s3153_s16 + $0x78] sm:$0xff] }
 0xdb6   :  { %2239 = vrcp.f32 %v1452_v5  ;;  %v1479_v27 = vand.u32 2147483648, %v1452_v5  ;;  %v1477_v28 = vand.u32 2147483647, %v1452_v5  ;;  %vm1473_vm1 = vweird.f32 %v1452_v5  ;;  %1918 = vmatpush.msra.mxu2 %v2114_v17 }
 0xdb7   :  { %v1595_v22 = vadd.f32 %v2238_v63, %v1594_v21  ;;  %v2112_v21 = vld [vmem:[%s3153_s16 + $0x68] sm:$0xff] }
 0xdb8   :  { %v1480_v8 = vor.u32 1.1754944e-38, %v1479_v27  ;;  %vm1478_vm4 = vcmp.eq.f32.partialorder %v1477_v28, 8.507059e+37  ;;  %1919 = vmatpush.msra.mxu2 %v2113_v19  ;;  %v2108_v27 = vld [vmem:[%s3153_s16 + $0x48] sm:$0xff] }
 0xdb9   :  { %v1599_v20 = vsel %vm1598_vm9, %v2238_v63, %v1595_v22  ;;  %vm3215_vm9 = vcmask 254976  }
 0xdba   :  { %v1604_v42 = vsel %vm1601_vm10, %v1603_v51, %v1599_v20  ;;  %1920 = vmatpush.msra.mxu2 %v2112_v21  ;;  %v2110_v51 = vld [vmem:[%s3153_s16 + $0x58] sm:$0xff] }
 0xdbb   :  { %v1605_v23 = vmul.f32 %v2234_v53, %v1604_v42 }
 0xdbc   :  { %v2240_v24 = vpop.eup %2239  ;;  %1921 = vmatpush.msra.mxu2 %v2111_v40 }
 0xdbd   :  { %v1469_v33 = vmul.f32 %v2240_v24, %v1452_v5  ;;  %2090 = vmatmul.msk.f32.gmra.mxu3 %vm312_vm14, %v1605_v23  ;;  %vm1474_vm11 = vweird.f32 %v2240_v24  ;;  %v1647_v0 = vpop.permute.xlu2 %1646  ;;  %v2109_v23 = vld [vmem:[%s3153_s16 + $0x50] sm:$0xff] }
 0xdbe   :  { %vm1475_vm0 = vmor %vm1473_vm1, %vm1474_vm11  ;;  %v1667_v1 = vsel %vm280_vm13, %v2977_v14, %v1647_v0  ;;  %1922 = vmatpush.msra.mxu2 %v2110_v51  ;;  %vm3216_vm11 = vcmask 523264   ;;  %v2151_v0 = vld [vmem:[%s3154_s17 + $0x1] ss:$0 sm:$0xff] }
 0xdbf   :  { %v1470_v25 = vsub.f32 1.0, %v1469_v33  ;;  %vm3217_vm1 = vmmov %vm3215_vm9 }
 0xdc0   :  { %1923 = vmatpush.msra.mxu2 %v2109_v23 }
 0xdc1   :  { %v1471_v7 = vmul.f32 %v2240_v24, %v1470_v25 }
 0xdc2   :  { %1924 = vmatpush.msra.mxu2 %v2108_v27 }
 0xdc3   :  { %v1472_v10 = vadd.f32 %v2240_v24, %v1471_v7  ;;  %v2107_v7 = vld [vmem:[%s3153_s16 + $0x40] sm:$0xff] }
 0xdc4   :  { %1925 = vmatpush.msra.mxu2 %v2107_v7 }
 0xdc5   :  { %v1476_v18 = vsel %vm1475_vm0, %v2240_v24, %v1472_v10  ;;  %vm3218_vm0 = vcmask 1040384  }
 0xdc6   :  { %v1481_v29 = vsel %vm1478_vm4, %v1480_v8, %v1476_v18  ;;  %vm3219_vm4 = vmmov %vm3217_vm1 }
 0xdc7   :  { %v1482_v62 = vmul.f32 %v2236_v3, %v1481_v29 }
 0xdc9   :  { %2083 = vmatmul.msk.f32.gmra.mxu1 %vm312_vm14, %v1482_v62 }
 0xe0d   :  { %v1719_v31 = vpop.xlane.xlu0 %1718 }
 0xe0e   :  { %v1723_v32 = vmul.f32 %v1719_v31, %v2515_v52 }
 0xe10   :  { %v1725_v36 = vsub.f32 %v3011_v13, %v1723_v32 }
 0xe12   :  { %v1727_v37 = vmul.f32 %v1725_v36, %v1725_v36 }
 0xe14   :  { %v1729_v38 = vsel %vm3212_vm5, %v1727_v37, 0.0 }
 0xe15   :  { %1730 = vadd.xlane.f32.xlu1 %v1729_v38 }
 0xe40   :  { %v1639_v54 = vpop.f32.mrf.mxu3 }
 0xe41   :  { %1662 = vrot.lane.b32.xlu1 %v1639_v54, %s3209_s27 }
 0xe46   :  { %v1516_v39 = vpop.f32.mrf.mxu1 }
 0xe47   :  { %1654 = vrot.lane.b32.xlu0 %v1516_v39, %s2297_s30 }
 0xe88   :  { %v1731_v30 = vpop.xlane.xlu1 %1730 }
 0xe89   :  { %v1735_v45 = vmul.f32 %v1731_v30, %v2515_v52 }
 0xe8b   :  { %v1737_v46 = vadd.f32 1e-06, %v1735_v45 }
 0xe8d   :  { %2241 = vrsqrt.f32 %v1737_v46  ;;  %vm1745_vm12 = vweird.f32 %v1737_v46 }
 0xe93   :  { %v2242_v47 = vpop.eup %2241 }
 0xe94   :  { %v1740_v12 = vmul.f32 %v2242_v47, %v1737_v46  ;;  %vm1746_vm14 = vweird.f32 %v2242_v47 }
 0xe95   :  { %vm1747_vm2 = vmor %vm1745_vm12, %vm1746_vm14 }
 0xe96   :  { %v1741_v48 = vmul.f32 %v2242_v47, %v1740_v12 }
 0xe98   :  { %v1742_v49 = vmul.f32 0.5, %v1741_v48 }
 0xe9a   :  { %v1743_v50 = vsub.f32 1.5, %v1742_v49 }
 0xe9c   :  { %v1744_v58 = vmul.f32 %v2242_v47, %v1743_v50 }
 0xe9e   :  { %v1748_v56 = vsel %vm1747_vm2, %v2242_v47, %v1744_v58  ;;  %vm3220_vm2 = vmmov %vm3213_vm7 }
 0xe9f   :  { %v1759_v59 = vmul.f32 %v1748_v56, %v1725_v36 }
 0xea1   :  { %v1764_v26 = vmul.f32 %v3038_v55, %v1759_v59 }
 0xea3   :  { %v1769_v53 = vadd.f32 %v3043_v60, %v1764_v26 }
 0xea5   :  { %2105 = vmatmul.msk.f32.vlgmr.msra.gmra.mxu1 %vm3213_vm7, %v1769_v53  ;;  %vm3221_vm7 = vmmov %vm3217_vm1 }
 0xeb3   :  { %v1663_v57 = vpop.permute.xlu1 %1662 }
 0xeb9   :  { %v1655_v2 = vpop.permute.xlu0 %1654 }
 0xeba   :  { %v1669_v3 = vsel %vm794_vm3, %v1667_v1, %v1655_v2 }
 0xebb   :  { %v1671_v35 = vsel %vm797_vm6, %v1669_v3, %v1663_v57 }
 0xebc   :  { %2097 = vmatmul.msk.f32.gmra.mxu0 %vm3214_vm15, %v1671_v35 }
 0xf22   :  { %v1804_v11 = vpop.f32.mrf.mxu1 }
 0xf23   :  { %v1805_v15 = vadd.f32 %v3056_v9, %v1804_v11 }
 0xf25   :  { %v1812_v16 = vmul.f32 0.70710677, %v1805_v15  ;;  %v1810_v48 = vmul.f32 0.5, %v1805_v15 }
 0xf27   :  { %v1814_v63 = vand.u32 2147483647, %v1812_v16  ;;  %vm1880_vm10 = vcmp.ge.f32.partialorder %v1812_v16, 0.0 }
 0xf29   :  { %v1816_v61 = vmul.f32 0.3275911, %v1814_v63  ;;  %v1868_v31 = vsub.f32 0.0, %v1814_v63 }
 0xf2b   :  { %v1818_v14 = vadd.f32 1.0, %v1816_v61  ;;  %v1870_v38 = vmul.f32 %v1868_v31, %v1814_v63 }
 0xf2d   :  { %2243 = vrcp.f32 %v1818_v14  ;;  %v1831_v42 = vand.u32 2147483648, %v1818_v14  ;;  %v1829_v33 = vand.u32 2147483647, %v1818_v14  ;;  %vm1825_vm3 = vweird.f32 %v1818_v14 }
 0xf2e   :  { %v1872_v43 = vmul.f32 1.442695, %v1870_v38 }
 0xf2f   :  { %v1832_v8 = vor.u32 1.1754944e-38, %v1831_v42  ;;  %vm1830_vm8 = vcmp.eq.f32.partialorder %v1829_v33, 8.507059e+37 }
 0xf30   :  { %2245 = vpow2.f32 %v1872_v43 }
 0xf33   :  { %v2244_v5 = vpop.eup %2243 }
 0xf34   :  { %v1821_v22 = vmul.f32 %v2244_v5, %v1818_v14  ;;  %vm1826_vm13 = vweird.f32 %v2244_v5 }
 0xf35   :  { %vm1827_vm6 = vmor %vm1825_vm3, %vm1826_vm13 }
 0xf36   :  { %v1822_v20 = vsub.f32 1.0, %v1821_v22  ;;  %v2246_v45 = vpop.eup %2245 }
 0xf38   :  { %v1823_v24 = vmul.f32 %v2244_v5, %v1822_v20 }
 0xf39   :  { %v1708_v25 = vpop.f32.mrf.mxu0 }
 0xf3a   :  { %v1824_v28 = vadd.f32 %v2244_v5, %v1823_v24  ;;  %v1709_v10 = vadd.f32 %v3007_v6, %v1708_v25 }
 0xf3c   :  { %v1828_v18 = vsel %vm1827_vm6, %v2244_v5, %v1824_v28  ;;  %v1712_v29 = vadd.f32 %v1709_v10, %v2819_v4  ;;  %v1971_v10 = vld [vmem:[%s3157_s20 + $0x10] sm:$0xff] }
 0xf3d   :  { %v1833_v62 = vsel %vm1830_vm8, %v1832_v8, %v1828_v18  ;;  %v1969_v18 = vld [vmem:[%s3157_s20] sm:$0xff] }
 0xf3e   :  { %v1850_v32 = vmul.f32 1.0614054, %v1833_v62  ;;  %v1720_v36 = vsel %vm3215_vm9, %v1712_v29, 0.0 }
 0xf3f   :  { %1721 = vadd.xlane.f32.xlu0 %v1720_v36 }
 0xf40   :  { %v1852_v37 = vadd.f32 -1.4531521, %v1850_v32 }
 0xf42   :  { %v1854_v54 = vmul.f32 %v1852_v37, %v1833_v62 }
 0xf44   :  { %v1856_v39 = vadd.f32 1.4214138, %v1854_v54 }
 0xf46   :  { %v1858_v6 = vmul.f32 %v1856_v39, %v1833_v62 }
 0xf48   :  { %v1860_v41 = vadd.f32 -0.28449672, %v1858_v6 }
 0xf4a   :  { %v1862_v44 = vmul.f32 %v1860_v41, %v1833_v62 }
 0xf4c   :  { %v1864_v34 = vadd.f32 0.2548296, %v1862_v44 }
 0xf4e   :  { %v1866_v30 = vmul.f32 %v1864_v34, %v1833_v62 }
 0xf50   :  { %v1876_v4 = vmul.f32 %v2246_v45, %v1866_v30 }
 0xf52   :  { %v1878_v46 = vsub.f32 1.0, %v1876_v4 }
 0xf54   :  { %v1882_v47 = vsub.f32 0.0, %v1878_v46 }
 0xf56   :  { %v1884_v12 = vsel %vm1880_vm10, %v1878_v46, %v1882_v47 }
 0xf57   :  { %v1886_v49 = vadd.f32 1.0, %v1884_v12 }
 0xf59   :  { %v1888_v50 = vmul.f32 %v1886_v49, %v1810_v48 }
 0xf5b   :  { %2116 = vmatmul.msk.f32.vlgmr.msra.gmra.mxu2 %vm3216_vm11, %v1888_v50  ;;  %vm3222_vm11 = vmmov %vm3220_vm2 }
 0xfb2   :  { %v1722_v58 = vpop.xlane.xlu0 %1721 }
 0xfb3   :  { %v1724_v56 = vmul.f32 %v1722_v58, %v2515_v52 }
 0xfb5   :  { %v1726_v59 = vsub.f32 %v1712_v29, %v1724_v56 }
 0xfb7   :  { %v1728_v26 = vmul.f32 %v1726_v59, %v1726_v59 }
 0xfb9   :  { %v1732_v53 = vsel %vm3217_vm1, %v1728_v26, 0.0 }
 0xfba   :  { %1733 = vadd.xlane.f32.xlu2 %v1732_v53 }
 0xfde   :  { %v1927_v1 = vpop.f32.mrf.mxu2 }
 0xfdf   :  { %v1928_v2 = vadd.f32 %v2151_v0, %v1927_v1  ;;  %v2153_v1 = vld [vmem:[%s3156_s19] ss:$0 sm:$0xff] }
 0xfe1   :  { %v1932_v57 = vadd.f32 %v1928_v2, %v3011_v13 }
 0xfe3   :  { %v1934_v3 = vrot.slane %v1932_v57, 4 }
 0xfe5   :  { %v1936_v35 = vsel %vm3218_vm0, %v1932_v57, %v1934_v3  ;;  %vm3223_vm0 = vcmask 523264  }
 0xfe6   :  { %v1939_v11 = vsel %vm3219_vm4, %v1936_v35, 0.0 }
 0xfe7   :  { %1940 = vadd.xlane.f32.xlu1 %v1939_v11 }
0x102d   :  { %v1734_v15 = vpop.xlane.xlu2 %1733 }
0x102e   :  { %v1736_v16 = vmul.f32 %v1734_v15, %v2515_v52 }
0x1030   :  { %v1738_v63 = vadd.f32 1e-06, %v1736_v16 }
0x1032   :  { %2247 = vrsqrt.f32 %v1738_v63  ;;  %vm1755_vm14 = vweird.f32 %v1738_v63 }
0x1038   :  { %v2248_v61 = vpop.eup %2247 }
0x1039   :  { %v1750_v14 = vmul.f32 %v2248_v61, %v1738_v63  ;;  %vm1756_vm5 = vweird.f32 %v2248_v61 }
0x103a   :  { %vm1757_vm12 = vmor %vm1755_vm14, %vm1756_vm5 }
0x103b   :  { %v1751_v17 = vmul.f32 %v2248_v61, %v1750_v14 }
0x103d   :  { %v1752_v19 = vmul.f32 0.5, %v1751_v17 }
0x103f   :  { %v1753_v21 = vsub.f32 1.5, %v1752_v19 }
0x1041   :  { %v1754_v5 = vmul.f32 %v2248_v61, %v1753_v21 }
0x1043   :  { %v1758_v13 = vsel %vm1757_vm12, %v2248_v61, %v1754_v5 }
0x1044   :  { %v1760_v40 = vmul.f32 %v1758_v13, %v1726_v59  ;;  %v2152_v59 = vld [vmem:[%s3155_s18] ss:$0 sm:$0xff] }
0x1045   :  { %v2154_v13 = vld [vmem:[%s3158_s21] ss:$0 sm:$0xff] }
0x1046   :  { %v1765_v22 = vmul.f32 %v3038_v55, %v1760_v40 }
0x1048   :  { %v1770_v51 = vadd.f32 %v3043_v60, %v1765_v22  ;;  %v1972_v60 = vld [vmem:[%s3157_s20 + $0x18] sm:$0xff] }
0x1049   :  { %1992 = vmatpush.msra.mxu3 %v1972_v60 }
0x104a   :  { %2106 = vmatmul.msk.f32.gmra.mxu1 %vm3220_vm2, %v1770_v51 }
0x104b   :  { %1993 = vmatpush.msra.mxu3 %v1971_v10 }
0x105a   :  { %v1941_v20 = vpop.xlane.xlu1 %1940 }
0x105b   :  { %v1942_v42 = vmul.f32 %v1941_v20, %v2515_v52 }
0x105d   :  { %v1943_v23 = vsub.f32 %v1936_v35, %v1942_v42 }
0x105f   :  { %v1944_v24 = vmul.f32 %v1943_v23, %v1943_v23 }
0x1061   :  { %v1945_v33 = vsel %vm3221_vm7, %v1944_v24, 0.0 }
0x1062   :  { %1946 = vadd.xlane.f32.xlu0 %v1945_v33 }
0x10c7   :  { %v1807_v25 = vpop.f32.mrf.mxu1 }
0x10c8   :  { %v3102_v27 = vadd.f32 %v3056_v9, %v1807_v25  ;;  %v1970_v9 = vld [vmem:[%s3157_s20 + $0x8] sm:$0xff] }
0x10c9   :  { %1994 = vmatpush.msra.mxu3 %v1970_v9 }
0x10ca   :  { %v3105_v7 = vmul.f32 0.70710677, %v3102_v27  ;;  %v1811_v19 = vmul.f32 0.5, %v3102_v27 }
0x10cb   :  { %1995 = vmatpush.msra.mxu3 %v1969_v18 }
0x10cc   :  { %v1815_v55 = vand.u32 2147483647, %v3105_v7  ;;  %vm1881_vm1 = vcmp.ge.f32.partialorder %v3105_v7, 0.0 }
0x10ce   :  { %v1817_v28 = vmul.f32 0.3275911, %v1815_v55  ;;  %v1869_v30 = vsub.f32 0.0, %v1815_v55 }
0x10d0   :  { %v1819_v8 = vadd.f32 1.0, %v1817_v28  ;;  %v1871_v12 = vmul.f32 %v1869_v30, %v1815_v55 }
0x10d2   :  { %2249 = vrcp.f32 %v1819_v8  ;;  %v1846_v38 = vand.u32 2147483648, %v1819_v8  ;;  %v1844_v39 = vand.u32 2147483647, %v1819_v8  ;;  %vm1840_vm13 = vweird.f32 %v1819_v8 }
0x10d3   :  { %v1874_v56 = vmul.f32 1.442695, %v1871_v12 }
0x10d4   :  { %v1847_v41 = vor.u32 1.1754944e-38, %v1846_v38  ;;  %vm1845_vm6 = vcmp.eq.f32.partialorder %v1844_v39, 8.507059e+37 }
0x10d5   :  { %v1947_v29 = vpop.xlane.xlu0 %1946 }
0x10d6   :  { %v1948_v62 = vmul.f32 %v1947_v29, %v2515_v52 }
0x10d8   :  { %v2250_v31 = vpop.eup %2249  ;;  %v1949_v32 = vadd.f32 1e-06, %v1948_v62 }
0x10d9   :  { %v1836_v36 = vmul.f32 %v2250_v31, %v1819_v8  ;;  %vm1841_vm15 = vweird.f32 %v2250_v31 }
0x10da   :  { %2251 = vrsqrt.f32 %v1949_v32  ;;  %vm1842_vm3 = vmor %vm1840_vm13, %vm1841_vm15  ;;  %vm1956_vm9 = vweird.f32 %v1949_v32 }
0x10db   :  { %v1837_v37 = vsub.f32 1.0, %v1836_v36  ;;  %2253 = vpow2.f32 %v1874_v56 }
0x10dd   :  { %v1838_v54 = vmul.f32 %v2250_v31, %v1837_v37 }
0x10df   :  { %v1839_v43 = vadd.f32 %v2250_v31, %v1838_v54 }
0x10e0   :  { %v2252_v6 = vpop.eup %2251 }
0x10e1   :  { %v1951_v44 = vmul.f32 %v2252_v6, %v1949_v32  ;;  %v1843_v34 = vsel %vm1842_vm3, %v2250_v31, %v1839_v43  ;;  %vm1957_vm8 = vweird.f32 %v2252_v6  ;;  %v2254_v16 = vpop.eup %2253 }
0x10e2   :  { %v1848_v45 = vsel %vm1845_vm6, %v1847_v41, %v1843_v34  ;;  %vm1958_vm10 = vmor %vm1956_vm9, %vm1957_vm8 }
0x10e3   :  { %v1952_v52 = vmul.f32 %v2252_v6, %v1951_v44  ;;  %v1851_v4 = vmul.f32 1.0614054, %v1848_v45 }
0x10e5   :  { %v1953_v46 = vmul.f32 0.5, %v1952_v52  ;;  %v1853_v47 = vadd.f32 -1.4531521, %v1851_v4 }
0x10e7   :  { %v1954_v48 = vsub.f32 1.5, %v1953_v46  ;;  %v1855_v49 = vmul.f32 %v1853_v47, %v1848_v45 }
0x10e9   :  { %v1955_v50 = vmul.f32 %v2252_v6, %v1954_v48  ;;  %v1857_v58 = vadd.f32 1.4214138, %v1855_v49 }
0x10eb   :  { %v1959_v26 = vsel %vm1958_vm10, %v2252_v6, %v1955_v50  ;;  %v1859_v53 = vmul.f32 %v1857_v58, %v1848_v45 }
0x10ec   :  { %v1960_v0 = vmul.f32 %v1959_v26, %v1943_v23 }
0x10ed   :  { %v1861_v2 = vadd.f32 -0.28449672, %v1859_v53 }
0x10ee   :  { %v1964_v57 = vmul.f32 %v2152_v59, %v1960_v0 }
0x10ef   :  { %v1863_v3 = vmul.f32 %v1861_v2, %v1848_v45 }
0x10f0   :  { %v1968_v35 = vadd.f32 %v2153_v1, %v1964_v57 }
0x10f1   :  { %v1865_v11 = vadd.f32 0.2548296, %v1863_v3 }
0x10f2   :  { %2118 = vmatmul.msk.f32.vlgmr.msra.gmra.mxu3 %vm3222_vm11, %v1968_v35 }
0x10f3   :  { %v1867_v15 = vmul.f32 %v1865_v11, %v1848_v45 }
0x10f5   :  { %v1877_v63 = vmul.f32 %v2254_v16, %v1867_v15 }
0x10f7   :  { %v1879_v61 = vsub.f32 1.0, %v1877_v63 }
0x10f9   :  { %v1883_v14 = vsub.f32 0.0, %v1879_v61 }
0x10fb   :  { %v1885_v17 = vsel %vm1881_vm1, %v1879_v61, %v1883_v14 }
0x10fc   :  { %v1887_v21 = vadd.f32 1.0, %v1885_v17 }
0x10fe   :  { %v1889_v5 = vmul.f32 %v1887_v21, %v1811_v19 }
0x1100   :  { %2117 = vmatmul.msk.f32.gmra.mxu2 %vm3223_vm0, %v1889_v5 }
0x1175   :  { %v1997_v40 = vpop.f32.mrf.mxu3 }
0x1176   :  { %v1998_v22 = vadd.f32 %v2154_v13, %v1997_v40 }
0x1178   :  { %2000 = vst [vmem:[#allocation2] sm:$0x3] %v1998_v22 }
0x1179   :  { %2011 = dma.vmem_to_hbm [thread:$0]  %s2007_s15, 32, %s2009_s24, [#allocation3]  }
0x1183   :  { %v1930_v51 = vpop.f32.mrf.mxu2 }
0x1184   :  { %2281 = dma.done.wait [#allocation3], 32  }
0x1185   :  { %2282 = vsyncadd [#allocation3], 4294967264 }
0x1186   :  { %2016 = vsyncpa [#allocation3], 1 }

</bundles_post_ra>
